<compile_context>
chip_gen: v7x
topology: tpu7x:2x2x1
jax: 0.10.0
libtpu: 0.0.40
codegen_flags: <defaults>
</compile_context>

<pallas_src>
import jax
import jax.numpy as jnp
import numpy as np
from jax import lax
from jax.experimental import pallas as pl
from jax.experimental.pallas import tpu as pltpu


# ---------------------------------------------------------------------------
# Fused kernel (generated per layer count so each layer gets its own refs)
# ---------------------------------------------------------------------------
def _make_fused_kernel(num_layers):
    L = num_layers

    def kernel(*refs):
        # refs = [x2d, h0, (wih, whh, bih, bhh) * L, wfc, bfc,
        #         out, hout, seq, gx_r, gx_z, gx_n]
        x_ref, h0_ref = refs[0], refs[1]
        layer_refs = [tuple(refs[2 + 4 * l: 6 + 4 * l]) for l in range(L)]
        wfc_ref, bfc_ref = refs[2 + 4 * L], refs[3 + 4 * L]
        out_ref, hout_ref = refs[4 + 4 * L], refs[5 + 4 * L]
        seq_ref, gxr_ref, gxz_ref, gxn_ref = refs[6 + 4 * L: 10 + 4 * L]

        c = pl.program_id(0)
        nc = pl.num_programs(0)
        _, Bp, H = h0_ref.shape
        Tt = x_ref.shape[0] // Bp            # timesteps in this chunk

        # chunk 0: load the initial hidden state into the resident carry/output
        @pl.when(c == 0)
        def _():
            hout_ref[...] = h0_ref[...]

        if Tt <= 16:
            unroll = True
        elif Tt % 4 == 0:
            unroll = 4
        else:
            unroll = 1

        def run_layer(layer_idx, in_ref, wih_ref, whh_ref, bih_ref, bhh_ref,
                      write_seq):
            # ---- hoisted, time-invariant input projection for the whole chunk
            #      (fills MXU rows instead of T tiny matmuls) ----
            xin = in_ref[...]                                     # (Tt*Bp, Din)
            gxr_ref[...] = (jnp.dot(xin, wih_ref[0],
                                    preferred_element_type=jnp.float32)
                            + bih_ref[0])
            gxz_ref[...] = (jnp.dot(xin, wih_ref[1],
                                    preferred_element_type=jnp.float32)
                            + bih_ref[1])
            gxn_ref[...] = (jnp.dot(xin, wih_ref[2],
                                    preferred_element_type=jnp.float32)
                            + bih_ref[2])

            whh_r, whh_z, whh_n = whh_ref[0], whh_ref[1], whh_ref[2]
            bhh_r, bhh_z, bhh_n = bhh_ref[0], bhh_ref[1], bhh_ref[2]

            # ---- sequential recurrence: only the h @ W_h matmuls per step ----
            def step(t, h):
                row = t * Bp                                      # Bp % 8 == 0
                gh_r = jnp.dot(h, whh_r, preferred_element_type=jnp.float32) + bhh_r
                gh_z = jnp.dot(h, whh_z, preferred_element_type=jnp.float32) + bhh_z
                gh_n = jnp.dot(h, whh_n, preferred_element_type=jnp.float32) + bhh_n
                r = jax.nn.sigmoid(gxr_ref[pl.ds(row, Bp), :] + gh_r)
                z = jax.nn.sigmoid(gxz_ref[pl.ds(row, Bp), :] + gh_z)
                n = jnp.tanh(gxn_ref[pl.ds(row, Bp), :] + r * gh_n)
                h_new = (1.0 - z) * n + z * h
                if write_seq:                                     # static flag
                    seq_ref[pl.ds(row, Bp), :] = h_new
                return h_new

            h_final = lax.fori_loop(0, Tt, step, hout_ref[layer_idx],
                                    unroll=unroll)
            hout_ref[layer_idx] = h_final

        # layer 0 reads the pipelined x chunk; layers >= 1 read the previous
        # layer's chunk output, which stays resident in the VMEM scratch.
        for l in range(L):
            run_layer(l, x_ref if l == 0 else seq_ref, *layer_refs[l],
                      write_seq=(l < L - 1))

        # fused ReLU + Linear head on the final layer's final hidden state
        # (out[:, -1] of nn.GRU == h_n[-1]); no (T, B, H) writeback needed.
        @pl.when(c == nc - 1)
        def _():
            h_last = jnp.maximum(hout_ref[L - 1], 0.0)
            out_ref[...] = (jnp.dot(h_last, wfc_ref[...],
                                    preferred_element_type=jnp.float32)
                            + bfc_ref[...])

    return kernel


# ---------------------------------------------------------------------------
# Wrapper
# ---------------------------------------------------------------------------
def _round_up(x, m):
    return ((x + m - 1) // m) * m


def _const_index_map(ndim):
    zeros = (0,) * ndim
    return lambda c: zeros


def _pick_time_chunk(T):
    if T <= 64:
        return T
    for tt in (64, 32, 16, 8):
        if T % tt == 0:
            return tt
    return T  # fallback: whole sequence resident


@jax.jit
def gru_model_forward(prepared, x, h):
    """Equivalent of GRUmodel.forward.  x: (B, input_dim, T), h: (L, B, H)."""
    B, D, T = x.shape
    L, _, H = h.shape
    C = prepared["fc_w"].shape[1]

    # torch.reshape(x, (B, T, D)) -- a reshape, NOT a transpose.
    x_btd = jnp.reshape(x, (B, T, D))

    # Pad batch to a multiple of 8 sublanes -> aligned per-step accesses.
    Bp = _round_up(B, 8)
    x_p = jnp.pad(x_btd, ((0, Bp - B), (0, 0), (0, 0)))
    h_p = jnp.pad(h, ((0, 0), (0, Bp - B), (0, 0)))

    # Time-major, flattened to 2-D rows (t-major, then batch) for the kernel.
    x2d = jnp.reshape(jnp.transpose(x_p, (1, 0, 2)), (T * Bp, D))

    Tt = _pick_time_chunk(T)
    n_chunks = T // Tt

    in_specs = [
        pl.BlockSpec((Tt * Bp, D), lambda c: (c, 0)),        # x chunk (pipelined)
        pl.BlockSpec((L, Bp, H), _const_index_map(3)),       # h0 (resident)
    ]
    inputs = [x2d, h_p]
    for lp in prepared["layers"]:
        for name in ("wih", "whh", "bih", "bhh"):
            arr = lp[name]
            in_specs.append(pl.BlockSpec(arr.shape, _const_index_map(arr.ndim)))
            inputs.append(arr)
    in_specs += [pl.BlockSpec(prepared["fc_w"].shape, _const_index_map(2)),
                 pl.BlockSpec(prepared["fc_b"].shape, _const_index_map(2))]
    inputs += [prepared["fc_w"], prepared["fc_b"]]

    out, h_new = pl.pallas_call(
        _make_fused_kernel(L),
        out_shape=(jax.ShapeDtypeStruct((Bp, C), jnp.float32),
                   jax.ShapeDtypeStruct((L, Bp, H), jnp.float32)),
        grid_spec=pltpu.PrefetchScalarGridSpec(
            num_scalar_prefetch=0,
            grid=(n_chunks,),
            in_specs=in_specs,
            out_specs=[pl.BlockSpec((Bp, C), _const_index_map(2)),
                       pl.BlockSpec((L, Bp, H), _const_index_map(3))],
            scratch_shapes=[pltpu.VMEM((Tt * Bp, H), jnp.float32)
                            for _ in range(4)],   # seq, gx_r, gx_z, gx_n
        ),
        compiler_params=pltpu.CompilerParams(
            dimension_semantics=("arbitrary",)),   # serial time-chunk carry
    )(*inputs)

    return out[:B], h_new[:, :B]


# ---------------------------------------------------------------------------
# Parameter init (PyTorch layout) and one-time kernel-friendly preparation
# ---------------------------------------------------------------------------
def init_params(key, input_dim, hidden_dim, n_layers, num_classes):
    k = 1.0 / np.sqrt(hidden_dim)
    params = {"gru": []}
    for l in range(n_layers):
        d_in = input_dim if l == 0 else hidden_dim
        key, k1, k2, k3, k4 = jax.random.split(key, 5)
        params["gru"].append({
            "w_ih": jax.random.uniform(k1, (3 * hidden_dim, d_in),
                                       jnp.float32, -k, k),
            "w_hh": jax.random.uniform(k2, (3 * hidden_dim, hidden_dim),
                                       jnp.float32, -k, k),
            "b_ih": jax.random.uniform(k3, (3 * hidden_dim,), jnp.float32, -k, k),
            "b_hh": jax.random.uniform(k4, (3 * hidden_dim,), jnp.float32, -k, k),
        })
    key, k1, k2 = jax.random.split(key, 3)
    params["fc_w"] = jax.random.uniform(k1, (num_classes, hidden_dim),
                                        jnp.float32, -k, k)
    params["fc_b"] = jax.random.uniform(k2, (num_classes,), jnp.float32, -k, k)
    return params


def prepare_params(params):
    """Pre-transpose / gate-split the weights ONCE (gate-major, matmul-ready)."""
    def split_w(w):                      # (3H, Din) -> (3, Din, H), order (r,z,n)
        H = w.shape[0] // 3
        return jnp.stack([w[g * H:(g + 1) * H, :].T for g in range(3)], axis=0)

    def split_b(b):                      # (3H,) -> (3, 1, H)
        H = b.shape[0] // 3
        return jnp.stack([b[g * H:(g + 1) * H].reshape(1, H) for g in range(3)],
                         axis=0)

    layers = [{"wih": split_w(lp["w_ih"]), "whh": split_w(lp["w_hh"]),
               "bih": split_b(lp["b_ih"]), "bhh": split_b(lp["b_hh"])}
              for lp in params["gru"]]
    return {"layers": layers,
            "fc_w": params["fc_w"].T,                 # (H, C)
            "fc_b": params["fc_b"].reshape(1, -1)}    # (1, C)


# ---------------------------------------------------------------------------
# Pure-JAX reference (PyTorch semantics) for the correctness check
# ---------------------------------------------------------------------------
def gru_model_reference(params, x, h):
    B, D, T = x.shape
    H = h.shape[2]
    layer_in = jnp.reshape(x, (B, T, D))
    h_out = []
    for l, lp in enumerate(params["gru"]):
        w_ih, w_hh, b_ih, b_hh = lp["w_ih"], lp["w_hh"], lp["b_ih"], lp["b_hh"]
        ht = h[l]
        hs = []
        for t in range(T):
            x_t = layer_in[:, t]
            gx = x_t @ w_ih.T + b_ih
            gh = ht @ w_hh.T + b_hh
            r = jax.nn.sigmoid(gx[:, :H] + gh[:, :H])
            z = jax.nn.sigmoid(gx[:, H:2 * H] + gh[:, H:2 * H])
            n = jnp.tanh(gx[:, 2 * H:] + r * gh[:, 2 * H:])
            ht = (1.0 - z) * n + z * ht
            hs.append(ht)
        layer_in = jnp.stack(hs, axis=1)
        h_out.append(ht)
    h_new = jnp.stack(h_out, axis=0)
    out = jnp.maximum(layer_in[:, -1], 0.0) @ params["fc_w"].T + params["fc_b"]
    return out, h_new


# ---------------------------------------------------------------------------
if __name__ == "__main__":
    B, input_dim, T = 2, 4, 8
    hidden_dim, n_layers, num_classes = 32, 2, 5

    key = jax.random.PRNGKey(0)
    key, kx, kh, kp = jax.random.split(key, 4)
    x = jax.random.normal(kx, (B, input_dim, T), jnp.float32)
    h = jax.random.normal(kh, (n_layers, B, hidden_dim), jnp.float32)
    params = init_params(kp, input_dim, hidden_dim, n_layers, num_classes)
    prepared = prepare_params(params)

    out, h_new = gru_model_forward(prepared, x, h)
    out, h_new = jax.block_until_ready((out, h_new))

    out_ref, h_ref = gru_model_reference(params, x, h)
    np.testing.assert_allclose(np.asarray(out), np.asarray(out_ref),
                               rtol=1e-4, atol=1e-4)
    np.testing.assert_allclose(np.asarray(h_new), np.asarray(h_ref),
                               rtol=1e-4, atol=1e-4)

    assert out.shape == (B, num_classes)
    assert h_new.shape == (n_layers, B, hidden_dim)
    print("KERNEL_OK")
</pallas_src>

<mosaic_0001>
module attributes {stable_mosaic.version = 11 : i64} {
  func.func @kernel(%arg0: i32, %arg1: memref<64x4xf32, #tpu.memory_space<vmem>>, %arg2: memref<2x8x32xf32, #tpu.memory_space<vmem>>, %arg3: memref<3x4x32xf32, #tpu.memory_space<vmem>>, %arg4: memref<3x32x32xf32, #tpu.memory_space<vmem>>, %arg5: memref<3x1x32xf32, #tpu.memory_space<vmem>>, %arg6: memref<3x1x32xf32, #tpu.memory_space<vmem>>, %arg7: memref<3x32x32xf32, #tpu.memory_space<vmem>>, %arg8: memref<3x32x32xf32, #tpu.memory_space<vmem>>, %arg9: memref<3x1x32xf32, #tpu.memory_space<vmem>>, %arg10: memref<3x1x32xf32, #tpu.memory_space<vmem>>, %arg11: memref<32x5xf32, #tpu.memory_space<vmem>>, %arg12: memref<1x5xf32, #tpu.memory_space<vmem>>, %arg13: memref<8x5xf32, #tpu.memory_space<vmem>>, %arg14: memref<2x8x32xf32, #tpu.memory_space<vmem>>, %arg15: memref<64x32xf32, #tpu.memory_space<vmem>>, %arg16: memref<64x32xf32, #tpu.memory_space<vmem>>, %arg17: memref<64x32xf32, #tpu.memory_space<vmem>>, %arg18: memref<64x32xf32, #tpu.memory_space<vmem>>) attributes {dimension_semantics = [#tpu.dimension_semantics<arbitrary>], iteration_bounds = array<i64: 1>, scalar_prefetch = 0 : i64, scratch_operands = 4 : i64, tpu.core_type = #tpu.core_type<tc>, window_params = [{transform_indices = @transform_0, window_bounds = array<i64: 64, 4>}, {pipeline_mode = #tpu.pipeline_mode<synchronous>, transform_indices = @transform_1, window_bounds = array<i64: 2, 8, 32>}, {pipeline_mode = #tpu.pipeline_mode<synchronous>, transform_indices = @transform_2, window_bounds = array<i64: 3, 4, 32>}, {pipeline_mode = #tpu.pipeline_mode<synchronous>, transform_indices = @transform_3, window_bounds = array<i64: 3, 32, 32>}, {pipeline_mode = #tpu.pipeline_mode<synchronous>, transform_indices = @transform_4, window_bounds = array<i64: 3, 1, 32>}, {pipeline_mode = #tpu.pipeline_mode<synchronous>, transform_indices = @transform_5, window_bounds = array<i64: 3, 1, 32>}, {pipeline_mode = #tpu.pipeline_mode<synchronous>, transform_indices = @transform_6, window_bounds = array<i64: 3, 32, 32>}, {pipeline_mode = #tpu.pipeline_mode<synchronous>, transform_indices = @transform_7, window_bounds = array<i64: 3, 32, 32>}, {pipeline_mode = #tpu.pipeline_mode<synchronous>, transform_indices = @transform_8, window_bounds = array<i64: 3, 1, 32>}, {pipeline_mode = #tpu.pipeline_mode<synchronous>, transform_indices = @transform_9, window_bounds = array<i64: 3, 1, 32>}, {pipeline_mode = #tpu.pipeline_mode<synchronous>, transform_indices = @transform_10, window_bounds = array<i64: 32, 5>}, {pipeline_mode = #tpu.pipeline_mode<synchronous>, transform_indices = @transform_11, window_bounds = array<i64: 1, 5>}, {pipeline_mode = #tpu.pipeline_mode<synchronous>, transform_indices = @transform_12, window_bounds = array<i64: 8, 5>}, {pipeline_mode = #tpu.pipeline_mode<synchronous>, transform_indices = @transform_13, window_bounds = array<i64: 2, 8, 32>}]} {
    %c0_i32 = arith.constant 0 : i32
    %0 = arith.cmpi eq, %arg0, %c0_i32 : i32
    %1 = arith.extui %0 : i1 to i32
    %c0_i32_0 = arith.constant 0 : i32
    %2 = arith.cmpi ne, %1, %c0_i32_0 : i32
    scf.if %2 {
      %c0_283 = arith.constant 0 : index
      %c0_284 = arith.constant 0 : index
      %c0_285 = arith.constant 0 : index
      %682 = vector.load %arg2[%c0_283, %c0_284, %c0_285] : memref<2x8x32xf32, #tpu.memory_space<vmem>>, vector<2x8x32xf32>
      %c0_286 = arith.constant 0 : index
      %c0_287 = arith.constant 0 : index
      %c0_288 = arith.constant 0 : index
      %683 = vector.load %arg14[%c0_286, %c0_287, %c0_288] : memref<2x8x32xf32, #tpu.memory_space<vmem>>, vector<2x8x32xf32>
      tpu.vector_store %arg14[%c0_286, %c0_287, %c0_288], %682 {strides = array<i32>} : memref<2x8x32xf32, #tpu.memory_space<vmem>>, vector<2x8x32xf32>,
    } else {
    }
    %c0 = arith.constant 0 : index
    %c0_1 = arith.constant 0 : index
    %3 = vector.load %arg1[%c0, %c0_1] : memref<64x4xf32, #tpu.memory_space<vmem>>, vector<64x4xf32>
    %c0_2 = arith.constant 0 : index
    %c0_3 = arith.constant 0 : index
    %c0_4 = arith.constant 0 : index
    %4 = vector.load %arg3[%c0_2, %c0_3, %c0_4] : memref<3x4x32xf32, #tpu.memory_space<vmem>>, vector<1x4x32xf32>
    %5 = vector.shape_cast %4 : vector<1x4x32xf32> to vector<4x32xf32>
    %cst = arith.constant dense<0.000000e+00> : vector<64x32xf32>
    %6 = tpu.matmul %3, %5, %cst {dimension_numbers = #tpu.dot_dimension_numbers<[1], [0], [0], [1], [0, 0, 1, 1], [], []>} : vector<64x4xf32>, vector<4x32xf32>, vector<64x32xf32> -> vector<64x32xf32>
    %c0_5 = arith.constant 0 : index
    %c0_6 = arith.constant 0 : index
    %c0_7 = arith.constant 0 : index
    %7 = vector.load %arg5[%c0_5, %c0_6, %c0_7] : memref<3x1x32xf32, #tpu.memory_space<vmem>>, vector<1x1x32xf32>
    %8 = vector.shape_cast %7 : vector<1x1x32xf32> to vector<1x32xf32>
    %9 = vector.broadcast %8 : vector<1x32xf32> to vector<64x32xf32>
    %10 = arith.addf %6, %9 : vector<64x32xf32>
    %c0_8 = arith.constant 0 : index
    %c0_9 = arith.constant 0 : index
    %11 = vector.load %arg16[%c0_8, %c0_9] : memref<64x32xf32, #tpu.memory_space<vmem>>, vector<64x32xf32>
    tpu.vector_store %arg16[%c0_8, %c0_9], %10 {strides = array<i32>} : memref<64x32xf32, #tpu.memory_space<vmem>>, vector<64x32xf32>,
    %c1 = arith.constant 1 : index
    %c0_10 = arith.constant 0 : index
    %c0_11 = arith.constant 0 : index
    %12 = vector.load %arg3[%c1, %c0_10, %c0_11] : memref<3x4x32xf32, #tpu.memory_space<vmem>>, vector<1x4x32xf32>
    %13 = vector.shape_cast %12 : vector<1x4x32xf32> to vector<4x32xf32>
    %cst_12 = arith.constant dense<0.000000e+00> : vector<64x32xf32>
    %14 = tpu.matmul %3, %13, %cst_12 {dimension_numbers = #tpu.dot_dimension_numbers<[1], [0], [0], [1], [0, 0, 1, 1], [], []>} : vector<64x4xf32>, vector<4x32xf32>, vector<64x32xf32> -> vector<64x32xf32>
    %c1_13 = arith.constant 1 : index
    %c0_14 = arith.constant 0 : index
    %c0_15 = arith.constant 0 : index
    %15 = vector.load %arg5[%c1_13, %c0_14, %c0_15] : memref<3x1x32xf32, #tpu.memory_space<vmem>>, vector<1x1x32xf32>
    %16 = vector.shape_cast %15 : vector<1x1x32xf32> to vector<1x32xf32>
    %17 = vector.broadcast %16 : vector<1x32xf32> to vector<64x32xf32>
    %18 = arith.addf %14, %17 : vector<64x32xf32>
    %c0_16 = arith.constant 0 : index
    %c0_17 = arith.constant 0 : index
    %19 = vector.load %arg17[%c0_16, %c0_17] : memref<64x32xf32, #tpu.memory_space<vmem>>, vector<64x32xf32>
    tpu.vector_store %arg17[%c0_16, %c0_17], %18 {strides = array<i32>} : memref<64x32xf32, #tpu.memory_space<vmem>>, vector<64x32xf32>,
    %c2 = arith.constant 2 : index
    %c0_18 = arith.constant 0 : index
    %c0_19 = arith.constant 0 : index
    %20 = vector.load %arg3[%c2, %c0_18, %c0_19] : memref<3x4x32xf32, #tpu.memory_space<vmem>>, vector<1x4x32xf32>
    %21 = vector.shape_cast %20 : vector<1x4x32xf32> to vector<4x32xf32>
    %cst_20 = arith.constant dense<0.000000e+00> : vector<64x32xf32>
    %22 = tpu.matmul %3, %21, %cst_20 {dimension_numbers = #tpu.dot_dimension_numbers<[1], [0], [0], [1], [0, 0, 1, 1], [], []>} : vector<64x4xf32>, vector<4x32xf32>, vector<64x32xf32> -> vector<64x32xf32>
    %c2_21 = arith.constant 2 : index
    %c0_22 = arith.constant 0 : index
    %c0_23 = arith.constant 0 : index
    %23 = vector.load %arg5[%c2_21, %c0_22, %c0_23] : memref<3x1x32xf32, #tpu.memory_space<vmem>>, vector<1x1x32xf32>
    %24 = vector.shape_cast %23 : vector<1x1x32xf32> to vector<1x32xf32>
    %25 = vector.broadcast %24 : vector<1x32xf32> to vector<64x32xf32>
    %26 = arith.addf %22, %25 : vector<64x32xf32>
    %c0_24 = arith.constant 0 : index
    %c0_25 = arith.constant 0 : index
    %27 = vector.load %arg18[%c0_24, %c0_25] : memref<64x32xf32, #tpu.memory_space<vmem>>, vector<64x32xf32>
    tpu.vector_store %arg18[%c0_24, %c0_25], %26 {strides = array<i32>} : memref<64x32xf32, #tpu.memory_space<vmem>>, vector<64x32xf32>,
    %c0_26 = arith.constant 0 : index
    %c0_27 = arith.constant 0 : index
    %c0_28 = arith.constant 0 : index
    %28 = vector.load %arg4[%c0_26, %c0_27, %c0_28] : memref<3x32x32xf32, #tpu.memory_space<vmem>>, vector<1x32x32xf32>
    %29 = vector.shape_cast %28 : vector<1x32x32xf32> to vector<32x32xf32>
    %c1_29 = arith.constant 1 : index
    %c0_30 = arith.constant 0 : index
    %c0_31 = arith.constant 0 : index
    %30 = vector.load %arg4[%c1_29, %c0_30, %c0_31] : memref<3x32x32xf32, #tpu.memory_space<vmem>>, vector<1x32x32xf32>
    %31 = vector.shape_cast %30 : vector<1x32x32xf32> to vector<32x32xf32>
    %c2_32 = arith.constant 2 : index
    %c0_33 = arith.constant 0 : index
    %c0_34 = arith.constant 0 : index
    %32 = vector.load %arg4[%c2_32, %c0_33, %c0_34] : memref<3x32x32xf32, #tpu.memory_space<vmem>>, vector<1x32x32xf32>
    %33 = vector.shape_cast %32 : vector<1x32x32xf32> to vector<32x32xf32>
    %c0_35 = arith.constant 0 : index
    %c0_36 = arith.constant 0 : index
    %c0_37 = arith.constant 0 : index
    %34 = vector.load %arg6[%c0_35, %c0_36, %c0_37] : memref<3x1x32xf32, #tpu.memory_space<vmem>>, vector<1x1x32xf32>
    %35 = vector.shape_cast %34 : vector<1x1x32xf32> to vector<1x32xf32>
    %c1_38 = arith.constant 1 : index
    %c0_39 = arith.constant 0 : index
    %c0_40 = arith.constant 0 : index
    %36 = vector.load %arg6[%c1_38, %c0_39, %c0_40] : memref<3x1x32xf32, #tpu.memory_space<vmem>>, vector<1x1x32xf32>
    %37 = vector.shape_cast %36 : vector<1x1x32xf32> to vector<1x32xf32>
    %c2_41 = arith.constant 2 : index
    %c0_42 = arith.constant 0 : index
    %c0_43 = arith.constant 0 : index
    %38 = vector.load %arg6[%c2_41, %c0_42, %c0_43] : memref<3x1x32xf32, #tpu.memory_space<vmem>>, vector<1x1x32xf32>
    %39 = vector.shape_cast %38 : vector<1x1x32xf32> to vector<1x32xf32>
    %c0_44 = arith.constant 0 : index
    %c0_45 = arith.constant 0 : index
    %c0_46 = arith.constant 0 : index
    %40 = vector.load %arg14[%c0_44, %c0_45, %c0_46] : memref<2x8x32xf32, #tpu.memory_space<vmem>>, vector<1x8x32xf32>
    %41 = vector.shape_cast %40 : vector<1x8x32xf32> to vector<8x32xf32>
    %c0_i32_47 = arith.constant 0 : i32
    %c8_i32 = arith.constant 8 : i32
    %42 = arith.muli %c0_i32_47, %c8_i32 : i32
    %cst_48 = arith.constant dense<0.000000e+00> : vector<8x32xf32>
    %43 = tpu.matmul %41, %29, %cst_48 {dimension_numbers = #tpu.dot_dimension_numbers<[1], [0], [0], [1], [0, 0, 1, 1], [], []>} : vector<8x32xf32>, vector<32x32xf32>, vector<8x32xf32> -> vector<8x32xf32>
    %44 = vector.broadcast %35 : vector<1x32xf32> to vector<8x32xf32>
    %45 = arith.addf %43, %44 : vector<8x32xf32>
    %cst_49 = arith.constant dense<0.000000e+00> : vector<8x32xf32>
    %46 = tpu.matmul %41, %31, %cst_49 {dimension_numbers = #tpu.dot_dimension_numbers<[1], [0], [0], [1], [0, 0, 1, 1], [], []>} : vector<8x32xf32>, vector<32x32xf32>, vector<8x32xf32> -> vector<8x32xf32>
    %47 = vector.broadcast %37 : vector<1x32xf32> to vector<8x32xf32>
    %48 = arith.addf %46, %47 : vector<8x32xf32>
    %cst_50 = arith.constant dense<0.000000e+00> : vector<8x32xf32>
    %49 = tpu.matmul %41, %33, %cst_50 {dimension_numbers = #tpu.dot_dimension_numbers<[1], [0], [0], [1], [0, 0, 1, 1], [], []>} : vector<8x32xf32>, vector<32x32xf32>, vector<8x32xf32> -> vector<8x32xf32>
    %50 = vector.broadcast %39 : vector<1x32xf32> to vector<8x32xf32>
    %51 = arith.addf %49, %50 : vector<8x32xf32>
    %52 = arith.index_cast %42 : i32 to index
    %c0_51 = arith.constant 0 : index
    %53 = vector.load %arg16[%52, %c0_51] : memref<64x32xf32, #tpu.memory_space<vmem>>, vector<8x32xf32>
    %54 = arith.addf %53, %45 : vector<8x32xf32>
    %55 = arith.negf %54 : vector<8x32xf32>
    %56 = math.exp %55 : vector<8x32xf32>
    %cst_52 = arith.constant 1.000000e+00 : f32
    %57 = vector.broadcast %cst_52 : f32 to vector<8x32xf32>
    %58 = arith.addf %57, %56 : vector<8x32xf32>
    %59 = arith.divf %57, %58 : vector<8x32xf32>
    %60 = arith.index_cast %42 : i32 to index
    %c0_53 = arith.constant 0 : index
    %61 = vector.load %arg17[%60, %c0_53] : memref<64x32xf32, #tpu.memory_space<vmem>>, vector<8x32xf32>
    %62 = arith.addf %61, %48 : vector<8x32xf32>
    %63 = arith.negf %62 : vector<8x32xf32>
    %64 = math.exp %63 : vector<8x32xf32>
    %cst_54 = arith.constant 1.000000e+00 : f32
    %65 = vector.broadcast %cst_54 : f32 to vector<8x32xf32>
    %66 = arith.addf %65, %64 : vector<8x32xf32>
    %67 = arith.divf %65, %66 : vector<8x32xf32>
    %68 = arith.index_cast %42 : i32 to index
    %c0_55 = arith.constant 0 : index
    %69 = vector.load %arg18[%68, %c0_55] : memref<64x32xf32, #tpu.memory_space<vmem>>, vector<8x32xf32>
    %70 = arith.mulf %59, %51 : vector<8x32xf32>
    %71 = arith.addf %69, %70 : vector<8x32xf32>
    %72 = math.tanh %71 : vector<8x32xf32>
    %cst_56 = arith.constant 1.000000e+00 : f32
    %73 = vector.broadcast %cst_56 : f32 to vector<8x32xf32>
    %74 = arith.subf %73, %67 : vector<8x32xf32>
    %75 = arith.mulf %74, %72 : vector<8x32xf32>
    %76 = arith.mulf %67, %41 : vector<8x32xf32>
    %77 = arith.addf %75, %76 : vector<8x32xf32>
    %78 = arith.index_cast %42 : i32 to index
    %c0_57 = arith.constant 0 : index
    %79 = vector.load %arg15[%78, %c0_57] : memref<64x32xf32, #tpu.memory_space<vmem>>, vector<8x32xf32>
    tpu.vector_store %arg15[%78, %c0_57], %77 {strides = array<i32>} : memref<64x32xf32, #tpu.memory_space<vmem>>, vector<8x32xf32>,
    %c1_i32 = arith.constant 1 : i32
    %c8_i32_58 = arith.constant 8 : i32
    %80 = arith.muli %c1_i32, %c8_i32_58 : i32
    %cst_59 = arith.constant dense<0.000000e+00> : vector<8x32xf32>
    %81 = tpu.matmul %77, %29, %cst_59 {dimension_numbers = #tpu.dot_dimension_numbers<[1], [0], [0], [1], [0, 0, 1, 1], [], []>} : vector<8x32xf32>, vector<32x32xf32>, vector<8x32xf32> -> vector<8x32xf32>
    %82 = vector.broadcast %35 : vector<1x32xf32> to vector<8x32xf32>
    %83 = arith.addf %81, %82 : vector<8x32xf32>
    %cst_60 = arith.constant dense<0.000000e+00> : vector<8x32xf32>
    %84 = tpu.matmul %77, %31, %cst_60 {dimension_numbers = #tpu.dot_dimension_numbers<[1], [0], [0], [1], [0, 0, 1, 1], [], []>} : vector<8x32xf32>, vector<32x32xf32>, vector<8x32xf32> -> vector<8x32xf32>
    %85 = vector.broadcast %37 : vector<1x32xf32> to vector<8x32xf32>
    %86 = arith.addf %84, %85 : vector<8x32xf32>
    %cst_61 = arith.constant dense<0.000000e+00> : vector<8x32xf32>
    %87 = tpu.matmul %77, %33, %cst_61 {dimension_numbers = #tpu.dot_dimension_numbers<[1], [0], [0], [1], [0, 0, 1, 1], [], []>} : vector<8x32xf32>, vector<32x32xf32>, vector<8x32xf32> -> vector<8x32xf32>
    %88 = vector.broadcast %39 : vector<1x32xf32> to vector<8x32xf32>
    %89 = arith.addf %87, %88 : vector<8x32xf32>
    %90 = arith.index_cast %80 : i32 to index
    %c0_62 = arith.constant 0 : index
    %91 = vector.load %arg16[%90, %c0_62] : memref<64x32xf32, #tpu.memory_space<vmem>>, vector<8x32xf32>
    %92 = arith.addf %91, %83 : vector<8x32xf32>
    %93 = arith.negf %92 : vector<8x32xf32>
    %94 = math.exp %93 : vector<8x32xf32>
    %cst_63 = arith.constant 1.000000e+00 : f32
    %95 = vector.broadcast %cst_63 : f32 to vector<8x32xf32>
    %96 = arith.addf %95, %94 : vector<8x32xf32>
    %97 = arith.divf %95, %96 : vector<8x32xf32>
    %98 = arith.index_cast %80 : i32 to index
    %c0_64 = arith.constant 0 : index
    %99 = vector.load %arg17[%98, %c0_64] : memref<64x32xf32, #tpu.memory_space<vmem>>, vector<8x32xf32>
    %100 = arith.addf %99, %86 : vector<8x32xf32>
    %101 = arith.negf %100 : vector<8x32xf32>
    %102 = math.exp %101 : vector<8x32xf32>
    %cst_65 = arith.constant 1.000000e+00 : f32
    %103 = vector.broadcast %cst_65 : f32 to vector<8x32xf32>
    %104 = arith.addf %103, %102 : vector<8x32xf32>
    %105 = arith.divf %103, %104 : vector<8x32xf32>
    %106 = arith.index_cast %80 : i32 to index
    %c0_66 = arith.constant 0 : index
    %107 = vector.load %arg18[%106, %c0_66] : memref<64x32xf32, #tpu.memory_space<vmem>>, vector<8x32xf32>
    %108 = arith.mulf %97, %89 : vector<8x32xf32>
    %109 = arith.addf %107, %108 : vector<8x32xf32>
    %110 = math.tanh %109 : vector<8x32xf32>
    %cst_67 = arith.constant 1.000000e+00 : f32
    %111 = vector.broadcast %cst_67 : f32 to vector<8x32xf32>
    %112 = arith.subf %111, %105 : vector<8x32xf32>
    %113 = arith.mulf %112, %110 : vector<8x32xf32>
    %114 = arith.mulf %105, %77 : vector<8x32xf32>
    %115 = arith.addf %113, %114 : vector<8x32xf32>
    %116 = arith.index_cast %80 : i32 to index
    %c0_68 = arith.constant 0 : index
    %117 = vector.load %arg15[%116, %c0_68] : memref<64x32xf32, #tpu.memory_space<vmem>>, vector<8x32xf32>
    tpu.vector_store %arg15[%116, %c0_68], %115 {strides = array<i32>} : memref<64x32xf32, #tpu.memory_space<vmem>>, vector<8x32xf32>,
    %c2_i32 = arith.constant 2 : i32
    %c8_i32_69 = arith.constant 8 : i32
    %118 = arith.muli %c2_i32, %c8_i32_69 : i32
    %cst_70 = arith.constant dense<0.000000e+00> : vector<8x32xf32>
    %119 = tpu.matmul %115, %29, %cst_70 {dimension_numbers = #tpu.dot_dimension_numbers<[1], [0], [0], [1], [0, 0, 1, 1], [], []>} : vector<8x32xf32>, vector<32x32xf32>, vector<8x32xf32> -> vector<8x32xf32>
    %120 = vector.broadcast %35 : vector<1x32xf32> to vector<8x32xf32>
    %121 = arith.addf %119, %120 : vector<8x32xf32>
    %cst_71 = arith.constant dense<0.000000e+00> : vector<8x32xf32>
    %122 = tpu.matmul %115, %31, %cst_71 {dimension_numbers = #tpu.dot_dimension_numbers<[1], [0], [0], [1], [0, 0, 1, 1], [], []>} : vector<8x32xf32>, vector<32x32xf32>, vector<8x32xf32> -> vector<8x32xf32>
    %123 = vector.broadcast %37 : vector<1x32xf32> to vector<8x32xf32>
    %124 = arith.addf %122, %123 : vector<8x32xf32>
    %cst_72 = arith.constant dense<0.000000e+00> : vector<8x32xf32>
    %125 = tpu.matmul %115, %33, %cst_72 {dimension_numbers = #tpu.dot_dimension_numbers<[1], [0], [0], [1], [0, 0, 1, 1], [], []>} : vector<8x32xf32>, vector<32x32xf32>, vector<8x32xf32> -> vector<8x32xf32>
    %126 = vector.broadcast %39 : vector<1x32xf32> to vector<8x32xf32>
    %127 = arith.addf %125, %126 : vector<8x32xf32>
    %128 = arith.index_cast %118 : i32 to index
    %c0_73 = arith.constant 0 : index
    %129 = vector.load %arg16[%128, %c0_73] : memref<64x32xf32, #tpu.memory_space<vmem>>, vector<8x32xf32>
    %130 = arith.addf %129, %121 : vector<8x32xf32>
    %131 = arith.negf %130 : vector<8x32xf32>
    %132 = math.exp %131 : vector<8x32xf32>
    %cst_74 = arith.constant 1.000000e+00 : f32
    %133 = vector.broadcast %cst_74 : f32 to vector<8x32xf32>
    %134 = arith.addf %133, %132 : vector<8x32xf32>
    %135 = arith.divf %133, %134 : vector<8x32xf32>
    %136 = arith.index_cast %118 : i32 to index
    %c0_75 = arith.constant 0 : index
    %137 = vector.load %arg17[%136, %c0_75] : memref<64x32xf32, #tpu.memory_space<vmem>>, vector<8x32xf32>
    %138 = arith.addf %137, %124 : vector<8x32xf32>
    %139 = arith.negf %138 : vector<8x32xf32>
    %140 = math.exp %139 : vector<8x32xf32>
    %cst_76 = arith.constant 1.000000e+00 : f32
    %141 = vector.broadcast %cst_76 : f32 to vector<8x32xf32>
    %142 = arith.addf %141, %140 : vector<8x32xf32>
    %143 = arith.divf %141, %142 : vector<8x32xf32>
    %144 = arith.index_cast %118 : i32 to index
    %c0_77 = arith.constant 0 : index
    %145 = vector.load %arg18[%144, %c0_77] : memref<64x32xf32, #tpu.memory_space<vmem>>, vector<8x32xf32>
    %146 = arith.mulf %135, %127 : vector<8x32xf32>
    %147 = arith.addf %145, %146 : vector<8x32xf32>
    %148 = math.tanh %147 : vector<8x32xf32>
    %cst_78 = arith.constant 1.000000e+00 : f32
    %149 = vector.broadcast %cst_78 : f32 to vector<8x32xf32>
    %150 = arith.subf %149, %143 : vector<8x32xf32>
    %151 = arith.mulf %150, %148 : vector<8x32xf32>
    %152 = arith.mulf %143, %115 : vector<8x32xf32>
    %153 = arith.addf %151, %152 : vector<8x32xf32>
    %154 = arith.index_cast %118 : i32 to index
    %c0_79 = arith.constant 0 : index
    %155 = vector.load %arg15[%154, %c0_79] : memref<64x32xf32, #tpu.memory_space<vmem>>, vector<8x32xf32>
    tpu.vector_store %arg15[%154, %c0_79], %153 {strides = array<i32>} : memref<64x32xf32, #tpu.memory_space<vmem>>, vector<8x32xf32>,
    %c3_i32 = arith.constant 3 : i32
    %c8_i32_80 = arith.constant 8 : i32
    %156 = arith.muli %c3_i32, %c8_i32_80 : i32
    %cst_81 = arith.constant dense<0.000000e+00> : vector<8x32xf32>
    %157 = tpu.matmul %153, %29, %cst_81 {dimension_numbers = #tpu.dot_dimension_numbers<[1], [0], [0], [1], [0, 0, 1, 1], [], []>} : vector<8x32xf32>, vector<32x32xf32>, vector<8x32xf32> -> vector<8x32xf32>
    %158 = vector.broadcast %35 : vector<1x32xf32> to vector<8x32xf32>
    %159 = arith.addf %157, %158 : vector<8x32xf32>
    %cst_82 = arith.constant dense<0.000000e+00> : vector<8x32xf32>
    %160 = tpu.matmul %153, %31, %cst_82 {dimension_numbers = #tpu.dot_dimension_numbers<[1], [0], [0], [1], [0, 0, 1, 1], [], []>} : vector<8x32xf32>, vector<32x32xf32>, vector<8x32xf32> -> vector<8x32xf32>
    %161 = vector.broadcast %37 : vector<1x32xf32> to vector<8x32xf32>
    %162 = arith.addf %160, %161 : vector<8x32xf32>
    %cst_83 = arith.constant dense<0.000000e+00> : vector<8x32xf32>
    %163 = tpu.matmul %153, %33, %cst_83 {dimension_numbers = #tpu.dot_dimension_numbers<[1], [0], [0], [1], [0, 0, 1, 1], [], []>} : vector<8x32xf32>, vector<32x32xf32>, vector<8x32xf32> -> vector<8x32xf32>
    %164 = vector.broadcast %39 : vector<1x32xf32> to vector<8x32xf32>
    %165 = arith.addf %163, %164 : vector<8x32xf32>
    %166 = arith.index_cast %156 : i32 to index
    %c0_84 = arith.constant 0 : index
    %167 = vector.load %arg16[%166, %c0_84] : memref<64x32xf32, #tpu.memory_space<vmem>>, vector<8x32xf32>
    %168 = arith.addf %167, %159 : vector<8x32xf32>
    %169 = arith.negf %168 : vector<8x32xf32>
    %170 = math.exp %169 : vector<8x32xf32>
    %cst_85 = arith.constant 1.000000e+00 : f32
    %171 = vector.broadcast %cst_85 : f32 to vector<8x32xf32>
    %172 = arith.addf %171, %170 : vector<8x32xf32>
    %173 = arith.divf %171, %172 : vector<8x32xf32>
    %174 = arith.index_cast %156 : i32 to index
    %c0_86 = arith.constant 0 : index
    %175 = vector.load %arg17[%174, %c0_86] : memref<64x32xf32, #tpu.memory_space<vmem>>, vector<8x32xf32>
    %176 = arith.addf %175, %162 : vector<8x32xf32>
    %177 = arith.negf %176 : vector<8x32xf32>
    %178 = math.exp %177 : vector<8x32xf32>
    %cst_87 = arith.constant 1.000000e+00 : f32
    %179 = vector.broadcast %cst_87 : f32 to vector<8x32xf32>
    %180 = arith.addf %179, %178 : vector<8x32xf32>
    %181 = arith.divf %179, %180 : vector<8x32xf32>
    %182 = arith.index_cast %156 : i32 to index
    %c0_88 = arith.constant 0 : index
    %183 = vector.load %arg18[%182, %c0_88] : memref<64x32xf32, #tpu.memory_space<vmem>>, vector<8x32xf32>
    %184 = arith.mulf %173, %165 : vector<8x32xf32>
    %185 = arith.addf %183, %184 : vector<8x32xf32>
    %186 = math.tanh %185 : vector<8x32xf32>
    %cst_89 = arith.constant 1.000000e+00 : f32
    %187 = vector.broadcast %cst_89 : f32 to vector<8x32xf32>
    %188 = arith.subf %187, %181 : vector<8x32xf32>
    %189 = arith.mulf %188, %186 : vector<8x32xf32>
    %190 = arith.mulf %181, %153 : vector<8x32xf32>
    %191 = arith.addf %189, %190 : vector<8x32xf32>
    %192 = arith.index_cast %156 : i32 to index
    %c0_90 = arith.constant 0 : index
    %193 = vector.load %arg15[%192, %c0_90] : memref<64x32xf32, #tpu.memory_space<vmem>>, vector<8x32xf32>
    tpu.vector_store %arg15[%192, %c0_90], %191 {strides = array<i32>} : memref<64x32xf32, #tpu.memory_space<vmem>>, vector<8x32xf32>,
    %c4_i32 = arith.constant 4 : i32
    %c8_i32_91 = arith.constant 8 : i32
    %194 = arith.muli %c4_i32, %c8_i32_91 : i32
    %cst_92 = arith.constant dense<0.000000e+00> : vector<8x32xf32>
    %195 = tpu.matmul %191, %29, %cst_92 {dimension_numbers = #tpu.dot_dimension_numbers<[1], [0], [0], [1], [0, 0, 1, 1], [], []>} : vector<8x32xf32>, vector<32x32xf32>, vector<8x32xf32> -> vector<8x32xf32>
    %196 = vector.broadcast %35 : vector<1x32xf32> to vector<8x32xf32>
    %197 = arith.addf %195, %196 : vector<8x32xf32>
    %cst_93 = arith.constant dense<0.000000e+00> : vector<8x32xf32>
    %198 = tpu.matmul %191, %31, %cst_93 {dimension_numbers = #tpu.dot_dimension_numbers<[1], [0], [0], [1], [0, 0, 1, 1], [], []>} : vector<8x32xf32>, vector<32x32xf32>, vector<8x32xf32> -> vector<8x32xf32>
    %199 = vector.broadcast %37 : vector<1x32xf32> to vector<8x32xf32>
    %200 = arith.addf %198, %199 : vector<8x32xf32>
    %cst_94 = arith.constant dense<0.000000e+00> : vector<8x32xf32>
    %201 = tpu.matmul %191, %33, %cst_94 {dimension_numbers = #tpu.dot_dimension_numbers<[1], [0], [0], [1], [0, 0, 1, 1], [], []>} : vector<8x32xf32>, vector<32x32xf32>, vector<8x32xf32> -> vector<8x32xf32>
    %202 = vector.broadcast %39 : vector<1x32xf32> to vector<8x32xf32>
    %203 = arith.addf %201, %202 : vector<8x32xf32>
    %204 = arith.index_cast %194 : i32 to index
    %c0_95 = arith.constant 0 : index
    %205 = vector.load %arg16[%204, %c0_95] : memref<64x32xf32, #tpu.memory_space<vmem>>, vector<8x32xf32>
    %206 = arith.addf %205, %197 : vector<8x32xf32>
    %207 = arith.negf %206 : vector<8x32xf32>
    %208 = math.exp %207 : vector<8x32xf32>
    %cst_96 = arith.constant 1.000000e+00 : f32
    %209 = vector.broadcast %cst_96 : f32 to vector<8x32xf32>
    %210 = arith.addf %209, %208 : vector<8x32xf32>
    %211 = arith.divf %209, %210 : vector<8x32xf32>
    %212 = arith.index_cast %194 : i32 to index
    %c0_97 = arith.constant 0 : index
    %213 = vector.load %arg17[%212, %c0_97] : memref<64x32xf32, #tpu.memory_space<vmem>>, vector<8x32xf32>
    %214 = arith.addf %213, %200 : vector<8x32xf32>
    %215 = arith.negf %214 : vector<8x32xf32>
    %216 = math.exp %215 : vector<8x32xf32>
    %cst_98 = arith.constant 1.000000e+00 : f32
    %217 = vector.broadcast %cst_98 : f32 to vector<8x32xf32>
    %218 = arith.addf %217, %216 : vector<8x32xf32>
    %219 = arith.divf %217, %218 : vector<8x32xf32>
    %220 = arith.index_cast %194 : i32 to index
    %c0_99 = arith.constant 0 : index
    %221 = vector.load %arg18[%220, %c0_99] : memref<64x32xf32, #tpu.memory_space<vmem>>, vector<8x32xf32>
    %222 = arith.mulf %211, %203 : vector<8x32xf32>
    %223 = arith.addf %221, %222 : vector<8x32xf32>
    %224 = math.tanh %223 : vector<8x32xf32>
    %cst_100 = arith.constant 1.000000e+00 : f32
    %225 = vector.broadcast %cst_100 : f32 to vector<8x32xf32>
    %226 = arith.subf %225, %219 : vector<8x32xf32>
    %227 = arith.mulf %226, %224 : vector<8x32xf32>
    %228 = arith.mulf %219, %191 : vector<8x32xf32>
    %229 = arith.addf %227, %228 : vector<8x32xf32>
    %230 = arith.index_cast %194 : i32 to index
    %c0_101 = arith.constant 0 : index
    %231 = vector.load %arg15[%230, %c0_101] : memref<64x32xf32, #tpu.memory_space<vmem>>, vector<8x32xf32>
    tpu.vector_store %arg15[%230, %c0_101], %229 {strides = array<i32>} : memref<64x32xf32, #tpu.memory_space<vmem>>, vector<8x32xf32>,
    %c5_i32 = arith.constant 5 : i32
    %c8_i32_102 = arith.constant 8 : i32
    %232 = arith.muli %c5_i32, %c8_i32_102 : i32
    %cst_103 = arith.constant dense<0.000000e+00> : vector<8x32xf32>
    %233 = tpu.matmul %229, %29, %cst_103 {dimension_numbers = #tpu.dot_dimension_numbers<[1], [0], [0], [1], [0, 0, 1, 1], [], []>} : vector<8x32xf32>, vector<32x32xf32>, vector<8x32xf32> -> vector<8x32xf32>
    %234 = vector.broadcast %35 : vector<1x32xf32> to vector<8x32xf32>
    %235 = arith.addf %233, %234 : vector<8x32xf32>
    %cst_104 = arith.constant dense<0.000000e+00> : vector<8x32xf32>
    %236 = tpu.matmul %229, %31, %cst_104 {dimension_numbers = #tpu.dot_dimension_numbers<[1], [0], [0], [1], [0, 0, 1, 1], [], []>} : vector<8x32xf32>, vector<32x32xf32>, vector<8x32xf32> -> vector<8x32xf32>
    %237 = vector.broadcast %37 : vector<1x32xf32> to vector<8x32xf32>
    %238 = arith.addf %236, %237 : vector<8x32xf32>
    %cst_105 = arith.constant dense<0.000000e+00> : vector<8x32xf32>
    %239 = tpu.matmul %229, %33, %cst_105 {dimension_numbers = #tpu.dot_dimension_numbers<[1], [0], [0], [1], [0, 0, 1, 1], [], []>} : vector<8x32xf32>, vector<32x32xf32>, vector<8x32xf32> -> vector<8x32xf32>
    %240 = vector.broadcast %39 : vector<1x32xf32> to vector<8x32xf32>
    %241 = arith.addf %239, %240 : vector<8x32xf32>
    %242 = arith.index_cast %232 : i32 to index
    %c0_106 = arith.constant 0 : index
    %243 = vector.load %arg16[%242, %c0_106] : memref<64x32xf32, #tpu.memory_space<vmem>>, vector<8x32xf32>
    %244 = arith.addf %243, %235 : vector<8x32xf32>
    %245 = arith.negf %244 : vector<8x32xf32>
    %246 = math.exp %245 : vector<8x32xf32>
    %cst_107 = arith.constant 1.000000e+00 : f32
    %247 = vector.broadcast %cst_107 : f32 to vector<8x32xf32>
    %248 = arith.addf %247, %246 : vector<8x32xf32>
    %249 = arith.divf %247, %248 : vector<8x32xf32>
    %250 = arith.index_cast %232 : i32 to index
    %c0_108 = arith.constant 0 : index
    %251 = vector.load %arg17[%250, %c0_108] : memref<64x32xf32, #tpu.memory_space<vmem>>, vector<8x32xf32>
    %252 = arith.addf %251, %238 : vector<8x32xf32>
    %253 = arith.negf %252 : vector<8x32xf32>
    %254 = math.exp %253 : vector<8x32xf32>
    %cst_109 = arith.constant 1.000000e+00 : f32
    %255 = vector.broadcast %cst_109 : f32 to vector<8x32xf32>
    %256 = arith.addf %255, %254 : vector<8x32xf32>
    %257 = arith.divf %255, %256 : vector<8x32xf32>
    %258 = arith.index_cast %232 : i32 to index
    %c0_110 = arith.constant 0 : index
    %259 = vector.load %arg18[%258, %c0_110] : memref<64x32xf32, #tpu.memory_space<vmem>>, vector<8x32xf32>
    %260 = arith.mulf %249, %241 : vector<8x32xf32>
    %261 = arith.addf %259, %260 : vector<8x32xf32>
    %262 = math.tanh %261 : vector<8x32xf32>
    %cst_111 = arith.constant 1.000000e+00 : f32
    %263 = vector.broadcast %cst_111 : f32 to vector<8x32xf32>
    %264 = arith.subf %263, %257 : vector<8x32xf32>
    %265 = arith.mulf %264, %262 : vector<8x32xf32>
    %266 = arith.mulf %257, %229 : vector<8x32xf32>
    %267 = arith.addf %265, %266 : vector<8x32xf32>
    %268 = arith.index_cast %232 : i32 to index
    %c0_112 = arith.constant 0 : index
    %269 = vector.load %arg15[%268, %c0_112] : memref<64x32xf32, #tpu.memory_space<vmem>>, vector<8x32xf32>
    tpu.vector_store %arg15[%268, %c0_112], %267 {strides = array<i32>} : memref<64x32xf32, #tpu.memory_space<vmem>>, vector<8x32xf32>,
    %c6_i32 = arith.constant 6 : i32
    %c8_i32_113 = arith.constant 8 : i32
    %270 = arith.muli %c6_i32, %c8_i32_113 : i32
    %cst_114 = arith.constant dense<0.000000e+00> : vector<8x32xf32>
    %271 = tpu.matmul %267, %29, %cst_114 {dimension_numbers = #tpu.dot_dimension_numbers<[1], [0], [0], [1], [0, 0, 1, 1], [], []>} : vector<8x32xf32>, vector<32x32xf32>, vector<8x32xf32> -> vector<8x32xf32>
    %272 = vector.broadcast %35 : vector<1x32xf32> to vector<8x32xf32>
    %273 = arith.addf %271, %272 : vector<8x32xf32>
    %cst_115 = arith.constant dense<0.000000e+00> : vector<8x32xf32>
    %274 = tpu.matmul %267, %31, %cst_115 {dimension_numbers = #tpu.dot_dimension_numbers<[1], [0], [0], [1], [0, 0, 1, 1], [], []>} : vector<8x32xf32>, vector<32x32xf32>, vector<8x32xf32> -> vector<8x32xf32>
    %275 = vector.broadcast %37 : vector<1x32xf32> to vector<8x32xf32>
    %276 = arith.addf %274, %275 : vector<8x32xf32>
    %cst_116 = arith.constant dense<0.000000e+00> : vector<8x32xf32>
    %277 = tpu.matmul %267, %33, %cst_116 {dimension_numbers = #tpu.dot_dimension_numbers<[1], [0], [0], [1], [0, 0, 1, 1], [], []>} : vector<8x32xf32>, vector<32x32xf32>, vector<8x32xf32> -> vector<8x32xf32>
    %278 = vector.broadcast %39 : vector<1x32xf32> to vector<8x32xf32>
    %279 = arith.addf %277, %278 : vector<8x32xf32>
    %280 = arith.index_cast %270 : i32 to index
    %c0_117 = arith.constant 0 : index
    %281 = vector.load %arg16[%280, %c0_117] : memref<64x32xf32, #tpu.memory_space<vmem>>, vector<8x32xf32>
    %282 = arith.addf %281, %273 : vector<8x32xf32>
    %283 = arith.negf %282 : vector<8x32xf32>
    %284 = math.exp %283 : vector<8x32xf32>
    %cst_118 = arith.constant 1.000000e+00 : f32
    %285 = vector.broadcast %cst_118 : f32 to vector<8x32xf32>
    %286 = arith.addf %285, %284 : vector<8x32xf32>
    %287 = arith.divf %285, %286 : vector<8x32xf32>
    %288 = arith.index_cast %270 : i32 to index
    %c0_119 = arith.constant 0 : index
    %289 = vector.load %arg17[%288, %c0_119] : memref<64x32xf32, #tpu.memory_space<vmem>>, vector<8x32xf32>
    %290 = arith.addf %289, %276 : vector<8x32xf32>
    %291 = arith.negf %290 : vector<8x32xf32>
    %292 = math.exp %291 : vector<8x32xf32>
    %cst_120 = arith.constant 1.000000e+00 : f32
    %293 = vector.broadcast %cst_120 : f32 to vector<8x32xf32>
    %294 = arith.addf %293, %292 : vector<8x32xf32>
    %295 = arith.divf %293, %294 : vector<8x32xf32>
    %296 = arith.index_cast %270 : i32 to index
    %c0_121 = arith.constant 0 : index
    %297 = vector.load %arg18[%296, %c0_121] : memref<64x32xf32, #tpu.memory_space<vmem>>, vector<8x32xf32>
    %298 = arith.mulf %287, %279 : vector<8x32xf32>
    %299 = arith.addf %297, %298 : vector<8x32xf32>
    %300 = math.tanh %299 : vector<8x32xf32>
    %cst_122 = arith.constant 1.000000e+00 : f32
    %301 = vector.broadcast %cst_122 : f32 to vector<8x32xf32>
    %302 = arith.subf %301, %295 : vector<8x32xf32>
    %303 = arith.mulf %302, %300 : vector<8x32xf32>
    %304 = arith.mulf %295, %267 : vector<8x32xf32>
    %305 = arith.addf %303, %304 : vector<8x32xf32>
    %306 = arith.index_cast %270 : i32 to index
    %c0_123 = arith.constant 0 : index
    %307 = vector.load %arg15[%306, %c0_123] : memref<64x32xf32, #tpu.memory_space<vmem>>, vector<8x32xf32>
    tpu.vector_store %arg15[%306, %c0_123], %305 {strides = array<i32>} : memref<64x32xf32, #tpu.memory_space<vmem>>, vector<8x32xf32>,
    %c7_i32 = arith.constant 7 : i32
    %c8_i32_124 = arith.constant 8 : i32
    %308 = arith.muli %c7_i32, %c8_i32_124 : i32
    %cst_125 = arith.constant dense<0.000000e+00> : vector<8x32xf32>
    %309 = tpu.matmul %305, %29, %cst_125 {dimension_numbers = #tpu.dot_dimension_numbers<[1], [0], [0], [1], [0, 0, 1, 1], [], []>} : vector<8x32xf32>, vector<32x32xf32>, vector<8x32xf32> -> vector<8x32xf32>
    %310 = vector.broadcast %35 : vector<1x32xf32> to vector<8x32xf32>
    %311 = arith.addf %309, %310 : vector<8x32xf32>
    %cst_126 = arith.constant dense<0.000000e+00> : vector<8x32xf32>
    %312 = tpu.matmul %305, %31, %cst_126 {dimension_numbers = #tpu.dot_dimension_numbers<[1], [0], [0], [1], [0, 0, 1, 1], [], []>} : vector<8x32xf32>, vector<32x32xf32>, vector<8x32xf32> -> vector<8x32xf32>
    %313 = vector.broadcast %37 : vector<1x32xf32> to vector<8x32xf32>
    %314 = arith.addf %312, %313 : vector<8x32xf32>
    %cst_127 = arith.constant dense<0.000000e+00> : vector<8x32xf32>
    %315 = tpu.matmul %305, %33, %cst_127 {dimension_numbers = #tpu.dot_dimension_numbers<[1], [0], [0], [1], [0, 0, 1, 1], [], []>} : vector<8x32xf32>, vector<32x32xf32>, vector<8x32xf32> -> vector<8x32xf32>
    %316 = vector.broadcast %39 : vector<1x32xf32> to vector<8x32xf32>
    %317 = arith.addf %315, %316 : vector<8x32xf32>
    %318 = arith.index_cast %308 : i32 to index
    %c0_128 = arith.constant 0 : index
    %319 = vector.load %arg16[%318, %c0_128] : memref<64x32xf32, #tpu.memory_space<vmem>>, vector<8x32xf32>
    %320 = arith.addf %319, %311 : vector<8x32xf32>
    %321 = arith.negf %320 : vector<8x32xf32>
    %322 = math.exp %321 : vector<8x32xf32>
    %cst_129 = arith.constant 1.000000e+00 : f32
    %323 = vector.broadcast %cst_129 : f32 to vector<8x32xf32>
    %324 = arith.addf %323, %322 : vector<8x32xf32>
    %325 = arith.divf %323, %324 : vector<8x32xf32>
    %326 = arith.index_cast %308 : i32 to index
    %c0_130 = arith.constant 0 : index
    %327 = vector.load %arg17[%326, %c0_130] : memref<64x32xf32, #tpu.memory_space<vmem>>, vector<8x32xf32>
    %328 = arith.addf %327, %314 : vector<8x32xf32>
    %329 = arith.negf %328 : vector<8x32xf32>
    %330 = math.exp %329 : vector<8x32xf32>
    %cst_131 = arith.constant 1.000000e+00 : f32
    %331 = vector.broadcast %cst_131 : f32 to vector<8x32xf32>
    %332 = arith.addf %331, %330 : vector<8x32xf32>
    %333 = arith.divf %331, %332 : vector<8x32xf32>
    %334 = arith.index_cast %308 : i32 to index
    %c0_132 = arith.constant 0 : index
    %335 = vector.load %arg18[%334, %c0_132] : memref<64x32xf32, #tpu.memory_space<vmem>>, vector<8x32xf32>
    %336 = arith.mulf %325, %317 : vector<8x32xf32>
    %337 = arith.addf %335, %336 : vector<8x32xf32>
    %338 = math.tanh %337 : vector<8x32xf32>
    %cst_133 = arith.constant 1.000000e+00 : f32
    %339 = vector.broadcast %cst_133 : f32 to vector<8x32xf32>
    %340 = arith.subf %339, %333 : vector<8x32xf32>
    %341 = arith.mulf %340, %338 : vector<8x32xf32>
    %342 = arith.mulf %333, %305 : vector<8x32xf32>
    %343 = arith.addf %341, %342 : vector<8x32xf32>
    %344 = arith.index_cast %308 : i32 to index
    %c0_134 = arith.constant 0 : index
    %345 = vector.load %arg15[%344, %c0_134] : memref<64x32xf32, #tpu.memory_space<vmem>>, vector<8x32xf32>
    tpu.vector_store %arg15[%344, %c0_134], %343 {strides = array<i32>} : memref<64x32xf32, #tpu.memory_space<vmem>>, vector<8x32xf32>,
    %c8_i32_135 = arith.constant 8 : i32
    %c0_136 = arith.constant 0 : index
    %c0_137 = arith.constant 0 : index
    %c0_138 = arith.constant 0 : index
    %346 = vector.load %arg14[%c0_136, %c0_137, %c0_138] : memref<2x8x32xf32, #tpu.memory_space<vmem>>, vector<1x8x32xf32>
    %347 = vector.shape_cast %346 : vector<1x8x32xf32> to vector<8x32xf32>
    %348 = vector.shape_cast %343 : vector<8x32xf32> to vector<1x8x32xf32>
    tpu.vector_store %arg14[%c0_136, %c0_137, %c0_138], %348 {strides = array<i32>} : memref<2x8x32xf32, #tpu.memory_space<vmem>>, vector<1x8x32xf32>,
    %c0_139 = arith.constant 0 : index
    %c0_140 = arith.constant 0 : index
    %349 = vector.load %arg15[%c0_139, %c0_140] : memref<64x32xf32, #tpu.memory_space<vmem>>, vector<64x32xf32>
    %c0_141 = arith.constant 0 : index
    %c0_142 = arith.constant 0 : index
    %c0_143 = arith.constant 0 : index
    %350 = vector.load %arg7[%c0_141, %c0_142, %c0_143] : memref<3x32x32xf32, #tpu.memory_space<vmem>>, vector<1x32x32xf32>
    %351 = vector.shape_cast %350 : vector<1x32x32xf32> to vector<32x32xf32>
    %cst_144 = arith.constant dense<0.000000e+00> : vector<64x32xf32>
    %352 = tpu.matmul %349, %351, %cst_144 {dimension_numbers = #tpu.dot_dimension_numbers<[1], [0], [0], [1], [0, 0, 1, 1], [], []>} : vector<64x32xf32>, vector<32x32xf32>, vector<64x32xf32> -> vector<64x32xf32>
    %c0_145 = arith.constant 0 : index
    %c0_146 = arith.constant 0 : index
    %c0_147 = arith.constant 0 : index
    %353 = vector.load %arg9[%c0_145, %c0_146, %c0_147] : memref<3x1x32xf32, #tpu.memory_space<vmem>>, vector<1x1x32xf32>
    %354 = vector.shape_cast %353 : vector<1x1x32xf32> to vector<1x32xf32>
    %355 = vector.broadcast %354 : vector<1x32xf32> to vector<64x32xf32>
    %356 = arith.addf %352, %355 : vector<64x32xf32>
    %c0_148 = arith.constant 0 : index
    %c0_149 = arith.constant 0 : index
    %357 = vector.load %arg16[%c0_148, %c0_149] : memref<64x32xf32, #tpu.memory_space<vmem>>, vector<64x32xf32>
    tpu.vector_store %arg16[%c0_148, %c0_149], %356 {strides = array<i32>} : memref<64x32xf32, #tpu.memory_space<vmem>>, vector<64x32xf32>,
    %c1_150 = arith.constant 1 : index
    %c0_151 = arith.constant 0 : index
    %c0_152 = arith.constant 0 : index
    %358 = vector.load %arg7[%c1_150, %c0_151, %c0_152] : memref<3x32x32xf32, #tpu.memory_space<vmem>>, vector<1x32x32xf32>
    %359 = vector.shape_cast %358 : vector<1x32x32xf32> to vector<32x32xf32>
    %cst_153 = arith.constant dense<0.000000e+00> : vector<64x32xf32>
    %360 = tpu.matmul %349, %359, %cst_153 {dimension_numbers = #tpu.dot_dimension_numbers<[1], [0], [0], [1], [0, 0, 1, 1], [], []>} : vector<64x32xf32>, vector<32x32xf32>, vector<64x32xf32> -> vector<64x32xf32>
    %c1_154 = arith.constant 1 : index
    %c0_155 = arith.constant 0 : index
    %c0_156 = arith.constant 0 : index
    %361 = vector.load %arg9[%c1_154, %c0_155, %c0_156] : memref<3x1x32xf32, #tpu.memory_space<vmem>>, vector<1x1x32xf32>
    %362 = vector.shape_cast %361 : vector<1x1x32xf32> to vector<1x32xf32>
    %363 = vector.broadcast %362 : vector<1x32xf32> to vector<64x32xf32>
    %364 = arith.addf %360, %363 : vector<64x32xf32>
    %c0_157 = arith.constant 0 : index
    %c0_158 = arith.constant 0 : index
    %365 = vector.load %arg17[%c0_157, %c0_158] : memref<64x32xf32, #tpu.memory_space<vmem>>, vector<64x32xf32>
    tpu.vector_store %arg17[%c0_157, %c0_158], %364 {strides = array<i32>} : memref<64x32xf32, #tpu.memory_space<vmem>>, vector<64x32xf32>,
    %c2_159 = arith.constant 2 : index
    %c0_160 = arith.constant 0 : index
    %c0_161 = arith.constant 0 : index
    %366 = vector.load %arg7[%c2_159, %c0_160, %c0_161] : memref<3x32x32xf32, #tpu.memory_space<vmem>>, vector<1x32x32xf32>
    %367 = vector.shape_cast %366 : vector<1x32x32xf32> to vector<32x32xf32>
    %cst_162 = arith.constant dense<0.000000e+00> : vector<64x32xf32>
    %368 = tpu.matmul %349, %367, %cst_162 {dimension_numbers = #tpu.dot_dimension_numbers<[1], [0], [0], [1], [0, 0, 1, 1], [], []>} : vector<64x32xf32>, vector<32x32xf32>, vector<64x32xf32> -> vector<64x32xf32>
    %c2_163 = arith.constant 2 : index
    %c0_164 = arith.constant 0 : index
    %c0_165 = arith.constant 0 : index
    %369 = vector.load %arg9[%c2_163, %c0_164, %c0_165] : memref<3x1x32xf32, #tpu.memory_space<vmem>>, vector<1x1x32xf32>
    %370 = vector.shape_cast %369 : vector<1x1x32xf32> to vector<1x32xf32>
    %371 = vector.broadcast %370 : vector<1x32xf32> to vector<64x32xf32>
    %372 = arith.addf %368, %371 : vector<64x32xf32>
    %c0_166 = arith.constant 0 : index
    %c0_167 = arith.constant 0 : index
    %373 = vector.load %arg18[%c0_166, %c0_167] : memref<64x32xf32, #tpu.memory_space<vmem>>, vector<64x32xf32>
    tpu.vector_store %arg18[%c0_166, %c0_167], %372 {strides = array<i32>} : memref<64x32xf32, #tpu.memory_space<vmem>>, vector<64x32xf32>,
    %c0_168 = arith.constant 0 : index
    %c0_169 = arith.constant 0 : index
    %c0_170 = arith.constant 0 : index
    %374 = vector.load %arg8[%c0_168, %c0_169, %c0_170] : memref<3x32x32xf32, #tpu.memory_space<vmem>>, vector<1x32x32xf32>
    %375 = vector.shape_cast %374 : vector<1x32x32xf32> to vector<32x32xf32>
    %c1_171 = arith.constant 1 : index
    %c0_172 = arith.constant 0 : index
    %c0_173 = arith.constant 0 : index
    %376 = vector.load %arg8[%c1_171, %c0_172, %c0_173] : memref<3x32x32xf32, #tpu.memory_space<vmem>>, vector<1x32x32xf32>
    %377 = vector.shape_cast %376 : vector<1x32x32xf32> to vector<32x32xf32>
    %c2_174 = arith.constant 2 : index
    %c0_175 = arith.constant 0 : index
    %c0_176 = arith.constant 0 : index
    %378 = vector.load %arg8[%c2_174, %c0_175, %c0_176] : memref<3x32x32xf32, #tpu.memory_space<vmem>>, vector<1x32x32xf32>
    %379 = vector.shape_cast %378 : vector<1x32x32xf32> to vector<32x32xf32>
    %c0_177 = arith.constant 0 : index
    %c0_178 = arith.constant 0 : index
    %c0_179 = arith.constant 0 : index
    %380 = vector.load %arg10[%c0_177, %c0_178, %c0_179] : memref<3x1x32xf32, #tpu.memory_space<vmem>>, vector<1x1x32xf32>
    %381 = vector.shape_cast %380 : vector<1x1x32xf32> to vector<1x32xf32>
    %c1_180 = arith.constant 1 : index
    %c0_181 = arith.constant 0 : index
    %c0_182 = arith.constant 0 : index
    %382 = vector.load %arg10[%c1_180, %c0_181, %c0_182] : memref<3x1x32xf32, #tpu.memory_space<vmem>>, vector<1x1x32xf32>
    %383 = vector.shape_cast %382 : vector<1x1x32xf32> to vector<1x32xf32>
    %c2_183 = arith.constant 2 : index
    %c0_184 = arith.constant 0 : index
    %c0_185 = arith.constant 0 : index
    %384 = vector.load %arg10[%c2_183, %c0_184, %c0_185] : memref<3x1x32xf32, #tpu.memory_space<vmem>>, vector<1x1x32xf32>
    %385 = vector.shape_cast %384 : vector<1x1x32xf32> to vector<1x32xf32>
    %c1_186 = arith.constant 1 : index
    %c0_187 = arith.constant 0 : index
    %c0_188 = arith.constant 0 : index
    %386 = vector.load %arg14[%c1_186, %c0_187, %c0_188] : memref<2x8x32xf32, #tpu.memory_space<vmem>>, vector<1x8x32xf32>
    %387 = vector.shape_cast %386 : vector<1x8x32xf32> to vector<8x32xf32>
    %c0_i32_189 = arith.constant 0 : i32
    %c8_i32_190 = arith.constant 8 : i32
    %388 = arith.muli %c0_i32_189, %c8_i32_190 : i32
    %cst_191 = arith.constant dense<0.000000e+00> : vector<8x32xf32>
    %389 = tpu.matmul %387, %375, %cst_191 {dimension_numbers = #tpu.dot_dimension_numbers<[1], [0], [0], [1], [0, 0, 1, 1], [], []>} : vector<8x32xf32>, vector<32x32xf32>, vector<8x32xf32> -> vector<8x32xf32>
    %390 = vector.broadcast %381 : vector<1x32xf32> to vector<8x32xf32>
    %391 = arith.addf %389, %390 : vector<8x32xf32>
    %cst_192 = arith.constant dense<0.000000e+00> : vector<8x32xf32>
    %392 = tpu.matmul %387, %377, %cst_192 {dimension_numbers = #tpu.dot_dimension_numbers<[1], [0], [0], [1], [0, 0, 1, 1], [], []>} : vector<8x32xf32>, vector<32x32xf32>, vector<8x32xf32> -> vector<8x32xf32>
    %393 = vector.broadcast %383 : vector<1x32xf32> to vector<8x32xf32>
    %394 = arith.addf %392, %393 : vector<8x32xf32>
    %cst_193 = arith.constant dense<0.000000e+00> : vector<8x32xf32>
    %395 = tpu.matmul %387, %379, %cst_193 {dimension_numbers = #tpu.dot_dimension_numbers<[1], [0], [0], [1], [0, 0, 1, 1], [], []>} : vector<8x32xf32>, vector<32x32xf32>, vector<8x32xf32> -> vector<8x32xf32>
    %396 = vector.broadcast %385 : vector<1x32xf32> to vector<8x32xf32>
    %397 = arith.addf %395, %396 : vector<8x32xf32>
    %398 = arith.index_cast %388 : i32 to index
    %c0_194 = arith.constant 0 : index
    %399 = vector.load %arg16[%398, %c0_194] : memref<64x32xf32, #tpu.memory_space<vmem>>, vector<8x32xf32>
    %400 = arith.addf %399, %391 : vector<8x32xf32>
    %401 = arith.negf %400 : vector<8x32xf32>
    %402 = math.exp %401 : vector<8x32xf32>
    %cst_195 = arith.constant 1.000000e+00 : f32
    %403 = vector.broadcast %cst_195 : f32 to vector<8x32xf32>
    %404 = arith.addf %403, %402 : vector<8x32xf32>
    %405 = arith.divf %403, %404 : vector<8x32xf32>
    %406 = arith.index_cast %388 : i32 to index
    %c0_196 = arith.constant 0 : index
    %407 = vector.load %arg17[%406, %c0_196] : memref<64x32xf32, #tpu.memory_space<vmem>>, vector<8x32xf32>
    %408 = arith.addf %407, %394 : vector<8x32xf32>
    %409 = arith.negf %408 : vector<8x32xf32>
    %410 = math.exp %409 : vector<8x32xf32>
    %cst_197 = arith.constant 1.000000e+00 : f32
    %411 = vector.broadcast %cst_197 : f32 to vector<8x32xf32>
    %412 = arith.addf %411, %410 : vector<8x32xf32>
    %413 = arith.divf %411, %412 : vector<8x32xf32>
    %414 = arith.index_cast %388 : i32 to index
    %c0_198 = arith.constant 0 : index
    %415 = vector.load %arg18[%414, %c0_198] : memref<64x32xf32, #tpu.memory_space<vmem>>, vector<8x32xf32>
    %416 = arith.mulf %405, %397 : vector<8x32xf32>
    %417 = arith.addf %415, %416 : vector<8x32xf32>
    %418 = math.tanh %417 : vector<8x32xf32>
    %cst_199 = arith.constant 1.000000e+00 : f32
    %419 = vector.broadcast %cst_199 : f32 to vector<8x32xf32>
    %420 = arith.subf %419, %413 : vector<8x32xf32>
    %421 = arith.mulf %420, %418 : vector<8x32xf32>
    %422 = arith.mulf %413, %387 : vector<8x32xf32>
    %423 = arith.addf %421, %422 : vector<8x32xf32>
    %c1_i32_200 = arith.constant 1 : i32
    %c8_i32_201 = arith.constant 8 : i32
    %424 = arith.muli %c1_i32_200, %c8_i32_201 : i32
    %cst_202 = arith.constant dense<0.000000e+00> : vector<8x32xf32>
    %425 = tpu.matmul %423, %375, %cst_202 {dimension_numbers = #tpu.dot_dimension_numbers<[1], [0], [0], [1], [0, 0, 1, 1], [], []>} : vector<8x32xf32>, vector<32x32xf32>, vector<8x32xf32> -> vector<8x32xf32>
    %426 = vector.broadcast %381 : vector<1x32xf32> to vector<8x32xf32>
    %427 = arith.addf %425, %426 : vector<8x32xf32>
    %cst_203 = arith.constant dense<0.000000e+00> : vector<8x32xf32>
    %428 = tpu.matmul %423, %377, %cst_203 {dimension_numbers = #tpu.dot_dimension_numbers<[1], [0], [0], [1], [0, 0, 1, 1], [], []>} : vector<8x32xf32>, vector<32x32xf32>, vector<8x32xf32> -> vector<8x32xf32>
    %429 = vector.broadcast %383 : vector<1x32xf32> to vector<8x32xf32>
    %430 = arith.addf %428, %429 : vector<8x32xf32>
    %cst_204 = arith.constant dense<0.000000e+00> : vector<8x32xf32>
    %431 = tpu.matmul %423, %379, %cst_204 {dimension_numbers = #tpu.dot_dimension_numbers<[1], [0], [0], [1], [0, 0, 1, 1], [], []>} : vector<8x32xf32>, vector<32x32xf32>, vector<8x32xf32> -> vector<8x32xf32>
    %432 = vector.broadcast %385 : vector<1x32xf32> to vector<8x32xf32>
    %433 = arith.addf %431, %432 : vector<8x32xf32>
    %434 = arith.index_cast %424 : i32 to index
    %c0_205 = arith.constant 0 : index
    %435 = vector.load %arg16[%434, %c0_205] : memref<64x32xf32, #tpu.memory_space<vmem>>, vector<8x32xf32>
    %436 = arith.addf %435, %427 : vector<8x32xf32>
    %437 = arith.negf %436 : vector<8x32xf32>
    %438 = math.exp %437 : vector<8x32xf32>
    %cst_206 = arith.constant 1.000000e+00 : f32
    %439 = vector.broadcast %cst_206 : f32 to vector<8x32xf32>
    %440 = arith.addf %439, %438 : vector<8x32xf32>
    %441 = arith.divf %439, %440 : vector<8x32xf32>
    %442 = arith.index_cast %424 : i32 to index
    %c0_207 = arith.constant 0 : index
    %443 = vector.load %arg17[%442, %c0_207] : memref<64x32xf32, #tpu.memory_space<vmem>>, vector<8x32xf32>
    %444 = arith.addf %443, %430 : vector<8x32xf32>
    %445 = arith.negf %444 : vector<8x32xf32>
    %446 = math.exp %445 : vector<8x32xf32>
    %cst_208 = arith.constant 1.000000e+00 : f32
    %447 = vector.broadcast %cst_208 : f32 to vector<8x32xf32>
    %448 = arith.addf %447, %446 : vector<8x32xf32>
    %449 = arith.divf %447, %448 : vector<8x32xf32>
    %450 = arith.index_cast %424 : i32 to index
    %c0_209 = arith.constant 0 : index
    %451 = vector.load %arg18[%450, %c0_209] : memref<64x32xf32, #tpu.memory_space<vmem>>, vector<8x32xf32>
    %452 = arith.mulf %441, %433 : vector<8x32xf32>
    %453 = arith.addf %451, %452 : vector<8x32xf32>
    %454 = math.tanh %453 : vector<8x32xf32>
    %cst_210 = arith.constant 1.000000e+00 : f32
    %455 = vector.broadcast %cst_210 : f32 to vector<8x32xf32>
    %456 = arith.subf %455, %449 : vector<8x32xf32>
    %457 = arith.mulf %456, %454 : vector<8x32xf32>
    %458 = arith.mulf %449, %423 : vector<8x32xf32>
    %459 = arith.addf %457, %458 : vector<8x32xf32>
    %c2_i32_211 = arith.constant 2 : i32
    %c8_i32_212 = arith.constant 8 : i32
    %460 = arith.muli %c2_i32_211, %c8_i32_212 : i32
    %cst_213 = arith.constant dense<0.000000e+00> : vector<8x32xf32>
    %461 = tpu.matmul %459, %375, %cst_213 {dimension_numbers = #tpu.dot_dimension_numbers<[1], [0], [0], [1], [0, 0, 1, 1], [], []>} : vector<8x32xf32>, vector<32x32xf32>, vector<8x32xf32> -> vector<8x32xf32>
    %462 = vector.broadcast %381 : vector<1x32xf32> to vector<8x32xf32>
    %463 = arith.addf %461, %462 : vector<8x32xf32>
    %cst_214 = arith.constant dense<0.000000e+00> : vector<8x32xf32>
    %464 = tpu.matmul %459, %377, %cst_214 {dimension_numbers = #tpu.dot_dimension_numbers<[1], [0], [0], [1], [0, 0, 1, 1], [], []>} : vector<8x32xf32>, vector<32x32xf32>, vector<8x32xf32> -> vector<8x32xf32>
    %465 = vector.broadcast %383 : vector<1x32xf32> to vector<8x32xf32>
    %466 = arith.addf %464, %465 : vector<8x32xf32>
    %cst_215 = arith.constant dense<0.000000e+00> : vector<8x32xf32>
    %467 = tpu.matmul %459, %379, %cst_215 {dimension_numbers = #tpu.dot_dimension_numbers<[1], [0], [0], [1], [0, 0, 1, 1], [], []>} : vector<8x32xf32>, vector<32x32xf32>, vector<8x32xf32> -> vector<8x32xf32>
    %468 = vector.broadcast %385 : vector<1x32xf32> to vector<8x32xf32>
    %469 = arith.addf %467, %468 : vector<8x32xf32>
    %470 = arith.index_cast %460 : i32 to index
    %c0_216 = arith.constant 0 : index
    %471 = vector.load %arg16[%470, %c0_216] : memref<64x32xf32, #tpu.memory_space<vmem>>, vector<8x32xf32>
    %472 = arith.addf %471, %463 : vector<8x32xf32>
    %473 = arith.negf %472 : vector<8x32xf32>
    %474 = math.exp %473 : vector<8x32xf32>
    %cst_217 = arith.constant 1.000000e+00 : f32
    %475 = vector.broadcast %cst_217 : f32 to vector<8x32xf32>
    %476 = arith.addf %475, %474 : vector<8x32xf32>
    %477 = arith.divf %475, %476 : vector<8x32xf32>
    %478 = arith.index_cast %460 : i32 to index
    %c0_218 = arith.constant 0 : index
    %479 = vector.load %arg17[%478, %c0_218] : memref<64x32xf32, #tpu.memory_space<vmem>>, vector<8x32xf32>
    %480 = arith.addf %479, %466 : vector<8x32xf32>
    %481 = arith.negf %480 : vector<8x32xf32>
    %482 = math.exp %481 : vector<8x32xf32>
    %cst_219 = arith.constant 1.000000e+00 : f32
    %483 = vector.broadcast %cst_219 : f32 to vector<8x32xf32>
    %484 = arith.addf %483, %482 : vector<8x32xf32>
    %485 = arith.divf %483, %484 : vector<8x32xf32>
    %486 = arith.index_cast %460 : i32 to index
    %c0_220 = arith.constant 0 : index
    %487 = vector.load %arg18[%486, %c0_220] : memref<64x32xf32, #tpu.memory_space<vmem>>, vector<8x32xf32>
    %488 = arith.mulf %477, %469 : vector<8x32xf32>
    %489 = arith.addf %487, %488 : vector<8x32xf32>
    %490 = math.tanh %489 : vector<8x32xf32>
    %cst_221 = arith.constant 1.000000e+00 : f32
    %491 = vector.broadcast %cst_221 : f32 to vector<8x32xf32>
    %492 = arith.subf %491, %485 : vector<8x32xf32>
    %493 = arith.mulf %492, %490 : vector<8x32xf32>
    %494 = arith.mulf %485, %459 : vector<8x32xf32>
    %495 = arith.addf %493, %494 : vector<8x32xf32>
    %c3_i32_222 = arith.constant 3 : i32
    %c8_i32_223 = arith.constant 8 : i32
    %496 = arith.muli %c3_i32_222, %c8_i32_223 : i32
    %cst_224 = arith.constant dense<0.000000e+00> : vector<8x32xf32>
    %497 = tpu.matmul %495, %375, %cst_224 {dimension_numbers = #tpu.dot_dimension_numbers<[1], [0], [0], [1], [0, 0, 1, 1], [], []>} : vector<8x32xf32>, vector<32x32xf32>, vector<8x32xf32> -> vector<8x32xf32>
    %498 = vector.broadcast %381 : vector<1x32xf32> to vector<8x32xf32>
    %499 = arith.addf %497, %498 : vector<8x32xf32>
    %cst_225 = arith.constant dense<0.000000e+00> : vector<8x32xf32>
    %500 = tpu.matmul %495, %377, %cst_225 {dimension_numbers = #tpu.dot_dimension_numbers<[1], [0], [0], [1], [0, 0, 1, 1], [], []>} : vector<8x32xf32>, vector<32x32xf32>, vector<8x32xf32> -> vector<8x32xf32>
    %501 = vector.broadcast %383 : vector<1x32xf32> to vector<8x32xf32>
    %502 = arith.addf %500, %501 : vector<8x32xf32>
    %cst_226 = arith.constant dense<0.000000e+00> : vector<8x32xf32>
    %503 = tpu.matmul %495, %379, %cst_226 {dimension_numbers = #tpu.dot_dimension_numbers<[1], [0], [0], [1], [0, 0, 1, 1], [], []>} : vector<8x32xf32>, vector<32x32xf32>, vector<8x32xf32> -> vector<8x32xf32>
    %504 = vector.broadcast %385 : vector<1x32xf32> to vector<8x32xf32>
    %505 = arith.addf %503, %504 : vector<8x32xf32>
    %506 = arith.index_cast %496 : i32 to index
    %c0_227 = arith.constant 0 : index
    %507 = vector.load %arg16[%506, %c0_227] : memref<64x32xf32, #tpu.memory_space<vmem>>, vector<8x32xf32>
    %508 = arith.addf %507, %499 : vector<8x32xf32>
    %509 = arith.negf %508 : vector<8x32xf32>
    %510 = math.exp %509 : vector<8x32xf32>
    %cst_228 = arith.constant 1.000000e+00 : f32
    %511 = vector.broadcast %cst_228 : f32 to vector<8x32xf32>
    %512 = arith.addf %511, %510 : vector<8x32xf32>
    %513 = arith.divf %511, %512 : vector<8x32xf32>
    %514 = arith.index_cast %496 : i32 to index
    %c0_229 = arith.constant 0 : index
    %515 = vector.load %arg17[%514, %c0_229] : memref<64x32xf32, #tpu.memory_space<vmem>>, vector<8x32xf32>
    %516 = arith.addf %515, %502 : vector<8x32xf32>
    %517 = arith.negf %516 : vector<8x32xf32>
    %518 = math.exp %517 : vector<8x32xf32>
    %cst_230 = arith.constant 1.000000e+00 : f32
    %519 = vector.broadcast %cst_230 : f32 to vector<8x32xf32>
    %520 = arith.addf %519, %518 : vector<8x32xf32>
    %521 = arith.divf %519, %520 : vector<8x32xf32>
    %522 = arith.index_cast %496 : i32 to index
    %c0_231 = arith.constant 0 : index
    %523 = vector.load %arg18[%522, %c0_231] : memref<64x32xf32, #tpu.memory_space<vmem>>, vector<8x32xf32>
    %524 = arith.mulf %513, %505 : vector<8x32xf32>
    %525 = arith.addf %523, %524 : vector<8x32xf32>
    %526 = math.tanh %525 : vector<8x32xf32>
    %cst_232 = arith.constant 1.000000e+00 : f32
    %527 = vector.broadcast %cst_232 : f32 to vector<8x32xf32>
    %528 = arith.subf %527, %521 : vector<8x32xf32>
    %529 = arith.mulf %528, %526 : vector<8x32xf32>
    %530 = arith.mulf %521, %495 : vector<8x32xf32>
    %531 = arith.addf %529, %530 : vector<8x32xf32>
    %c4_i32_233 = arith.constant 4 : i32
    %c8_i32_234 = arith.constant 8 : i32
    %532 = arith.muli %c4_i32_233, %c8_i32_234 : i32
    %cst_235 = arith.constant dense<0.000000e+00> : vector<8x32xf32>
    %533 = tpu.matmul %531, %375, %cst_235 {dimension_numbers = #tpu.dot_dimension_numbers<[1], [0], [0], [1], [0, 0, 1, 1], [], []>} : vector<8x32xf32>, vector<32x32xf32>, vector<8x32xf32> -> vector<8x32xf32>
    %534 = vector.broadcast %381 : vector<1x32xf32> to vector<8x32xf32>
    %535 = arith.addf %533, %534 : vector<8x32xf32>
    %cst_236 = arith.constant dense<0.000000e+00> : vector<8x32xf32>
    %536 = tpu.matmul %531, %377, %cst_236 {dimension_numbers = #tpu.dot_dimension_numbers<[1], [0], [0], [1], [0, 0, 1, 1], [], []>} : vector<8x32xf32>, vector<32x32xf32>, vector<8x32xf32> -> vector<8x32xf32>
    %537 = vector.broadcast %383 : vector<1x32xf32> to vector<8x32xf32>
    %538 = arith.addf %536, %537 : vector<8x32xf32>
    %cst_237 = arith.constant dense<0.000000e+00> : vector<8x32xf32>
    %539 = tpu.matmul %531, %379, %cst_237 {dimension_numbers = #tpu.dot_dimension_numbers<[1], [0], [0], [1], [0, 0, 1, 1], [], []>} : vector<8x32xf32>, vector<32x32xf32>, vector<8x32xf32> -> vector<8x32xf32>
    %540 = vector.broadcast %385 : vector<1x32xf32> to vector<8x32xf32>
    %541 = arith.addf %539, %540 : vector<8x32xf32>
    %542 = arith.index_cast %532 : i32 to index
    %c0_238 = arith.constant 0 : index
    %543 = vector.load %arg16[%542, %c0_238] : memref<64x32xf32, #tpu.memory_space<vmem>>, vector<8x32xf32>
    %544 = arith.addf %543, %535 : vector<8x32xf32>
    %545 = arith.negf %544 : vector<8x32xf32>
    %546 = math.exp %545 : vector<8x32xf32>
    %cst_239 = arith.constant 1.000000e+00 : f32
    %547 = vector.broadcast %cst_239 : f32 to vector<8x32xf32>
    %548 = arith.addf %547, %546 : vector<8x32xf32>
    %549 = arith.divf %547, %548 : vector<8x32xf32>
    %550 = arith.index_cast %532 : i32 to index
    %c0_240 = arith.constant 0 : index
    %551 = vector.load %arg17[%550, %c0_240] : memref<64x32xf32, #tpu.memory_space<vmem>>, vector<8x32xf32>
    %552 = arith.addf %551, %538 : vector<8x32xf32>
    %553 = arith.negf %552 : vector<8x32xf32>
    %554 = math.exp %553 : vector<8x32xf32>
    %cst_241 = arith.constant 1.000000e+00 : f32
    %555 = vector.broadcast %cst_241 : f32 to vector<8x32xf32>
    %556 = arith.addf %555, %554 : vector<8x32xf32>
    %557 = arith.divf %555, %556 : vector<8x32xf32>
    %558 = arith.index_cast %532 : i32 to index
    %c0_242 = arith.constant 0 : index
    %559 = vector.load %arg18[%558, %c0_242] : memref<64x32xf32, #tpu.memory_space<vmem>>, vector<8x32xf32>
    %560 = arith.mulf %549, %541 : vector<8x32xf32>
    %561 = arith.addf %559, %560 : vector<8x32xf32>
    %562 = math.tanh %561 : vector<8x32xf32>
    %cst_243 = arith.constant 1.000000e+00 : f32
    %563 = vector.broadcast %cst_243 : f32 to vector<8x32xf32>
    %564 = arith.subf %563, %557 : vector<8x32xf32>
    %565 = arith.mulf %564, %562 : vector<8x32xf32>
    %566 = arith.mulf %557, %531 : vector<8x32xf32>
    %567 = arith.addf %565, %566 : vector<8x32xf32>
    %c5_i32_244 = arith.constant 5 : i32
    %c8_i32_245 = arith.constant 8 : i32
    %568 = arith.muli %c5_i32_244, %c8_i32_245 : i32
    %cst_246 = arith.constant dense<0.000000e+00> : vector<8x32xf32>
    %569 = tpu.matmul %567, %375, %cst_246 {dimension_numbers = #tpu.dot_dimension_numbers<[1], [0], [0], [1], [0, 0, 1, 1], [], []>} : vector<8x32xf32>, vector<32x32xf32>, vector<8x32xf32> -> vector<8x32xf32>
    %570 = vector.broadcast %381 : vector<1x32xf32> to vector<8x32xf32>
    %571 = arith.addf %569, %570 : vector<8x32xf32>
    %cst_247 = arith.constant dense<0.000000e+00> : vector<8x32xf32>
    %572 = tpu.matmul %567, %377, %cst_247 {dimension_numbers = #tpu.dot_dimension_numbers<[1], [0], [0], [1], [0, 0, 1, 1], [], []>} : vector<8x32xf32>, vector<32x32xf32>, vector<8x32xf32> -> vector<8x32xf32>
    %573 = vector.broadcast %383 : vector<1x32xf32> to vector<8x32xf32>
    %574 = arith.addf %572, %573 : vector<8x32xf32>
    %cst_248 = arith.constant dense<0.000000e+00> : vector<8x32xf32>
    %575 = tpu.matmul %567, %379, %cst_248 {dimension_numbers = #tpu.dot_dimension_numbers<[1], [0], [0], [1], [0, 0, 1, 1], [], []>} : vector<8x32xf32>, vector<32x32xf32>, vector<8x32xf32> -> vector<8x32xf32>
    %576 = vector.broadcast %385 : vector<1x32xf32> to vector<8x32xf32>
    %577 = arith.addf %575, %576 : vector<8x32xf32>
    %578 = arith.index_cast %568 : i32 to index
    %c0_249 = arith.constant 0 : index
    %579 = vector.load %arg16[%578, %c0_249] : memref<64x32xf32, #tpu.memory_space<vmem>>, vector<8x32xf32>
    %580 = arith.addf %579, %571 : vector<8x32xf32>
    %581 = arith.negf %580 : vector<8x32xf32>
    %582 = math.exp %581 : vector<8x32xf32>
    %cst_250 = arith.constant 1.000000e+00 : f32
    %583 = vector.broadcast %cst_250 : f32 to vector<8x32xf32>
    %584 = arith.addf %583, %582 : vector<8x32xf32>
    %585 = arith.divf %583, %584 : vector<8x32xf32>
    %586 = arith.index_cast %568 : i32 to index
    %c0_251 = arith.constant 0 : index
    %587 = vector.load %arg17[%586, %c0_251] : memref<64x32xf32, #tpu.memory_space<vmem>>, vector<8x32xf32>
    %588 = arith.addf %587, %574 : vector<8x32xf32>
    %589 = arith.negf %588 : vector<8x32xf32>
    %590 = math.exp %589 : vector<8x32xf32>
    %cst_252 = arith.constant 1.000000e+00 : f32
    %591 = vector.broadcast %cst_252 : f32 to vector<8x32xf32>
    %592 = arith.addf %591, %590 : vector<8x32xf32>
    %593 = arith.divf %591, %592 : vector<8x32xf32>
    %594 = arith.index_cast %568 : i32 to index
    %c0_253 = arith.constant 0 : index
    %595 = vector.load %arg18[%594, %c0_253] : memref<64x32xf32, #tpu.memory_space<vmem>>, vector<8x32xf32>
    %596 = arith.mulf %585, %577 : vector<8x32xf32>
    %597 = arith.addf %595, %596 : vector<8x32xf32>
    %598 = math.tanh %597 : vector<8x32xf32>
    %cst_254 = arith.constant 1.000000e+00 : f32
    %599 = vector.broadcast %cst_254 : f32 to vector<8x32xf32>
    %600 = arith.subf %599, %593 : vector<8x32xf32>
    %601 = arith.mulf %600, %598 : vector<8x32xf32>
    %602 = arith.mulf %593, %567 : vector<8x32xf32>
    %603 = arith.addf %601, %602 : vector<8x32xf32>
    %c6_i32_255 = arith.constant 6 : i32
    %c8_i32_256 = arith.constant 8 : i32
    %604 = arith.muli %c6_i32_255, %c8_i32_256 : i32
    %cst_257 = arith.constant dense<0.000000e+00> : vector<8x32xf32>
    %605 = tpu.matmul %603, %375, %cst_257 {dimension_numbers = #tpu.dot_dimension_numbers<[1], [0], [0], [1], [0, 0, 1, 1], [], []>} : vector<8x32xf32>, vector<32x32xf32>, vector<8x32xf32> -> vector<8x32xf32>
    %606 = vector.broadcast %381 : vector<1x32xf32> to vector<8x32xf32>
    %607 = arith.addf %605, %606 : vector<8x32xf32>
    %cst_258 = arith.constant dense<0.000000e+00> : vector<8x32xf32>
    %608 = tpu.matmul %603, %377, %cst_258 {dimension_numbers = #tpu.dot_dimension_numbers<[1], [0], [0], [1], [0, 0, 1, 1], [], []>} : vector<8x32xf32>, vector<32x32xf32>, vector<8x32xf32> -> vector<8x32xf32>
    %609 = vector.broadcast %383 : vector<1x32xf32> to vector<8x32xf32>
    %610 = arith.addf %608, %609 : vector<8x32xf32>
    %cst_259 = arith.constant dense<0.000000e+00> : vector<8x32xf32>
    %611 = tpu.matmul %603, %379, %cst_259 {dimension_numbers = #tpu.dot_dimension_numbers<[1], [0], [0], [1], [0, 0, 1, 1], [], []>} : vector<8x32xf32>, vector<32x32xf32>, vector<8x32xf32> -> vector<8x32xf32>
    %612 = vector.broadcast %385 : vector<1x32xf32> to vector<8x32xf32>
    %613 = arith.addf %611, %612 : vector<8x32xf32>
    %614 = arith.index_cast %604 : i32 to index
    %c0_260 = arith.constant 0 : index
    %615 = vector.load %arg16[%614, %c0_260] : memref<64x32xf32, #tpu.memory_space<vmem>>, vector<8x32xf32>
    %616 = arith.addf %615, %607 : vector<8x32xf32>
    %617 = arith.negf %616 : vector<8x32xf32>
    %618 = math.exp %617 : vector<8x32xf32>
    %cst_261 = arith.constant 1.000000e+00 : f32
    %619 = vector.broadcast %cst_261 : f32 to vector<8x32xf32>
    %620 = arith.addf %619, %618 : vector<8x32xf32>
    %621 = arith.divf %619, %620 : vector<8x32xf32>
    %622 = arith.index_cast %604 : i32 to index
    %c0_262 = arith.constant 0 : index
    %623 = vector.load %arg17[%622, %c0_262] : memref<64x32xf32, #tpu.memory_space<vmem>>, vector<8x32xf32>
    %624 = arith.addf %623, %610 : vector<8x32xf32>
    %625 = arith.negf %624 : vector<8x32xf32>
    %626 = math.exp %625 : vector<8x32xf32>
    %cst_263 = arith.constant 1.000000e+00 : f32
    %627 = vector.broadcast %cst_263 : f32 to vector<8x32xf32>
    %628 = arith.addf %627, %626 : vector<8x32xf32>
    %629 = arith.divf %627, %628 : vector<8x32xf32>
    %630 = arith.index_cast %604 : i32 to index
    %c0_264 = arith.constant 0 : index
    %631 = vector.load %arg18[%630, %c0_264] : memref<64x32xf32, #tpu.memory_space<vmem>>, vector<8x32xf32>
    %632 = arith.mulf %621, %613 : vector<8x32xf32>
    %633 = arith.addf %631, %632 : vector<8x32xf32>
    %634 = math.tanh %633 : vector<8x32xf32>
    %cst_265 = arith.constant 1.000000e+00 : f32
    %635 = vector.broadcast %cst_265 : f32 to vector<8x32xf32>
    %636 = arith.subf %635, %629 : vector<8x32xf32>
    %637 = arith.mulf %636, %634 : vector<8x32xf32>
    %638 = arith.mulf %629, %603 : vector<8x32xf32>
    %639 = arith.addf %637, %638 : vector<8x32xf32>
    %c7_i32_266 = arith.constant 7 : i32
    %c8_i32_267 = arith.constant 8 : i32
    %640 = arith.muli %c7_i32_266, %c8_i32_267 : i32
    %cst_268 = arith.constant dense<0.000000e+00> : vector<8x32xf32>
    %641 = tpu.matmul %639, %375, %cst_268 {dimension_numbers = #tpu.dot_dimension_numbers<[1], [0], [0], [1], [0, 0, 1, 1], [], []>} : vector<8x32xf32>, vector<32x32xf32>, vector<8x32xf32> -> vector<8x32xf32>
    %642 = vector.broadcast %381 : vector<1x32xf32> to vector<8x32xf32>
    %643 = arith.addf %641, %642 : vector<8x32xf32>
    %cst_269 = arith.constant dense<0.000000e+00> : vector<8x32xf32>
    %644 = tpu.matmul %639, %377, %cst_269 {dimension_numbers = #tpu.dot_dimension_numbers<[1], [0], [0], [1], [0, 0, 1, 1], [], []>} : vector<8x32xf32>, vector<32x32xf32>, vector<8x32xf32> -> vector<8x32xf32>
    %645 = vector.broadcast %383 : vector<1x32xf32> to vector<8x32xf32>
    %646 = arith.addf %644, %645 : vector<8x32xf32>
    %cst_270 = arith.constant dense<0.000000e+00> : vector<8x32xf32>
    %647 = tpu.matmul %639, %379, %cst_270 {dimension_numbers = #tpu.dot_dimension_numbers<[1], [0], [0], [1], [0, 0, 1, 1], [], []>} : vector<8x32xf32>, vector<32x32xf32>, vector<8x32xf32> -> vector<8x32xf32>
    %648 = vector.broadcast %385 : vector<1x32xf32> to vector<8x32xf32>
    %649 = arith.addf %647, %648 : vector<8x32xf32>
    %650 = arith.index_cast %640 : i32 to index
    %c0_271 = arith.constant 0 : index
    %651 = vector.load %arg16[%650, %c0_271] : memref<64x32xf32, #tpu.memory_space<vmem>>, vector<8x32xf32>
    %652 = arith.addf %651, %643 : vector<8x32xf32>
    %653 = arith.negf %652 : vector<8x32xf32>
    %654 = math.exp %653 : vector<8x32xf32>
    %cst_272 = arith.constant 1.000000e+00 : f32
    %655 = vector.broadcast %cst_272 : f32 to vector<8x32xf32>
    %656 = arith.addf %655, %654 : vector<8x32xf32>
    %657 = arith.divf %655, %656 : vector<8x32xf32>
    %658 = arith.index_cast %640 : i32 to index
    %c0_273 = arith.constant 0 : index
    %659 = vector.load %arg17[%658, %c0_273] : memref<64x32xf32, #tpu.memory_space<vmem>>, vector<8x32xf32>
    %660 = arith.addf %659, %646 : vector<8x32xf32>
    %661 = arith.negf %660 : vector<8x32xf32>
    %662 = math.exp %661 : vector<8x32xf32>
    %cst_274 = arith.constant 1.000000e+00 : f32
    %663 = vector.broadcast %cst_274 : f32 to vector<8x32xf32>
    %664 = arith.addf %663, %662 : vector<8x32xf32>
    %665 = arith.divf %663, %664 : vector<8x32xf32>
    %666 = arith.index_cast %640 : i32 to index
    %c0_275 = arith.constant 0 : index
    %667 = vector.load %arg18[%666, %c0_275] : memref<64x32xf32, #tpu.memory_space<vmem>>, vector<8x32xf32>
    %668 = arith.mulf %657, %649 : vector<8x32xf32>
    %669 = arith.addf %667, %668 : vector<8x32xf32>
    %670 = math.tanh %669 : vector<8x32xf32>
    %cst_276 = arith.constant 1.000000e+00 : f32
    %671 = vector.broadcast %cst_276 : f32 to vector<8x32xf32>
    %672 = arith.subf %671, %665 : vector<8x32xf32>
    %673 = arith.mulf %672, %670 : vector<8x32xf32>
    %674 = arith.mulf %665, %639 : vector<8x32xf32>
    %675 = arith.addf %673, %674 : vector<8x32xf32>
    %c8_i32_277 = arith.constant 8 : i32
    %c1_278 = arith.constant 1 : index
    %c0_279 = arith.constant 0 : index
    %c0_280 = arith.constant 0 : index
    %676 = vector.load %arg14[%c1_278, %c0_279, %c0_280] : memref<2x8x32xf32, #tpu.memory_space<vmem>>, vector<1x8x32xf32>
    %677 = vector.shape_cast %676 : vector<1x8x32xf32> to vector<8x32xf32>
    %678 = vector.shape_cast %675 : vector<8x32xf32> to vector<1x8x32xf32>
    tpu.vector_store %arg14[%c1_278, %c0_279, %c0_280], %678 {strides = array<i32>} : memref<2x8x32xf32, #tpu.memory_space<vmem>>, vector<1x8x32xf32>,
    %c0_i32_281 = arith.constant 0 : i32
    %679 = arith.cmpi eq, %arg0, %c0_i32_281 : i32
    %680 = arith.extui %679 : i1 to i32
    %c0_i32_282 = arith.constant 0 : i32
    %681 = arith.cmpi ne, %680, %c0_i32_282 : i32
    scf.if %681 {
      %c1_283 = arith.constant 1 : index
      %c0_284 = arith.constant 0 : index
      %c0_285 = arith.constant 0 : index
      %682 = vector.load %arg14[%c1_283, %c0_284, %c0_285] : memref<2x8x32xf32, #tpu.memory_space<vmem>>, vector<1x8x32xf32>
      %683 = vector.shape_cast %682 : vector<1x8x32xf32> to vector<8x32xf32>
      %cst_286 = arith.constant 0.000000e+00 : f32
      %684 = vector.broadcast %cst_286 : f32 to vector<8x32xf32>
      %685 = arith.maximumf %683, %684 : vector<8x32xf32>
      %c0_287 = arith.constant 0 : index
      %c0_288 = arith.constant 0 : index
      %686 = vector.load %arg11[%c0_287, %c0_288] : memref<32x5xf32, #tpu.memory_space<vmem>>, vector<32x5xf32>
      %cst_289 = arith.constant dense<0.000000e+00> : vector<8x5xf32>
      %687 = tpu.matmul %685, %686, %cst_289 {dimension_numbers = #tpu.dot_dimension_numbers<[1], [0], [0], [1], [0, 0, 1, 1], [], []>} : vector<8x32xf32>, vector<32x5xf32>, vector<8x5xf32> -> vector<8x5xf32>
      %c0_290 = arith.constant 0 : index
      %c0_291 = arith.constant 0 : index
      %688 = vector.load %arg12[%c0_290, %c0_291] : memref<1x5xf32, #tpu.memory_space<vmem>>, vector<1x5xf32>
      %689 = vector.broadcast %688 : vector<1x5xf32> to vector<8x5xf32>
      %690 = arith.addf %687, %689 : vector<8x5xf32>
      %c0_292 = arith.constant 0 : index
      %c0_293 = arith.constant 0 : index
      %691 = vector.load %arg13[%c0_292, %c0_293] : memref<8x5xf32, #tpu.memory_space<vmem>>, vector<8x5xf32>
      tpu.vector_store %arg13[%c0_292, %c0_293], %690 {strides = array<i32>} : memref<8x5xf32, #tpu.memory_space<vmem>>, vector<8x5xf32>,
    } else {
    }
    return
  }
  func.func @transform_0(%arg0: i32) -> (i32, i32) {
    %c0_i32 = arith.constant 0 : i32
    %c0_i32_0 = arith.constant 0 : i32
    return %arg0, %c0_i32 : i32, i32
  }
  func.func @transform_1(%arg0: i32) -> (i32, i32, i32) {
    %c0_i32 = arith.constant 0 : i32
    %c0_i32_0 = arith.constant 0 : i32
    %c0_i32_1 = arith.constant 0 : i32
    %c0_i32_2 = arith.constant 0 : i32
    return %c0_i32, %c0_i32_0, %c0_i32_1 : i32, i32, i32
  }
  func.func @transform_2(%arg0: i32) -> (i32, i32, i32) {
    %c0_i32 = arith.constant 0 : i32
    %c0_i32_0 = arith.constant 0 : i32
    %c0_i32_1 = arith.constant 0 : i32
    %c0_i32_2 = arith.constant 0 : i32
    return %c0_i32, %c0_i32_0, %c0_i32_1 : i32, i32, i32
  }
  func.func @transform_3(%arg0: i32) -> (i32, i32, i32) {
    %c0_i32 = arith.constant 0 : i32
    %c0_i32_0 = arith.constant 0 : i32
    %c0_i32_1 = arith.constant 0 : i32
    %c0_i32_2 = arith.constant 0 : i32
    return %c0_i32, %c0_i32_0, %c0_i32_1 : i32, i32, i32
  }
  func.func @transform_4(%arg0: i32) -> (i32, i32, i32) {
    %c0_i32 = arith.constant 0 : i32
    %c0_i32_0 = arith.constant 0 : i32
    %c0_i32_1 = arith.constant 0 : i32
    %c0_i32_2 = arith.constant 0 : i32
    return %c0_i32, %c0_i32_0, %c0_i32_1 : i32, i32, i32
  }
  func.func @transform_5(%arg0: i32) -> (i32, i32, i32) {
    %c0_i32 = arith.constant 0 : i32
    %c0_i32_0 = arith.constant 0 : i32
    %c0_i32_1 = arith.constant 0 : i32
    %c0_i32_2 = arith.constant 0 : i32
    return %c0_i32, %c0_i32_0, %c0_i32_1 : i32, i32, i32
  }
  func.func @transform_6(%arg0: i32) -> (i32, i32, i32) {
    %c0_i32 = arith.constant 0 : i32
    %c0_i32_0 = arith.constant 0 : i32
    %c0_i32_1 = arith.constant 0 : i32
    %c0_i32_2 = arith.constant 0 : i32
    return %c0_i32, %c0_i32_0, %c0_i32_1 : i32, i32, i32
  }
  func.func @transform_7(%arg0: i32) -> (i32, i32, i32) {
    %c0_i32 = arith.constant 0 : i32
    %c0_i32_0 = arith.constant 0 : i32
    %c0_i32_1 = arith.constant 0 : i32
    %c0_i32_2 = arith.constant 0 : i32
    return %c0_i32, %c0_i32_0, %c0_i32_1 : i32, i32, i32
  }
  func.func @transform_8(%arg0: i32) -> (i32, i32, i32) {
    %c0_i32 = arith.constant 0 : i32
    %c0_i32_0 = arith.constant 0 : i32
    %c0_i32_1 = arith.constant 0 : i32
    %c0_i32_2 = arith.constant 0 : i32
    return %c0_i32, %c0_i32_0, %c0_i32_1 : i32, i32, i32
  }
  func.func @transform_9(%arg0: i32) -> (i32, i32, i32) {
    %c0_i32 = arith.constant 0 : i32
    %c0_i32_0 = arith.constant 0 : i32
    %c0_i32_1 = arith.constant 0 : i32
    %c0_i32_2 = arith.constant 0 : i32
    return %c0_i32, %c0_i32_0, %c0_i32_1 : i32, i32, i32
  }
  func.func @transform_10(%arg0: i32) -> (i32, i32) {
    %c0_i32 = arith.constant 0 : i32
    %c0_i32_0 = arith.constant 0 : i32
    %c0_i32_1 = arith.constant 0 : i32
    return %c0_i32, %c0_i32_0 : i32, i32
  }
  func.func @transform_11(%arg0: i32) -> (i32, i32) {
    %c0_i32 = arith.constant 0 : i32
    %c0_i32_0 = arith.constant 0 : i32
    %c0_i32_1 = arith.constant 0 : i32
    return %c0_i32, %c0_i32_0 : i32, i32
  }
  func.func @transform_12(%arg0: i32) -> (i32, i32) {
    %c0_i32 = arith.constant 0 : i32
    %c0_i32_0 = arith.constant 0 : i32
    %c0_i32_1 = arith.constant 0 : i32
    return %c0_i32, %c0_i32_0 : i32, i32
  }
  func.func @transform_13(%arg0: i32) -> (i32, i32, i32) {
    %c0_i32 = arith.constant 0 : i32
    %c0_i32_0 = arith.constant 0 : i32
    %c0_i32_1 = arith.constant 0 : i32
    %c0_i32_2 = arith.constant 0 : i32
    return %c0_i32, %c0_i32_0, %c0_i32_1 : i32, i32, i32
  }
}

</mosaic_0001>

<bundles_post_ra>
// kernel: gru_model_forward.1
= control target key start
LH: loop header
LB: loop body
LE: loop exit
PB: predicated region body
PF: predicated region fallthrough
CT: control target
= control target key end

     0   :  { %19 = vsyncpa [#allocation7], 0  ;;  %s7574_s0 = inlined_call_operand.vmem [shape: f32[64,4], index: 0, kind: input, shape index: {}]   ;;  %s7575_s1 = inlined_call_operand.vmem [shape: f32[2,8,32], index: 1, kind: input, shape index: {}]   ;;  %s7576_s2 = inlined_call_operand.vmem [shape: f32[3,4,32], index: 2, kind: input, shape index: {}]   ;;  %s7577_s3 = inlined_call_operand.vmem [shape: f32[3,32,32], index: 3, kind: input, shape index: {}]   ;;  %s7578_s4 = inlined_call_operand.vmem [shape: f32[3,1,32], index: 4, kind: input, shape index: {}]   ;;  %s7579_s5 = inlined_call_operand.hbm [shape: f32[3,1,32], index: 5, kind: input, shape index: {}]   ;;  %s7580_s6 = inlined_call_operand.vmem [shape: f32[3,32,32], index: 6, kind: input, shape index: {}]   ;;  %s7581_s7 = inlined_call_operand.vmem [shape: f32[3,32,32], index: 7, kind: input, shape index: {}]   ;;  %s7582_s8 = inlined_call_operand.hbm [shape: f32[3,1,32], index: 8, kind: input, shape index: {}]   ;;  %s7583_s9 = inlined_call_operand.hbm [shape: f32[3,1,32], index: 9, kind: input, shape index: {}]   ;;  %s7584_s10 = inlined_call_operand.vmem [shape: f32[32,5], index: 10, kind: input, shape index: {}]   ;;  %s7585_s11 = inlined_call_operand.hbm [shape: f32[1,5], index: 11, kind: input, shape index: {}]   ;;  %s7586_s12 = inlined_call_operand.vmem [shape: f32[8,5], index: 12, kind: output, shape index: {0}]   ;;  %s7587_s13 = inlined_call_operand.vmem [shape: f32[2,8,32], index: 13, kind: output, shape index: {1}]  }
   0x1   :  { %20 = vsyncpa [#allocation9], 0 }
   0x2   :  { %21 = vsyncpa [#allocation12], 0  ;;  %s6613_s25 = smov [#allocation8]   ;;  %s6614_s27 = smov [#allocation6]  }
   0x3   :  { %s53_s26 = sshll.u32 %s6613_s25, 4  ;;  %s37_s28 = sshll.u32 %s6614_s27, 4  ;;  %s54_s26 = int_to_ptr.vmem [resolvable:$true] %s53_s26  ;;  %s6692_s28 = int_to_ptr.vmem [resolvable:$true] %s37_s28 }
   0x4   :  { %s6519_s14 = scalar_lea.hbm %s7582_s8, 48 }
   0x5   :  { %p6520_p0 = scmp.ne.s32.totalorder %s7582_s8, %s6519_s14  ;;  %p6523_p1 = scmp.lt.u32.totalorder %s6519_s14, %s7582_s8 }
   0x7   :  { %p6525_p2 = pnand %p6523_p1, %p6520_p0 }
   0x9   :  { %6528 = shalt.err (!%p6525_p2)
}
   0xa   :  { %s6529_s19 = scalar_lea.vmem %s54_s26, 48  ;;  %s6533_s20 = scalar_lea.vmem %s54_s26, 64 }
   0xb   :  { %p6530_p3 = scmp.ne.s32.totalorder %s54_s26, %s6529_s19  ;;  %p6534_p4 = scmp.lt.s32.totalorder %s54_s26, %s54_s26 }
   0xc   :  { %p6535_p5 = scmp.lt.s32.totalorder %s6533_s20, %s6529_s19 }
   0xe   :  { %p6536_p6 = por %p6535_p5, %p6534_p4 }
  0x10   :  { %p6537_p7 = pnand %p6536_p6, %p6530_p3 }
  0x12   :  { %6540 = shalt.err (!%p6537_p7)
}
  0x13   :  { %s6615_s21 = smov 16   ;;  %s6616_s22 = smov 1  }
  0x14   :  { %59 = dma.hbm_to_vmem [thread:$0]  %s7582_s8, 48, %s54_s26, [#allocation9], %s6615_s21, %s6615_s21, %s6616_s22  }
  0x15   :  { %s6541_s29 = scalar_lea.hbm %s7579_s5, 48 }
  0x16   :  { %p6542_p8 = scmp.ne.s32.totalorder %s7579_s5, %s6541_s29  ;;  %p6545_p9 = scmp.lt.u32.totalorder %s6541_s29, %s7579_s5 }
  0x18   :  { %p6547_p10 = pnand %p6545_p9, %p6542_p8 }
  0x1a   :  { %6550 = shalt.err (!%p6547_p10)
}
  0x1b   :  { %s6551_s17 = scalar_lea.vmem %s6692_s28, 48  ;;  %s6555_s8 = scalar_lea.vmem %s6692_s28, 64 }
  0x1c   :  { %p6552_p11 = scmp.ne.s32.totalorder %s6692_s28, %s6551_s17  ;;  %p6556_p12 = scmp.lt.s32.totalorder %s6692_s28, %s6692_s28 }
  0x1d   :  { %p6557_p13 = scmp.lt.s32.totalorder %s6555_s8, %s6551_s17 }
  0x1f   :  { %p6558_p0 = por %p6557_p13, %p6556_p12 }
  0x21   :  { %p6559_p1 = pnand %p6558_p0, %p6552_p11 }
  0x23   :  { %6562 = shalt.err (!%p6559_p1)
}
  0x24   :  { %43 = dma.hbm_to_vmem [thread:$0]  %s7579_s5, 48, %s6692_s28, [#allocation7], %s6615_s21, %s6615_s21, %s6616_s22  }
  0x25   :  { %s6617_s19 = smov [#allocation10]   ;;  %s6618_s23 = smov [#allocation11]  }
  0x26   :  { %s65_s20 = sshll.u32 %s6617_s19, 4  ;;  %s80_s24 = sshll.u32 %s6618_s23, 4  ;;  %s66_s20 = int_to_ptr.vmem [resolvable:$true] %s65_s20  ;;  %s81_s24 = int_to_ptr.vmem [resolvable:$true] %s80_s24 }
  0x27   :  { %s6563_s29 = scalar_lea.hbm %s7583_s9, 48 }
  0x28   :  { %p6564_p2 = scmp.ne.s32.totalorder %s7583_s9, %s6563_s29  ;;  %p6567_p3 = scmp.lt.u32.totalorder %s6563_s29, %s7583_s9 }
  0x2a   :  { %p6569_p4 = pnand %p6567_p3, %p6564_p2 }
  0x2c   :  { %6572 = shalt.err (!%p6569_p4)
}
  0x2d   :  { %s6573_s5 = scalar_lea.vmem %s66_s20, 48  ;;  %s6577_s28 = scalar_lea.vmem %s66_s20, 64 }
  0x2e   :  { %p6574_p5 = scmp.ne.s32.totalorder %s66_s20, %s6573_s5  ;;  %p6578_p6 = scmp.lt.s32.totalorder %s66_s20, %s66_s20 }
  0x2f   :  { %p6579_p7 = scmp.lt.s32.totalorder %s6577_s28, %s6573_s5 }
  0x31   :  { %p6580_p8 = por %p6579_p7, %p6578_p6 }
  0x33   :  { %p6581_p9 = pnand %p6580_p8, %p6574_p5 }
  0x35   :  { %6584 = shalt.err (!%p6581_p9)
}
  0x36   :  { %71 = dma.hbm_to_vmem [thread:$0]  %s7583_s9, 48, %s66_s20, [#allocation9], %s6615_s21, %s6615_s21, %s6616_s22  }
  0x37   :  { %s6585_s19 = scalar_lea.hbm %s7585_s11, 16 }
  0x38   :  { %p6586_p10 = scmp.ne.s32.totalorder %s7585_s11, %s6585_s19  ;;  %p6589_p11 = scmp.lt.u32.totalorder %s6585_s19, %s7585_s11 }
  0x3a   :  { %p6591_p12 = pnand %p6589_p11, %p6586_p10 }
  0x3c   :  { %6594 = shalt.err (!%p6591_p12)
}
  0x3d   :  { %s6595_s30 = scalar_lea.vmem %s81_s24, 16  ;;  %s6599_s14 = scalar_lea.vmem %s81_s24, 32 }
  0x3e   :  { %p6596_p13 = scmp.ne.s32.totalorder %s81_s24, %s6595_s30  ;;  %p6600_p0 = scmp.lt.s32.totalorder %s81_s24, %s81_s24 }
  0x3f   :  { %p6601_p1 = scmp.lt.s32.totalorder %s6599_s14, %s6595_s30 }
  0x41   :  { %p6602_p2 = por %p6601_p1, %p6600_p0 }
  0x43   :  { %p6603_p3 = pnand %p6602_p2, %p6596_p13 }
  0x45   :  { %6606 = shalt.err (!%p6603_p3)
}
  0x46   :  { %83 = dma.hbm_to_vmem [thread:$0]  %s7585_s11, 16, %s81_s24, [#allocation12]  }
  0x47   :  { %6607 = dma.done.wait [#allocation7], 48  }
  0x48   :  { %6608 = vsyncadd [#allocation7], 4294967248 }
  0x49   :  { %6609 = dma.done.wait [#allocation9], 96  }
  0x4a   :  { %6610 = vsyncadd [#allocation9], 4294967200 }
  0x4b   :  { %6611 = dma.done.wait [#allocation12], 16  }
  0x4c   :  { %6612 = vsyncadd [#allocation12], 4294967280  ;;  %vm146_vm0 = vcmask 1043456   ;;  %vm121_vm1 = vcmask 31744   ;;  %v113_v0 = vld [vmem:[%s7576_s2] sm:$0xf] }
  0x4d   :  { %v6763_v1 = vld [vmem:[%s7574_s0 + $0x30] sm:$0xff]  ;;  %v6768_v2 = vld [vmem:[%s7574_s0 + $0x38] sm:$0xff]  ;;  %6348 = vmatprep.subr.msk.mxu1 %vm146_vm0, %v113_v0  ;;  %v4915_v3 = vld [vmem:[%s7576_s2 + $0x4] sm:$0xf]  ;;  %5389 = vmatprep.subr.msk.mxu0 %vm146_vm0, %v113_v0  ;;  %vm102_vm2 = vcmask 261120   ;;  %v6619_v11 = vmov 0.0|0.0  }
  0x4e   :  { %5400 = vmatprep.mubr.msk.f32.mxu1 %vm121_vm1, %v6763_v1  ;;  %v105_v4 = vld [vmem:[%s7574_s0] sm:$0xff]  ;;  %6349 = vmatpush3.msk.msra.mxu1 %vm146_vm0, %v113_v0  ;;  %v517_v6 = vld [vmem:[%s7577_s3 + $0x8] sm:$0xff]  ;;  %v107_v9 = vld [vmem:[%s7574_s0 + $0x10] sm:$0xff]  ;;  %vm6620_vm3 = vmmov 0   ;;  %v6621_v26 = vmov 0.0   ;;  %vm4892_vm4 = vcmask 39936  }
  0x4f   :  { %v516_v5 = vld [vmem:[%s7577_s3] sm:$0xff]  ;;  %5401 = vmatmul.mubr.msk.f32.vlgmr.msra.gmra.mrb[0].mxu1 %vm121_vm1, %v6768_v2  ;;  %5403 = vmatprep.subr.msk.mxu1 %vm146_vm0, %v4915_v3  ;;  %v106_v7 = vld [vmem:[%s7574_s0 + $0x8] sm:$0xff]  ;;  %v518_v12 = vld [vmem:[%s7577_s3 + $0x10] sm:$0xff] }
  0x50   :  { %5404 = vmatpush3.msk.msra.mxu1 %vm146_vm0, %v4915_v3  ;;  %5405 = vmatprep.mubr.msk.f32.mxu1 %vm121_vm1, %v105_v4  ;;  %v6795_v8 = vpack.c.bf16 %v517_v6, %v516_v5  ;;  %v4927_v10 = vld [vmem:[%s7576_s2 + $0x8] sm:$0xf]  ;;  %v519_v13 = vld [vmem:[%s7577_s3 + $0x18] sm:$0xff]  ;;  %v100_v14 = vld [vmem:[%s7575_s1] sm:$0xff] }
  0x51   :  { %6030 = vmatprep.subr.bf16.mxu1 %v6619_v11  ;;  %5390 = vmatpush3.msk.msra.mxu0 %vm146_vm0, %v113_v0  ;;  %103 = vst.msk [vmem:[%s7587_s13] sm:$0xff] %vm102_vm2, %v100_v14  ;;  %v108_v15 = vld [vmem:[%s7574_s0 + $0x18] sm:$0xff]  ;;  %v6827_v16 = vpack.c.bf16 %v519_v13, %v518_v12  ;;  %v109_v17 = vld [vmem:[%s7574_s0 + $0x20] sm:$0xff]  ;;  %v110_v18 = vld [vmem:[%s7574_s0 + $0x28] sm:$0xff] }
  0x52   :  { %5391 = vmatprep.mubr.msk.f32.mxu0 %vm121_vm1, %v105_v4  ;;  %5417 = vmatprep.subr.msk.mxu0 %vm146_vm0, %v4927_v10  ;;  %v4943_v19 = vld [vmem:[%s7577_s3 + $0x40] sm:$0xff]  ;;  %v4944_v20 = vld [vmem:[%s7577_s3 + $0x48] sm:$0xff]  ;;  %v4945_v24 = vld [vmem:[%s7577_s3 + $0x50] sm:$0xff] }
  0x53   :  { %5406 = vmatmul.mubr.msk.f32.vlgmr.msra.gmra.mrb[2].mxu1 %vm121_vm1, %v106_v7  ;;  %5392 = vmatmul.mubr.msk.f32.vlgmr.msra.gmra.mrb[0].mxu0 %vm121_vm1, %v106_v7  ;;  %v6856_v21 = vpack.c.bf16 %v4944_v20, %v4943_v19  ;;  %v4939_v22 = vld [vmem:[%s7577_s3 + $0x20] sm:$0xff]  ;;  %v4940_v23 = vld [vmem:[%s7577_s3 + $0x28] sm:$0xff]  ;;  %v4946_v25 = vld [vmem:[%s7577_s3 + $0x58] sm:$0xff] }
  0x54   :  { %6032 = vmatpush3.bf16.msra.mxu1 %v6795_v8  ;;  %5408 = vmatprep.mubr.msk.f32.mxu1 %vm121_vm1, %v107_v9  ;;  %v6880_v28 = vpack.c.bf16 %v4940_v23, %v4939_v22  ;;  %v4941_v29 = vld [vmem:[%s7577_s3 + $0x30] sm:$0xff]  ;;  %v4942_v30 = vld [vmem:[%s7577_s3 + $0x38] sm:$0xff]  ;;  %v6891_v31 = vpack.c.bf16 %v4946_v25, %v4945_v24  ;;  %v4905_v33 = vld [vmem:[%s7578_s4] ss:$0 sm:$0xff] }
  0x55   :  { %6033 = vmatprep.subr.bf16.mxu1 %v6619_v11  ;;  %5418 = vmatpush3.msk.msra.mxu0 %vm146_vm0, %v4927_v10  ;;  %v6897_v32 = vpack.c.bf16 %v4942_v30, %v4941_v29  ;;  %v4917_v38 = vld [vmem:[%s7578_s4 + $0x1] ss:$0 sm:$0xff]  ;;  %v4929_v63 = vld [vmem:[%s7578_s4 + $0x2] ss:$0 sm:$0xff] }
  0x56   :  { %5394 = vmatprep.mubr.msk.f32.mxu0 %vm121_vm1, %v107_v9  ;;  %6042 = vmatprep.subr.bf16.mxu0 %v6619_v11  ;;  %v6962_v29 = vld [vmem:[#allocation6 + $0x1] ss:$0 sm:$0xff] }
  0x57   :  { %5409 = vmatmul.mubr.msk.f32.gmra.mrb[4].mxu1 %vm121_vm1, %v108_v15  ;;  %5395 = vmatmul.mubr.msk.f32.gmra.mrb[2].mxu0 %vm121_vm1, %v108_v15 }
  0x58   :  { %5411 = vmatprep.mubr.msk.f32.mxu1 %vm121_vm1, %v109_v17  ;;  %6035 = vmatpush3.bf16.msra.mxu1 %v6827_v16  ;;  %v6878_v27 = vld [vmem:[%s7587_s13] sm:$0xff] }
  0x59   :  { %6036 = vmatprep.subr.bf16.mxu1 %v6619_v11  ;;  %5397 = vmatprep.mubr.msk.f32.mxu0 %vm121_vm1, %v109_v17 }
  0x5b   :  { %5412 = vmatmul.mubr.msk.f32.gmra.mrb[6].mxu1 %vm121_vm1, %v110_v18  ;;  %5398 = vmatmul.mubr.msk.f32.gmra.mrb[4].mxu0 %vm121_vm1, %v110_v18 }
  0x5c   :  { %5414 = vmatprep.mubr.msk.f32.mxu1 %vm121_vm1, %v6763_v1  ;;  %5419 = vmatprep.mubr.msk.f32.mxu0 %vm121_vm1, %v105_v4 }
  0x5f   :  { %5415 = vmatmul.mubr.msk.f32.gmra.mrb[8].mxu1 %vm121_vm1, %v6768_v2  ;;  %5420 = vmatmul.mubr.msk.f32.vlgmr.msra.gmra.mrb[6].mxu0 %vm121_vm1, %v106_v7  ;;  %v6953_v7 = vld [vmem:[#allocation6] ss:$0 sm:$0xff] }
  0x60   :  { %5439 = vmatprep.mubr.msk.f32.mxu1 %vm6620_vm3, %v6621_v26  ;;  %6044 = vmatpush3.bf16.msra.mxu0 %v6856_v21 }
  0x61   :  { %5422 = vmatprep.mubr.msk.f32.mxu0 %vm121_vm1, %v107_v9  ;;  %6045 = vmatprep.subr.bf16.mxu0 %v6619_v11 }
  0x63   :  { %5440 = vmatmul.mubr.msk.f32.vlgmr.msra.gmra.mrb[10].mxu1 %vm102_vm2, %v6878_v27  ;;  %5423 = vmatmul.mubr.msk.f32.gmra.mrb[8].mxu0 %vm121_vm1, %v108_v15 }
  0x64   :  { %6038 = vmatpush3.bf16.msra.mxu1 %v6880_v28  ;;  %5450 = vmatprep.mubr.msk.f32.mxu1 %vm6620_vm3, %v6621_v26 }
  0x65   :  { %6039 = vmatprep.subr.bf16.mxu1 %v6619_v11  ;;  %5425 = vmatprep.mubr.msk.f32.mxu0 %vm121_vm1, %v109_v17 }
  0x66   :  { %6047 = vmatpush3.bf16.msra.mxu0 %v6891_v31 }
  0x67   :  { %5426 = vmatmul.mubr.msk.f32.gmra.mrb[10].mxu0 %vm121_vm1, %v110_v18  ;;  %6054 = vmatprep.subr.bf16.mxu0 %v6619_v11 }
  0x68   :  { %6041 = vmatpush3.bf16.msra.mxu1 %v6897_v32  ;;  %5428 = vmatprep.mubr.msk.f32.mxu0 %vm121_vm1, %v6763_v1 }
  0x69   :  { %6048 = vmatprep.subr.bf16.mxu1 %v6619_v11 }
  0x6b   :  { %5451 = vmatmul.mubr.msk.f32.vlgmr.msra.gmra.mrb[12].mxu1 %vm102_vm2, %v6878_v27  ;;  %5429 = vmatmul.mubr.msk.f32.gmra.mrb[12].mxu0 %vm121_vm1, %v6768_v2 }
  0x6c   :  { %5461 = vmatprep.mubr.msk.f32.mxu0 %vm6620_vm3, %v6621_v26  ;;  %6050 = vmatpush3.bf16.msra.mxu1 %v6795_v8 }
  0x6d   :  { %6051 = vmatprep.subr.bf16.mxu1 %v6619_v11  ;;  %5472 = vmatprep.mubr.msk.f32.mxu1 %vm6620_vm3, %v6621_v26 }
  0x6f   :  { %5462 = vmatmul.mubr.msk.f32.vlgmr.msra.gmra.mrb[14].mxu0 %vm102_vm2, %v6878_v27 }
  0x70   :  { %6056 = vmatpush3.bf16.msra.mxu0 %v6880_v28  ;;  %6053 = vmatpush3.bf16.msra.mxu1 %v6827_v16 }
  0x71   :  { %6057 = vmatprep.subr.bf16.mxu0 %v6619_v11  ;;  %5483 = vmatprep.mubr.msk.f32.mxu0 %vm6620_vm3, %v6621_v26 }
  0x72   :  { %6060 = vmatprep.subr.bf16.mxu1 %v6619_v11 }
  0x74   :  { %6059 = vmatpush3.bf16.msra.mxu0 %v6897_v32 }
  0x75   :  { %6066 = vmatprep.subr.bf16.mxu0 %v6619_v11 }
 0x122   :  { %v5402_v34 = vpop.f32.mrb[0].mxu1 }
 0x123   :  { %v252_v35 = vadd.f32 %v5402_v34, %v4905_v33  ;;  %v246_v36 = vpop.f32.mrb[1].mxu1 }
 0x124   :  { %v247_v37 = vadd.f32 %v4905_v33, %v246_v36 }
 0x125   :  { %263 = vst.msk [vmem:[#allocation3 + $0x38] sm:$0xff] %vm102_vm2, %v252_v35 }
 0x126   :  { %262 = vst.msk [vmem:[#allocation3 + $0x30] sm:$0xff] %vm102_vm2, %v247_v37  ;;  %v5407_v39 = vpop.f32.mrb[2].mxu1  ;;  %v5393_v40 = vpop.f32.mrb[0].mxu0 }
 0x127   :  { %v349_v41 = vadd.f32 %v5407_v39, %v4917_v38  ;;  %v343_v42 = vpop.f32.mrb[3].mxu1  ;;  %v222_v43 = vadd.f32 %v5393_v40, %v4905_v33  ;;  %v216_v44 = vpop.f32.mrb[1].mxu0 }
 0x128   :  { %v344_v45 = vadd.f32 %v4917_v38, %v343_v42  ;;  %v217_v46 = vadd.f32 %v4905_v33, %v216_v44 }
 0x129   :  { %383 = vst.msk [vmem:[#allocation4 + $0x8] sm:$0xff] %vm102_vm2, %v349_v41  ;;  %257 = vst.msk [vmem:[#allocation3 + $0x8] sm:$0xff] %vm102_vm2, %v222_v43 }
 0x12a   :  { %382 = vst.msk [vmem:[#allocation4] sm:$0xff] %vm102_vm2, %v344_v45  ;;  %v5410_v47 = vpop.f32.mrb[4].mxu1  ;;  %256 = vst.msk [vmem:[#allocation3] sm:$0xff] %vm102_vm2, %v217_v46  ;;  %v5396_v48 = vpop.f32.mrb[2].mxu0 }
 0x12b   :  { %v359_v49 = vadd.f32 %v5410_v47, %v4917_v38  ;;  %v353_v50 = vpop.f32.mrb[5].mxu1  ;;  %v232_v51 = vadd.f32 %v5396_v48, %v4905_v33  ;;  %v226_v52 = vpop.f32.mrb[3].mxu0  ;;  %v6969_v47 = vld [vmem:[#allocation6 + $0x2] ss:$0 sm:$0xff] }
 0x12c   :  { %v354_v53 = vadd.f32 %v4917_v38, %v353_v50  ;;  %v227_v54 = vadd.f32 %v4905_v33, %v226_v52 }
 0x12d   :  { %385 = vst.msk [vmem:[#allocation4 + $0x18] sm:$0xff] %vm102_vm2, %v359_v49  ;;  %259 = vst.msk [vmem:[#allocation3 + $0x18] sm:$0xff] %vm102_vm2, %v232_v51 }
 0x12e   :  { %384 = vst.msk [vmem:[#allocation4 + $0x10] sm:$0xff] %vm102_vm2, %v354_v53  ;;  %v5413_v55 = vpop.f32.mrb[6].mxu1  ;;  %258 = vst.msk [vmem:[#allocation3 + $0x10] sm:$0xff] %vm102_vm2, %v227_v54  ;;  %v5399_v56 = vpop.f32.mrb[4].mxu0 }
 0x12f   :  { %v369_v57 = vadd.f32 %v5413_v55, %v4917_v38  ;;  %v363_v58 = vpop.f32.mrb[7].mxu1  ;;  %v242_v59 = vadd.f32 %v5399_v56, %v4905_v33  ;;  %v236_v60 = vpop.f32.mrb[5].mxu0 }
 0x130   :  { %v364_v61 = vadd.f32 %v4917_v38, %v363_v58  ;;  %v237_v62 = vadd.f32 %v4905_v33, %v236_v60 }
 0x131   :  { %387 = vst.msk [vmem:[#allocation4 + $0x28] sm:$0xff] %vm102_vm2, %v369_v57  ;;  %261 = vst.msk [vmem:[#allocation3 + $0x28] sm:$0xff] %vm102_vm2, %v242_v59  ;;  %v767_v12 = vld [vmem:[#allocation3] sm:$0xff] }
 0x132   :  { %386 = vst.msk [vmem:[#allocation4 + $0x20] sm:$0xff] %vm102_vm2, %v364_v61  ;;  %v5416_v0 = vpop.f32.mrb[8].mxu1  ;;  %260 = vst.msk [vmem:[#allocation3 + $0x20] sm:$0xff] %vm102_vm2, %v237_v62  ;;  %v5421_v1 = vpop.f32.mrb[6].mxu0  ;;  %v775_v39 = vld [vmem:[#allocation4] sm:$0xff] }
 0x133   :  { %v379_v2 = vadd.f32 %v5416_v0, %v4917_v38  ;;  %v373_v3 = vpop.f32.mrb[9].mxu1  ;;  %v475_v4 = vadd.f32 %v5421_v1, %v4929_v63  ;;  %v469_v5 = vpop.f32.mrb[7].mxu0  ;;  %v1005_v1 = vld [vmem:[#allocation3 + $0x8] sm:$0xff] }
 0x134   :  { %v374_v6 = vadd.f32 %v4917_v38, %v373_v3  ;;  %v470_v9 = vadd.f32 %v4929_v63, %v469_v5  ;;  %v1013_v5 = vld [vmem:[#allocation4 + $0x8] sm:$0xff] }
 0x135   :  { %389 = vst.msk [vmem:[#allocation4 + $0x38] sm:$0xff] %vm102_vm2, %v379_v2  ;;  %509 = vst.msk [vmem:[#allocation5 + $0x8] sm:$0xff] %vm102_vm2, %v475_v4 }
 0x136   :  { %388 = vst.msk [vmem:[#allocation4 + $0x30] sm:$0xff] %vm102_vm2, %v374_v6  ;;  %v611_v10 = vpop.f32.mrb[10].mxu1  ;;  %508 = vst.msk [vmem:[#allocation5] sm:$0xff] %vm102_vm2, %v470_v9  ;;  %v5424_v13 = vpop.f32.mrb[8].mxu0 }
 0x137   :  { %v612_v14 = vadd.f32 %v6953_v7, %v611_v10  ;;  %v5441_v15 = vpop.f32.mrb[11].mxu1  ;;  %v485_v17 = vadd.f32 %v5424_v13, %v4929_v63  ;;  %v479_v18 = vpop.f32.mrb[9].mxu0 }
 0x138   :  { %v480_v19 = vadd.f32 %v4929_v63, %v479_v18 }
 0x139   :  { %v768_v20 = vadd.f32 %v767_v12, %v612_v14  ;;  %511 = vst.msk [vmem:[#allocation5 + $0x18] sm:$0xff] %vm102_vm2, %v485_v17 }
 0x13a   :  { %510 = vst.msk [vmem:[#allocation5 + $0x10] sm:$0xff] %vm102_vm2, %v480_v19  ;;  %v5427_v22 = vpop.f32.mrb[10].mxu0 }
 0x13b   :  { %v4953_v23 = vmul.f32 -1.442695, %v768_v20  ;;  %v495_v24 = vadd.f32 %v5427_v22, %v4929_v63  ;;  %v489_v25 = vpop.f32.mrb[11].mxu0 }
 0x13c   :  { %v490_v30 = vadd.f32 %v4929_v63, %v489_v25  ;;  %v1021_v22 = vld [vmem:[#allocation5 + $0x8] sm:$0xff] }
 0x13d   :  { %6359 = vpow2.f32 %v4953_v23  ;;  %513 = vst.msk [vmem:[#allocation5 + $0x28] sm:$0xff] %vm102_vm2, %v495_v24  ;;  %v783_v53 = vld [vmem:[#allocation5] sm:$0xff] }
 0x13e   :  { %v687_v33 = vpop.f32.mrb[12].mxu1  ;;  %512 = vst.msk [vmem:[#allocation5 + $0x20] sm:$0xff] %vm102_vm2, %v490_v30  ;;  %v5430_v34 = vpop.f32.mrb[12].mxu0 }
 0x13f   :  { %v688_v35 = vadd.f32 %v6962_v29, %v687_v33  ;;  %v5452_v36 = vpop.f32.mrb[13].mxu1  ;;  %v505_v37 = vadd.f32 %v5430_v34, %v4929_v63  ;;  %v499_v38 = vpop.f32.mrb[13].mxu0 }
 0x140   :  { %v500_v40 = vadd.f32 %v4929_v63, %v499_v38 }
 0x141   :  { %v776_v41 = vadd.f32 %v775_v39, %v688_v35  ;;  %515 = vst.msk [vmem:[#allocation5 + $0x38] sm:$0xff] %vm102_vm2, %v505_v37 }
 0x142   :  { %514 = vst.msk [vmem:[#allocation5 + $0x30] sm:$0xff] %vm102_vm2, %v500_v40  ;;  %v763_v42 = vpop.f32.mrb[14].mxu0 }
 0x143   :  { %v4954_v43 = vmul.f32 -1.442695, %v776_v41  ;;  %v5463_v44 = vpop.f32.mrb[15].mxu0  ;;  %v764_v50 = vadd.f32 %v6969_v47, %v763_v42  ;;  %v1243_v41 = vld [vmem:[#allocation3 + $0x10] sm:$0xff] }
 0x145   :  { %6361 = vpow2.f32 %v4954_v43 }
 0x147   :  { %v6360_v45 = vpop.eup %6359 }
 0x148   :  { %v772_v46 = vadd.f32 1.0, %v6360_v45  ;;  %v1251_v45 = vld [vmem:[#allocation4 + $0x10] sm:$0xff] }
 0x14a   :  { %6363 = vrcp.f32 %v772_v46 }
 0x14f   :  { %v6362_v48 = vpop.eup %6361 }
 0x150   :  { %v780_v49 = vadd.f32 1.0, %v6362_v48 }
 0x152   :  { %6365 = vrcp.f32 %v780_v49 }
 0x154   :  { %v6364_v51 = vpop.eup %6363 }
 0x155   :  { %v784_v52 = vmul.f32 %v6364_v51, %v764_v50 }
 0x157   :  { %v785_v54 = vadd.f32 %v784_v52, %v783_v53 }
 0x159   :  { %6367 = vtanh.f32 %v785_v54 }
 0x15c   :  { %v6366_v55 = vpop.eup %6365 }
 0x15d   :  { %v787_v56 = vsub.f32 1.0, %v6366_v55  ;;  %v789_v59 = vmul.f32 %v6366_v55, %v6878_v27 }
 0x163   :  { %v6368_v57 = vpop.eup %6367 }
 0x164   :  { %v788_v58 = vmul.f32 %v6368_v57, %v787_v56 }
 0x166   :  { %v790_v60 = vadd.f32 %v789_v59, %v788_v58  ;;  %v1259_v58 = vld [vmem:[#allocation5 + $0x10] sm:$0xff] }
 0x168   :  { %791 = vst.msk [vmem:[#allocation2] sm:$0xff] %vm102_vm2, %v790_v60  ;;  %5473 = vmatmul.mubr.msk.f32.vlgmr.msra.gmra.mrb[14].mxu1 %vm102_vm2, %v790_v60  ;;  %5484 = vmatmul.mubr.msk.f32.vlgmr.msra.gmra.mrb[16].mxu0 %vm102_vm2, %v790_v60 }
 0x169   :  { %6062 = vmatpush3.bf16.msra.mxu1 %v6856_v21  ;;  %5494 = vmatprep.mubr.msk.f32.mxu1 %vm6620_vm3, %v6621_v26 }
 0x16a   :  { %6063 = vmatprep.subr.bf16.mxu1 %v6619_v11  ;;  %6068 = vmatpush3.bf16.msra.mxu0 %v6795_v8 }
 0x16b   :  { %6069 = vmatprep.subr.bf16.mxu0 %v6619_v11  ;;  %5505 = vmatprep.mubr.msk.f32.mxu0 %vm6620_vm3, %v6621_v26 }
 0x16d   :  { %6065 = vmatpush3.bf16.msra.mxu1 %v6891_v31 }
 0x16e   :  { %6072 = vmatprep.subr.bf16.mxu1 %v6619_v11  ;;  %6071 = vmatpush3.bf16.msra.mxu0 %v6827_v16 }
 0x16f   :  { %6078 = vmatprep.subr.bf16.mxu0 %v6619_v11 }
 0x170   :  { %5495 = vmatmul.mubr.msk.f32.vlgmr.msra.gmra.mrb[16].mxu1 %vm102_vm2, %v790_v60 }
 0x171   :  { %6074 = vmatpush3.bf16.msra.mxu1 %v6880_v28  ;;  %5516 = vmatprep.mubr.msk.f32.mxu1 %vm6620_vm3, %v6621_v26 }
 0x172   :  { %6075 = vmatprep.subr.bf16.mxu1 %v6619_v11 }
 0x175   :  { %6077 = vmatpush3.bf16.msra.mxu1 %v6897_v32 }
 0x176   :  { %6084 = vmatprep.subr.bf16.mxu1 %v6619_v11 }
 0x23b   :  { %v861_v27 = vpop.f32.mrb[14].mxu1  ;;  %v931_v61 = vpop.f32.mrb[16].mxu0 }
 0x23c   :  { %v862_v62 = vadd.f32 %v6953_v7, %v861_v27  ;;  %v5474_v63 = vpop.f32.mrb[15].mxu1  ;;  %v5485_v0 = vpop.f32.mrb[17].mxu0  ;;  %v932_v2 = vadd.f32 %v6962_v29, %v931_v61 }
 0x23e   :  { %v1006_v3 = vadd.f32 %v1005_v1, %v862_v62  ;;  %v1014_v6 = vadd.f32 %v1013_v5, %v932_v2 }
 0x240   :  { %v4958_v4 = vmul.f32 -1.442695, %v1006_v3  ;;  %v4959_v12 = vmul.f32 -1.442695, %v1014_v6  ;;  %v1481_v6 = vld [vmem:[#allocation3 + $0x18] sm:$0xff] }
 0x242   :  { %6369 = vpow2.f32 %v4958_v4 }
 0x243   :  { %v1001_v9 = vpop.f32.mrb[16].mxu1  ;;  %6371 = vpow2.f32 %v4959_v12 }
 0x244   :  { %v5496_v10 = vpop.f32.mrb[17].mxu1  ;;  %v1002_v18 = vadd.f32 %v6969_v47, %v1001_v9 }
 0x24c   :  { %v6370_v13 = vpop.eup %6369 }
 0x24d   :  { %v1010_v14 = vadd.f32 1.0, %v6370_v13  ;;  %v6372_v15 = vpop.eup %6371  ;;  %v1489_v13 = vld [vmem:[#allocation4 + $0x18] sm:$0xff] }
 0x24e   :  { %v1018_v17 = vadd.f32 1.0, %v6372_v15 }
 0x24f   :  { %6373 = vrcp.f32 %v1010_v14 }
 0x250   :  { %6375 = vrcp.f32 %v1018_v17 }
 0x259   :  { %v6374_v19 = vpop.eup %6373 }
 0x25a   :  { %v1022_v20 = vmul.f32 %v6374_v19, %v1002_v18  ;;  %v6376_v24 = vpop.eup %6375 }
 0x25b   :  { %v1025_v25 = vsub.f32 1.0, %v6376_v24  ;;  %v1027_v34 = vmul.f32 %v6376_v24, %v790_v60 }
 0x25c   :  { %v1023_v23 = vadd.f32 %v1022_v20, %v1021_v22 }
 0x25e   :  { %6377 = vtanh.f32 %v1023_v23 }
 0x268   :  { %v6378_v30 = vpop.eup %6377 }
 0x269   :  { %v1026_v33 = vmul.f32 %v6378_v30, %v1025_v25 }
 0x26b   :  { %v1028_v35 = vadd.f32 %v1027_v34, %v1026_v33  ;;  %v1497_v33 = vld [vmem:[#allocation5 + $0x18] sm:$0xff] }
 0x26d   :  { %1029 = vst.msk [vmem:[#allocation2 + $0x8] sm:$0xff] %vm102_vm2, %v1028_v35  ;;  %5506 = vmatmul.mubr.msk.f32.vlgmr.msra.gmra.mrb[18].mxu0 %vm102_vm2, %v1028_v35  ;;  %5517 = vmatmul.mubr.msk.f32.vlgmr.msra.gmra.mrb[18].mxu1 %vm102_vm2, %v1028_v35 }
 0x26e   :  { %6080 = vmatpush3.bf16.msra.mxu0 %v6856_v21  ;;  %5527 = vmatprep.mubr.msk.f32.mxu0 %vm6620_vm3, %v6621_v26 }
 0x26f   :  { %6081 = vmatprep.subr.bf16.mxu0 %v6619_v11  ;;  %6086 = vmatpush3.bf16.msra.mxu1 %v6795_v8 }
 0x270   :  { %6087 = vmatprep.subr.bf16.mxu1 %v6619_v11  ;;  %5538 = vmatprep.mubr.msk.f32.mxu1 %vm6620_vm3, %v6621_v26 }
 0x272   :  { %6083 = vmatpush3.bf16.msra.mxu0 %v6891_v31 }
 0x273   :  { %6090 = vmatprep.subr.bf16.mxu0 %v6619_v11  ;;  %6089 = vmatpush3.bf16.msra.mxu1 %v6827_v16 }
 0x274   :  { %6096 = vmatprep.subr.bf16.mxu1 %v6619_v11 }
 0x275   :  { %5528 = vmatmul.mubr.msk.f32.vlgmr.msra.gmra.mrb[20].mxu0 %vm102_vm2, %v1028_v35 }
 0x276   :  { %6092 = vmatpush3.bf16.msra.mxu0 %v6880_v28  ;;  %5549 = vmatprep.mubr.msk.f32.mxu0 %vm6620_vm3, %v6621_v26 }
 0x277   :  { %6093 = vmatprep.subr.bf16.mxu0 %v6619_v11 }
 0x27a   :  { %6095 = vmatpush3.bf16.msra.mxu0 %v6897_v32 }
 0x27b   :  { %6102 = vmatprep.subr.bf16.mxu0 %v6619_v11 }
 0x340   :  { %v1099_v36 = vpop.f32.mrb[18].mxu0  ;;  %v1169_v37 = vpop.f32.mrb[18].mxu1 }
 0x341   :  { %v1100_v38 = vadd.f32 %v6953_v7, %v1099_v36  ;;  %v5507_v39 = vpop.f32.mrb[19].mxu0  ;;  %v5518_v40 = vpop.f32.mrb[19].mxu1  ;;  %v1170_v42 = vadd.f32 %v6962_v29, %v1169_v37 }
 0x343   :  { %v1244_v43 = vadd.f32 %v1243_v41, %v1100_v38  ;;  %v1252_v46 = vadd.f32 %v1251_v45, %v1170_v42 }
 0x345   :  { %v4963_v44 = vmul.f32 -1.442695, %v1244_v43  ;;  %v4964_v50 = vmul.f32 -1.442695, %v1252_v46  ;;  %v1719_v46 = vld [vmem:[#allocation3 + $0x20] sm:$0xff] }
 0x347   :  { %6379 = vpow2.f32 %v4963_v44 }
 0x348   :  { %v1239_v48 = vpop.f32.mrb[20].mxu0  ;;  %6381 = vpow2.f32 %v4964_v50 }
 0x349   :  { %v5529_v49 = vpop.f32.mrb[21].mxu0  ;;  %v1240_v55 = vadd.f32 %v6969_v47, %v1239_v48 }
 0x351   :  { %v6380_v51 = vpop.eup %6379 }
 0x352   :  { %v1248_v52 = vadd.f32 1.0, %v6380_v51  ;;  %v6382_v53 = vpop.eup %6381  ;;  %v1727_v51 = vld [vmem:[#allocation4 + $0x20] sm:$0xff] }
 0x353   :  { %v1256_v54 = vadd.f32 1.0, %v6382_v53 }
 0x354   :  { %6383 = vrcp.f32 %v1248_v52 }
 0x355   :  { %6385 = vrcp.f32 %v1256_v54 }
 0x35e   :  { %v6384_v56 = vpop.eup %6383 }
 0x35f   :  { %v1260_v57 = vmul.f32 %v6384_v56, %v1240_v55  ;;  %v6386_v60 = vpop.eup %6385 }
 0x360   :  { %v1263_v27 = vsub.f32 1.0, %v6386_v60  ;;  %v1265_v63 = vmul.f32 %v6386_v60, %v1028_v35 }
 0x361   :  { %v1261_v59 = vadd.f32 %v1260_v57, %v1259_v58 }
 0x363   :  { %6387 = vtanh.f32 %v1261_v59 }
 0x36d   :  { %v6388_v61 = vpop.eup %6387 }
 0x36e   :  { %v1264_v62 = vmul.f32 %v6388_v61, %v1263_v27 }
 0x370   :  { %v1266_v0 = vadd.f32 %v1265_v63, %v1264_v62  ;;  %v1735_v62 = vld [vmem:[#allocation5 + $0x20] sm:$0xff] }
 0x372   :  { %1267 = vst.msk [vmem:[#allocation2 + $0x10] sm:$0xff] %vm102_vm2, %v1266_v0  ;;  %5539 = vmatmul.mubr.msk.f32.vlgmr.msra.gmra.mrb[20].mxu1 %vm102_vm2, %v1266_v0  ;;  %5550 = vmatmul.mubr.msk.f32.vlgmr.msra.gmra.mrb[22].mxu0 %vm102_vm2, %v1266_v0 }
 0x373   :  { %6098 = vmatpush3.bf16.msra.mxu1 %v6856_v21  ;;  %5560 = vmatprep.mubr.msk.f32.mxu1 %vm6620_vm3, %v6621_v26 }
 0x374   :  { %6099 = vmatprep.subr.bf16.mxu1 %v6619_v11  ;;  %6104 = vmatpush3.bf16.msra.mxu0 %v6795_v8 }
 0x375   :  { %6105 = vmatprep.subr.bf16.mxu0 %v6619_v11  ;;  %5571 = vmatprep.mubr.msk.f32.mxu0 %vm6620_vm3, %v6621_v26 }
 0x377   :  { %6101 = vmatpush3.bf16.msra.mxu1 %v6891_v31 }
 0x378   :  { %6108 = vmatprep.subr.bf16.mxu1 %v6619_v11  ;;  %6107 = vmatpush3.bf16.msra.mxu0 %v6827_v16 }
 0x379   :  { %6114 = vmatprep.subr.bf16.mxu0 %v6619_v11 }
 0x37a   :  { %5561 = vmatmul.mubr.msk.f32.vlgmr.msra.gmra.mrb[22].mxu1 %vm102_vm2, %v1266_v0 }
 0x37b   :  { %6110 = vmatpush3.bf16.msra.mxu1 %v6880_v28  ;;  %5582 = vmatprep.mubr.msk.f32.mxu1 %vm6620_vm3, %v6621_v26 }
 0x37c   :  { %6111 = vmatprep.subr.bf16.mxu1 %v6619_v11 }
 0x37f   :  { %6113 = vmatpush3.bf16.msra.mxu1 %v6897_v32 }
 0x380   :  { %6120 = vmatprep.subr.bf16.mxu1 %v6619_v11 }
 0x445   :  { %v1337_v1 = vpop.f32.mrb[20].mxu1  ;;  %v1407_v2 = vpop.f32.mrb[22].mxu0 }
 0x446   :  { %v1338_v3 = vadd.f32 %v6953_v7, %v1337_v1  ;;  %v5540_v4 = vpop.f32.mrb[21].mxu1  ;;  %v5551_v5 = vpop.f32.mrb[23].mxu0  ;;  %v1408_v9 = vadd.f32 %v6962_v29, %v1407_v2 }
 0x448   :  { %v1482_v10 = vadd.f32 %v1481_v6, %v1338_v3  ;;  %v1490_v14 = vadd.f32 %v1489_v13, %v1408_v9 }
 0x44a   :  { %v4968_v12 = vmul.f32 -1.442695, %v1482_v10  ;;  %v4969_v18 = vmul.f32 -1.442695, %v1490_v14  ;;  %v1957_v14 = vld [vmem:[#allocation3 + $0x28] sm:$0xff] }
 0x44c   :  { %6389 = vpow2.f32 %v4968_v12 }
 0x44d   :  { %v1477_v15 = vpop.f32.mrb[22].mxu1  ;;  %6391 = vpow2.f32 %v4969_v18 }
 0x44e   :  { %v5562_v17 = vpop.f32.mrb[23].mxu1  ;;  %v1478_v24 = vadd.f32 %v6969_v47, %v1477_v15 }
 0x456   :  { %v6390_v19 = vpop.eup %6389 }
 0x457   :  { %v1486_v20 = vadd.f32 1.0, %v6390_v19  ;;  %v6392_v22 = vpop.eup %6391  ;;  %v1965_v19 = vld [vmem:[#allocation4 + $0x28] sm:$0xff] }
 0x458   :  { %v1494_v23 = vadd.f32 1.0, %v6392_v22 }
 0x459   :  { %6393 = vrcp.f32 %v1486_v20 }
 0x45a   :  { %6395 = vrcp.f32 %v1494_v23 }
 0x463   :  { %v6394_v25 = vpop.eup %6393 }
 0x464   :  { %v1498_v30 = vmul.f32 %v6394_v25, %v1478_v24  ;;  %v6396_v35 = vpop.eup %6395 }
 0x465   :  { %v1501_v36 = vsub.f32 1.0, %v6396_v35  ;;  %v1503_v39 = vmul.f32 %v6396_v35, %v1266_v0 }
 0x466   :  { %v1499_v34 = vadd.f32 %v1498_v30, %v1497_v33 }
 0x468   :  { %6397 = vtanh.f32 %v1499_v34 }
 0x472   :  { %v6398_v37 = vpop.eup %6397 }
 0x473   :  { %v1502_v38 = vmul.f32 %v6398_v37, %v1501_v36 }
 0x475   :  { %v1504_v40 = vadd.f32 %v1503_v39, %v1502_v38  ;;  %v1973_v38 = vld [vmem:[#allocation5 + $0x28] sm:$0xff] }
 0x477   :  { %1505 = vst.msk [vmem:[#allocation2 + $0x18] sm:$0xff] %vm102_vm2, %v1504_v40  ;;  %5572 = vmatmul.mubr.msk.f32.vlgmr.msra.gmra.mrb[24].mxu0 %vm102_vm2, %v1504_v40  ;;  %5583 = vmatmul.mubr.msk.f32.vlgmr.msra.gmra.mrb[24].mxu1 %vm102_vm2, %v1504_v40 }
 0x478   :  { %6116 = vmatpush3.bf16.msra.mxu0 %v6856_v21  ;;  %5593 = vmatprep.mubr.msk.f32.mxu0 %vm6620_vm3, %v6621_v26 }
 0x479   :  { %6117 = vmatprep.subr.bf16.mxu0 %v6619_v11  ;;  %6122 = vmatpush3.bf16.msra.mxu1 %v6795_v8 }
 0x47a   :  { %6123 = vmatprep.subr.bf16.mxu1 %v6619_v11  ;;  %5604 = vmatprep.mubr.msk.f32.mxu1 %vm6620_vm3, %v6621_v26 }
 0x47c   :  { %6119 = vmatpush3.bf16.msra.mxu0 %v6891_v31 }
 0x47d   :  { %6126 = vmatprep.subr.bf16.mxu0 %v6619_v11  ;;  %6125 = vmatpush3.bf16.msra.mxu1 %v6827_v16 }
 0x47e   :  { %6132 = vmatprep.subr.bf16.mxu1 %v6619_v11 }
 0x47f   :  { %5594 = vmatmul.mubr.msk.f32.vlgmr.msra.gmra.mrb[26].mxu0 %vm102_vm2, %v1504_v40 }
 0x480   :  { %6128 = vmatpush3.bf16.msra.mxu0 %v6880_v28  ;;  %5615 = vmatprep.mubr.msk.f32.mxu0 %vm6620_vm3, %v6621_v26 }
 0x481   :  { %6129 = vmatprep.subr.bf16.mxu0 %v6619_v11 }
 0x484   :  { %6131 = vmatpush3.bf16.msra.mxu0 %v6897_v32 }
 0x485   :  { %6138 = vmatprep.subr.bf16.mxu0 %v6619_v11 }
 0x54a   :  { %v1575_v41 = vpop.f32.mrb[24].mxu0  ;;  %v1645_v42 = vpop.f32.mrb[24].mxu1 }
 0x54b   :  { %v1576_v43 = vadd.f32 %v6953_v7, %v1575_v41  ;;  %v5573_v44 = vpop.f32.mrb[25].mxu0  ;;  %v5584_v45 = vpop.f32.mrb[25].mxu1  ;;  %v1646_v48 = vadd.f32 %v6962_v29, %v1645_v42 }
 0x54d   :  { %v1720_v49 = vadd.f32 %v1719_v46, %v1576_v43  ;;  %v1728_v52 = vadd.f32 %v1727_v51, %v1646_v48 }
 0x54f   :  { %v4973_v50 = vmul.f32 -1.442695, %v1720_v49  ;;  %v4974_v55 = vmul.f32 -1.442695, %v1728_v52  ;;  %v2195_v52 = vld [vmem:[#allocation3 + $0x30] sm:$0xff] }
 0x551   :  { %6399 = vpow2.f32 %v4973_v50 }
 0x552   :  { %v1715_v53 = vpop.f32.mrb[26].mxu0  ;;  %6401 = vpow2.f32 %v4974_v55  ;;  %v2203_v55 = vld [vmem:[#allocation4 + $0x30] sm:$0xff] }
 0x553   :  { %v5595_v54 = vpop.f32.mrb[27].mxu0  ;;  %v1716_v60 = vadd.f32 %v6969_v47, %v1715_v53 }
 0x55b   :  { %v6400_v56 = vpop.eup %6399 }
 0x55c   :  { %v1724_v57 = vadd.f32 1.0, %v6400_v56  ;;  %v6402_v58 = vpop.eup %6401 }
 0x55d   :  { %v1732_v59 = vadd.f32 1.0, %v6402_v58 }
 0x55e   :  { %6403 = vrcp.f32 %v1724_v57 }
 0x55f   :  { %6405 = vrcp.f32 %v1732_v59 }
 0x568   :  { %v6404_v27 = vpop.eup %6403 }
 0x569   :  { %v1736_v61 = vmul.f32 %v6404_v27, %v1716_v60  ;;  %v6406_v0 = vpop.eup %6405 }
 0x56a   :  { %v1739_v1 = vsub.f32 1.0, %v6406_v0  ;;  %v1741_v4 = vmul.f32 %v6406_v0, %v1504_v40 }
 0x56b   :  { %v1737_v63 = vadd.f32 %v1736_v61, %v1735_v62 }
 0x56d   :  { %6407 = vtanh.f32 %v1737_v63 }
 0x577   :  { %v6408_v2 = vpop.eup %6407 }
 0x578   :  { %v1740_v3 = vmul.f32 %v6408_v2, %v1739_v1  ;;  %v2211_v2 = vld [vmem:[#allocation5 + $0x30] sm:$0xff] }
 0x57a   :  { %v1742_v5 = vadd.f32 %v1741_v4, %v1740_v3 }
 0x57c   :  { %1743 = vst.msk [vmem:[#allocation2 + $0x20] sm:$0xff] %vm102_vm2, %v1742_v5  ;;  %5605 = vmatmul.mubr.msk.f32.vlgmr.msra.gmra.mrb[26].mxu1 %vm102_vm2, %v1742_v5  ;;  %5616 = vmatmul.mubr.msk.f32.vlgmr.msra.gmra.mrb[28].mxu0 %vm102_vm2, %v1742_v5 }
 0x57d   :  { %6134 = vmatpush3.bf16.msra.mxu1 %v6856_v21  ;;  %5626 = vmatprep.mubr.msk.f32.mxu1 %vm6620_vm3, %v6621_v26 }
 0x57e   :  { %6135 = vmatprep.subr.bf16.mxu1 %v6619_v11  ;;  %6140 = vmatpush3.bf16.msra.mxu0 %v6795_v8 }
 0x57f   :  { %6141 = vmatprep.subr.bf16.mxu0 %v6619_v11  ;;  %5637 = vmatprep.mubr.msk.f32.mxu0 %vm6620_vm3, %v6621_v26 }
 0x581   :  { %6137 = vmatpush3.bf16.msra.mxu1 %v6891_v31 }
 0x582   :  { %6144 = vmatprep.subr.bf16.mxu1 %v6619_v11  ;;  %6143 = vmatpush3.bf16.msra.mxu0 %v6827_v16 }
 0x583   :  { %6150 = vmatprep.subr.bf16.mxu0 %v6619_v11 }
 0x584   :  { %5627 = vmatmul.mubr.msk.f32.vlgmr.msra.gmra.mrb[28].mxu1 %vm102_vm2, %v1742_v5 }
 0x585   :  { %6146 = vmatpush3.bf16.msra.mxu1 %v6880_v28  ;;  %5648 = vmatprep.mubr.msk.f32.mxu1 %vm6620_vm3, %v6621_v26 }
 0x586   :  { %6147 = vmatprep.subr.bf16.mxu1 %v6619_v11 }
 0x589   :  { %6149 = vmatpush3.bf16.msra.mxu1 %v6897_v32 }
 0x58a   :  { %6156 = vmatprep.subr.bf16.mxu1 %v6619_v11 }
 0x64f   :  { %v1813_v6 = vpop.f32.mrb[26].mxu1  ;;  %v1883_v9 = vpop.f32.mrb[28].mxu0 }
 0x650   :  { %v1814_v10 = vadd.f32 %v6953_v7, %v1813_v6  ;;  %v5606_v12 = vpop.f32.mrb[27].mxu1  ;;  %v5617_v13 = vpop.f32.mrb[29].mxu0  ;;  %v1884_v15 = vadd.f32 %v6962_v29, %v1883_v9 }
 0x651   :  { %v2469_v12 = vld [vmem:[%s7580_s6 + $0x10] sm:$0xff]  ;;  %v2470_v13 = vld [vmem:[%s7580_s6 + $0x18] sm:$0xff] }
 0x652   :  { %v1958_v17 = vadd.f32 %v1957_v14, %v1814_v10  ;;  %v1966_v20 = vadd.f32 %v1965_v19, %v1884_v15  ;;  %v6178_v15 = vpack.c.bf16 %v2470_v13, %v2469_v12  ;;  %v7149_v19 = vld [vmem:[#allocation2] sm:$0xff] }
 0x654   :  { %v4978_v18 = vmul.f32 -1.442695, %v1958_v17  ;;  %v4979_v24 = vmul.f32 -1.442695, %v1966_v20  ;;  %v4999_v17 = vld [vmem:[%s7580_s6 + $0x20] sm:$0xff] }
 0x656   :  { %6409 = vpow2.f32 %v4978_v18  ;;  %v5000_v18 = vld [vmem:[%s7580_s6 + $0x28] sm:$0xff] }
 0x657   :  { %v1953_v22 = vpop.f32.mrb[28].mxu1  ;;  %6411 = vpow2.f32 %v4979_v24  ;;  %v6182_v20 = vpack.c.bf16 %v5000_v18, %v4999_v17  ;;  %v7163_v24 = vld [vmem:[#allocation2 + $0x8] sm:$0xff] }
 0x658   :  { %v5628_v23 = vpop.f32.mrb[29].mxu1  ;;  %v1954_v35 = vadd.f32 %v6969_v47, %v1953_v22  ;;  %v5001_v22 = vld [vmem:[%s7580_s6 + $0x30] sm:$0xff] }
 0x660   :  { %v6410_v25 = vpop.eup %6409 }
 0x661   :  { %v1962_v30 = vadd.f32 1.0, %v6410_v25  ;;  %v6412_v33 = vpop.eup %6411  ;;  %v7169_v25 = vld [vmem:[#allocation2 + $0x10] sm:$0xff] }
 0x662   :  { %v1970_v34 = vadd.f32 1.0, %v6412_v33 }
 0x663   :  { %6413 = vrcp.f32 %v1962_v30  ;;  %v7179_v30 = vld [vmem:[#allocation2 + $0x20] sm:$0xff] }
 0x664   :  { %6415 = vrcp.f32 %v1970_v34 }
 0x66d   :  { %v6414_v36 = vpop.eup %6413 }
 0x66e   :  { %v1974_v37 = vmul.f32 %v6414_v36, %v1954_v35  ;;  %v6416_v40 = vpop.eup %6415  ;;  %v2867_v35 = vld [vmem:[%s7581_s7] sm:$0xff]  ;;  %v2868_v36 = vld [vmem:[%s7581_s7 + $0x8] sm:$0xff] }
 0x66f   :  { %v1977_v41 = vsub.f32 1.0, %v6416_v40  ;;  %v1979_v44 = vmul.f32 %v6416_v40, %v1742_v5  ;;  %v2869_v40 = vld [vmem:[%s7581_s7 + $0x10] sm:$0xff] }
 0x670   :  { %v1975_v39 = vadd.f32 %v1974_v37, %v1973_v38  ;;  %v5012_v37 = vld [vmem:[%s7580_s6 + $0x40] sm:$0xff]  ;;  %v7213_v38 = vpack.c.bf16 %v2868_v36, %v2867_v35 }
 0x672   :  { %6417 = vtanh.f32 %v1975_v39  ;;  %v5013_v39 = vld [vmem:[%s7580_s6 + $0x48] sm:$0xff] }
 0x67c   :  { %v6418_v42 = vpop.eup %6417 }
 0x67d   :  { %v1978_v43 = vmul.f32 %v6418_v42, %v1977_v41  ;;  %v2870_v41 = vld [vmem:[%s7581_s7 + $0x18] sm:$0xff]  ;;  %v6190_v42 = vpack.c.bf16 %v5013_v39, %v5012_v37 }
 0x67f   :  { %v1980_v45 = vadd.f32 %v1979_v44, %v1978_v43  ;;  %v7225_v43 = vpack.c.bf16 %v2870_v41, %v2869_v40  ;;  %v101_v44 = vld [vmem:[%s7575_s1 + $0x8] sm:$0xff] }
 0x680   :  { %104 = vst.msk [vmem:[%s7587_s13 + $0x8] sm:$0xff] %vm102_vm2, %v101_v44  ;;  %v2449_v44 = vld [vmem:[#allocation5 + $0x38] sm:$0xff] }
 0x681   :  { %1981 = vst.msk [vmem:[#allocation2 + $0x28] sm:$0xff] %vm102_vm2, %v1980_v45  ;;  %5638 = vmatmul.mubr.msk.f32.vlgmr.msra.gmra.mrb[30].mxu0 %vm102_vm2, %v1980_v45  ;;  %5649 = vmatmul.mubr.msk.f32.vlgmr.msra.gmra.mrb[30].mxu1 %vm102_vm2, %v1980_v45 }
 0x682   :  { %6152 = vmatpush3.bf16.msra.mxu0 %v6856_v21  ;;  %5659 = vmatprep.mubr.msk.f32.mxu0 %vm6620_vm3, %v6621_v26 }
 0x683   :  { %6153 = vmatprep.subr.bf16.mxu0 %v6619_v11  ;;  %6158 = vmatpush3.bf16.msra.mxu1 %v6795_v8  ;;  %v2467_v8 = vld [vmem:[%s7580_s6] sm:$0xff] }
 0x684   :  { %6159 = vmatprep.subr.bf16.mxu1 %v6619_v11  ;;  %5670 = vmatprep.mubr.msk.f32.mxu1 %vm6620_vm3, %v6621_v26 }
 0x686   :  { %6155 = vmatpush3.bf16.msra.mxu0 %v6891_v31 }
 0x687   :  { %6162 = vmatprep.subr.bf16.mxu0 %v6619_v11  ;;  %6161 = vmatpush3.bf16.msra.mxu1 %v6827_v16  ;;  %v2468_v16 = vld [vmem:[%s7580_s6 + $0x8] sm:$0xff] }
 0x688   :  { %6168 = vmatprep.subr.bf16.mxu1 %v6619_v11  ;;  %v6174_v46 = vpack.c.bf16 %v2468_v16, %v2467_v8  ;;  %v7184_v33 = vld [vmem:[#allocation2 + $0x28] sm:$0xff]  ;;  %v5015_v8 = vld [vmem:[%s7580_s6 + $0x58] sm:$0xff] }
 0x689   :  { %5660 = vmatmul.mubr.msk.f32.vlgmr.msra.gmra.mrb[32].mxu0 %vm102_vm2, %v1980_v45 }
 0x68a   :  { %6164 = vmatpush3.bf16.msra.mxu0 %v6880_v28  ;;  %5681 = vmatprep.mubr.msk.f32.mxu0 %vm6620_vm3, %v6621_v26 }
 0x68b   :  { %6165 = vmatprep.subr.bf16.mxu0 %v6619_v11 }
 0x68e   :  { %6167 = vmatpush3.bf16.msra.mxu0 %v6897_v32 }
 0x68f   :  { %6175 = vmatprep.subr.bf16.mxu0 %v6174_v46 }
 0x754   :  { %v2051_v48 = vpop.f32.mrb[30].mxu0  ;;  %v2121_v49 = vpop.f32.mrb[30].mxu1 }
 0x755   :  { %v2052_v28 = vadd.f32 %v6953_v7, %v2051_v48  ;;  %v5639_v50 = vpop.f32.mrb[31].mxu0  ;;  %v5650_v51 = vpop.f32.mrb[31].mxu1  ;;  %v2122_v53 = vadd.f32 %v6962_v29, %v2121_v49 }
 0x756   :  { %v2433_v51 = vld [vmem:[#allocation3 + $0x38] sm:$0xff] }
 0x757   :  { %v2196_v32 = vadd.f32 %v2195_v52, %v2052_v28  ;;  %v2204_v56 = vadd.f32 %v2203_v55, %v2122_v53 }
 0x759   :  { %v4983_v54 = vmul.f32 -1.442695, %v2196_v32  ;;  %v4984_v59 = vmul.f32 -1.442695, %v2204_v56  ;;  %v7246_v56 = vld [vmem:[#allocation8] ss:$0 sm:$0xff] }
 0x75b   :  { %6419 = vpow2.f32 %v4983_v54  ;;  %v2441_v54 = vld [vmem:[#allocation4 + $0x38] sm:$0xff] }
 0x75c   :  { %v2191_v57 = vpop.f32.mrb[32].mxu0  ;;  %6421 = vpow2.f32 %v4984_v59 }
 0x75d   :  { %v5661_v58 = vpop.f32.mrb[33].mxu0  ;;  %v2192_v63 = vadd.f32 %v6969_v47, %v2191_v57 }
 0x765   :  { %v6420_v60 = vpop.eup %6419 }
 0x766   :  { %v2200_v27 = vadd.f32 1.0, %v6420_v60  ;;  %v6422_v61 = vpop.eup %6421 }
 0x767   :  { %v2208_v62 = vadd.f32 1.0, %v6422_v61 }
 0x768   :  { %6423 = vrcp.f32 %v2200_v27 }
 0x769   :  { %6425 = vrcp.f32 %v2208_v62 }
 0x772   :  { %v6424_v0 = vpop.eup %6423 }
 0x773   :  { %v2212_v1 = vmul.f32 %v6424_v0, %v2192_v63  ;;  %v6426_v4 = vpop.eup %6425 }
 0x774   :  { %v2215_v5 = vsub.f32 1.0, %v6426_v4  ;;  %v2217_v10 = vmul.f32 %v6426_v4, %v1980_v45  ;;  %v5014_v45 = vld [vmem:[%s7580_s6 + $0x50] sm:$0xff] }
 0x775   :  { %v2213_v3 = vadd.f32 %v2212_v1, %v2211_v2  ;;  %v6194_v16 = vpack.c.bf16 %v5015_v8, %v5014_v45  ;;  %v7254_v1 = vld [vmem:[#allocation8 + $0x1] ss:$0 sm:$0xff] }
 0x777   :  { %6427 = vtanh.f32 %v2213_v3 }
 0x781   :  { %v6428_v6 = vpop.eup %6427 }
 0x782   :  { %v2216_v9 = vmul.f32 %v6428_v6, %v2215_v5 }
 0x784   :  { %v7134_v14 = vadd.f32 %v2217_v10, %v2216_v9 }
 0x786   :  { %2219 = vst.msk [vmem:[#allocation2 + $0x30] sm:$0xff] %vm102_vm2, %v7134_v14  ;;  %5671 = vmatmul.mubr.msk.f32.vlgmr.msra.gmra.mrb[32].mxu1 %vm102_vm2, %v7134_v14  ;;  %5682 = vmatmul.mubr.msk.f32.vlgmr.msra.gmra.mrb[34].mxu0 %vm102_vm2, %v7134_v14 }
 0x787   :  { %6170 = vmatpush3.bf16.msra.mxu1 %v6856_v21  ;;  %6177 = vmatpush3.bf16.msra.mxu0 %v6174_v46  ;;  %v5002_v21 = vld [vmem:[%s7580_s6 + $0x38] sm:$0xff] }
 0x788   :  { %5703 = vmatprep.mubr.msk.f32.mxu0 %vm102_vm2, %v7149_v19  ;;  %6171 = vmatprep.subr.bf16.mxu1 %v6619_v11  ;;  %v6186_v23 = vpack.c.bf16 %v5002_v21, %v5001_v22 }
 0x789   :  { %6179 = vmatprep.subr.bf16.mxu0 %v6178_v15  ;;  %5692 = vmatprep.mubr.msk.f32.mxu1 %vm6620_vm3, %v6621_v26 }
 0x78b   :  { %6173 = vmatpush3.bf16.msra.mxu1 %v6891_v31  ;;  %6181 = vmatpush3.bf16.msra.mxu0 %v6178_v15  ;;  %v7175_v31 = vld [vmem:[#allocation2 + $0x18] sm:$0xff] }
 0x78c   :  { %6183 = vmatprep.subr.bf16.mxu1 %v6182_v20  ;;  %6191 = vmatprep.subr.bf16.mxu0 %v6190_v42 }
 0x78d   :  { %v7190_v34 = vld [vmem:[#allocation2 + $0x30] sm:$0xff] }
 0x78e   :  { %5693 = vmatmul.mubr.msk.f32.vlgmr.msra.gmra.mrb[34].mxu1 %vm102_vm2, %v7134_v14  ;;  %5704 = vmatmul.mubr.msk.f32.vlgmr.msra.gmra.mrb[36].mxu0 %vm102_vm2, %v7163_v24 }
 0x78f   :  { %5706 = vmatprep.mubr.msk.f32.mxu0 %vm102_vm2, %v7169_v25  ;;  %6185 = vmatpush3.bf16.msra.mxu1 %v6182_v20 }
 0x790   :  { %5723 = vmatprep.mubr.msk.f32.mxu1 %vm102_vm2, %v7149_v19  ;;  %6187 = vmatprep.subr.bf16.mxu1 %v6186_v23 }
 0x791   :  { %6193 = vmatpush3.bf16.msra.mxu0 %v6190_v42 }
 0x792   :  { %5707 = vmatmul.mubr.msk.f32.gmra.mrb[38].mxu0 %vm102_vm2, %v7175_v31  ;;  %6195 = vmatprep.subr.bf16.mxu0 %v6194_v16 }
 0x793   :  { %5709 = vmatprep.mubr.msk.f32.mxu0 %vm102_vm2, %v7179_v30  ;;  %6189 = vmatpush3.bf16.msra.mxu1 %v6186_v23 }
 0x794   :  { %6198 = vmatprep.subr.bf16.mxu1 %v6619_v11 }
 0x795   :  { %6197 = vmatpush3.bf16.msra.mxu0 %v6194_v16 }
 0x796   :  { %5710 = vmatmul.mubr.msk.f32.gmra.mrb[40].mxu0 %vm102_vm2, %v7184_v33  ;;  %5724 = vmatmul.mubr.msk.f32.vlgmr.msra.gmra.mrb[36].mxu1 %vm102_vm2, %v7163_v24 }
 0x797   :  { %5712 = vmatprep.mubr.msk.f32.mxu0 %vm102_vm2, %v7190_v34  ;;  %5726 = vmatprep.mubr.msk.f32.mxu1 %vm102_vm2, %v7169_v25 }
 0x798   :  { %6200 = vmatpush3.bf16.msra.mxu1 %v7213_v38  ;;  %6210 = vmatprep.subr.bf16.mxu0 %v6619_v11 }
 0x799   :  { %6201 = vmatprep.subr.bf16.mxu1 %v6619_v11 }
 0x79a   :  { %5727 = vmatmul.mubr.msk.f32.gmra.mrb[38].mxu1 %vm102_vm2, %v7175_v31 }
 0x79b   :  { %5729 = vmatprep.mubr.msk.f32.mxu1 %vm102_vm2, %v7179_v30 }
 0x79c   :  { %6203 = vmatpush3.bf16.msra.mxu1 %v7225_v43 }
 0x79d   :  { %6204 = vmatprep.subr.bf16.mxu1 %v6619_v11 }
 0x79e   :  { %5730 = vmatmul.mubr.msk.f32.gmra.mrb[40].mxu1 %vm102_vm2, %v7184_v33 }
 0x79f   :  { %5732 = vmatprep.mubr.msk.f32.mxu1 %vm102_vm2, %v7190_v34 }
 0x859   :  { %v2289_v46 = vpop.f32.mrb[32].mxu1  ;;  %v2359_v48 = vpop.f32.mrb[34].mxu0 }
 0x85a   :  { %v2290_v49 = vadd.f32 %v6953_v7, %v2289_v46  ;;  %v5672_v28 = vpop.f32.mrb[33].mxu1  ;;  %v5683_v50 = vpop.f32.mrb[35].mxu0  ;;  %v2360_v52 = vadd.f32 %v6962_v29, %v2359_v48 }
 0x85b   :  { %v5026_v50 = vld [vmem:[%s7581_s7 + $0x28] sm:$0xff] }
 0x85c   :  { %v2434_v53 = vadd.f32 %v2433_v51, %v2290_v49  ;;  %v2442_v55 = vadd.f32 %v2441_v54, %v2360_v52  ;;  %v5030_v52 = vld [vmem:[%s7581_s7 + $0x48] sm:$0xff]  ;;  %v5027_v54 = vld [vmem:[%s7581_s7 + $0x30] sm:$0xff] }
 0x85e   :  { %v4988_v32 = vmul.f32 -1.442695, %v2434_v53  ;;  %v4989_v61 = vmul.f32 -1.442695, %v2442_v55  ;;  %v7302_v53 = vld [vmem:[%s7587_s13 + $0x8] sm:$0xff]  ;;  %v5028_v55 = vld [vmem:[%s7581_s7 + $0x38] sm:$0xff] }
 0x860   :  { %6429 = vpow2.f32 %v4988_v32 }
 0x861   :  { %v2429_v57 = vpop.f32.mrb[34].mxu1  ;;  %v5705_v58 = vpop.f32.mrb[36].mxu0  ;;  %6431 = vpow2.f32 %v4989_v61 }
 0x862   :  { %v2574_v59 = vadd.f32 %v5705_v58, %v7246_v56  ;;  %v5694_v60 = vpop.f32.mrb[35].mxu1  ;;  %v2568_v27 = vpop.f32.mrb[37].mxu0  ;;  %v2430_v40 = vadd.f32 %v6969_v47, %v2429_v57  ;;  %v5025_v47 = vld [vmem:[%s7581_s7 + $0x20] sm:$0xff]  ;;  %v5032_v58 = vld [vmem:[%s7581_s7 + $0x58] sm:$0xff] }
 0x863   :  { %v2569_v7 = vadd.f32 %v7246_v56, %v2568_v27  ;;  %v7304_v32 = vpack.c.bf16 %v5026_v50, %v5025_v47 }
 0x864   :  { %2608 = vst.msk [vmem:[#allocation3 + $0x8] sm:$0xff] %vm102_vm2, %v2574_v59  ;;  %v7327_v59 = vpack.c.bf16 %v5028_v55, %v5027_v54 }
 0x865   :  { %2607 = vst.msk [vmem:[#allocation3] sm:$0xff] %vm102_vm2, %v2569_v7  ;;  %v5708_v29 = vpop.f32.mrb[38].mxu0  ;;  %v5016_v7 = vld [vmem:[#allocation8 + $0x2] ss:$0 sm:$0xff] }
 0x866   :  { %v2584_v62 = vadd.f32 %v5708_v29, %v7246_v56  ;;  %v2578_v63 = vpop.f32.mrb[39].mxu0  ;;  %v7371_v29 = vld [vmem:[#allocation10] ss:$0 sm:$0xff] }
 0x867   :  { %v2579_v0 = vadd.f32 %v7246_v56, %v2578_v63 }
 0x868   :  { %2610 = vst.msk [vmem:[#allocation3 + $0x18] sm:$0xff] %vm102_vm2, %v2584_v62 }
 0x869   :  { %2609 = vst.msk [vmem:[#allocation3 + $0x10] sm:$0xff] %vm102_vm2, %v2579_v0  ;;  %v5711_v2 = vpop.f32.mrb[40].mxu0  ;;  %v5725_v3 = vpop.f32.mrb[36].mxu1 }
 0x86a   :  { %v6430_v4 = vpop.eup %6429  ;;  %v2594_v5 = vadd.f32 %v5711_v2, %v7246_v56  ;;  %v2700_v6 = vadd.f32 %v5725_v3, %v7254_v1  ;;  %v2588_v9 = vpop.f32.mrb[41].mxu0 }
 0x86b   :  { %v2694_v10 = vpop.f32.mrb[37].mxu1  ;;  %v2438_v12 = vadd.f32 1.0, %v6430_v4  ;;  %v2589_v13 = vadd.f32 %v7246_v56, %v2588_v9  ;;  %v6432_v21 = vpop.eup %6431 }
 0x86c   :  { %v2695_v15 = vadd.f32 %v7254_v1, %v2694_v10  ;;  %2612 = vst.msk [vmem:[#allocation3 + $0x28] sm:$0xff] %vm102_vm2, %v2594_v5  ;;  %2734 = vst.msk [vmem:[#allocation4 + $0x8] sm:$0xff] %vm102_vm2, %v2700_v6  ;;  %v2446_v39 = vadd.f32 1.0, %v6432_v21  ;;  %v3119_v4 = vld [vmem:[#allocation3] sm:$0xff] }
 0x86d   :  { %6433 = vrcp.f32 %v2438_v12  ;;  %2611 = vst.msk [vmem:[#allocation3 + $0x20] sm:$0xff] %vm102_vm2, %v2589_v13  ;;  %v5728_v17 = vpop.f32.mrb[38].mxu1 }
 0x86e   :  { %2733 = vst.msk [vmem:[#allocation4] sm:$0xff] %vm102_vm2, %v2695_v15  ;;  %v2710_v18 = vadd.f32 %v5728_v17, %v7254_v1  ;;  %v2704_v20 = vpop.f32.mrb[39].mxu1  ;;  %6435 = vrcp.f32 %v2446_v39  ;;  %v7380_v15 = vld [vmem:[#allocation10 + $0x1] ss:$0 sm:$0xff] }
 0x86f   :  { %v2705_v22 = vadd.f32 %v7254_v1, %v2704_v20 }
 0x870   :  { %2736 = vst.msk [vmem:[#allocation4 + $0x18] sm:$0xff] %vm102_vm2, %v2710_v18 }
 0x871   :  { %2735 = vst.msk [vmem:[#allocation4 + $0x10] sm:$0xff] %vm102_vm2, %v2705_v22  ;;  %v5731_v23 = vpop.f32.mrb[40].mxu1 }
 0x872   :  { %v2720_v35 = vadd.f32 %v5731_v23, %v7254_v1  ;;  %v2714_v36 = vpop.f32.mrb[41].mxu1 }
 0x873   :  { %v2715_v37 = vadd.f32 %v7254_v1, %v2714_v36 }
 0x874   :  { %2738 = vst.msk [vmem:[#allocation4 + $0x28] sm:$0xff] %vm102_vm2, %v2720_v35 }
 0x875   :  { %2737 = vst.msk [vmem:[#allocation4 + $0x20] sm:$0xff] %vm102_vm2, %v2715_v37  ;;  %v3127_v35 = vld [vmem:[#allocation4] sm:$0xff] }
 0x877   :  { %v6434_v41 = vpop.eup %6433 }
 0x878   :  { %v2450_v42 = vmul.f32 %v6434_v41, %v2430_v40  ;;  %v6436_v8 = vpop.eup %6435 }
 0x879   :  { %v2453_v16 = vsub.f32 1.0, %v6436_v8  ;;  %v2455_v48 = vmul.f32 %v6436_v8, %v7134_v14  ;;  %v5029_v14 = vld [vmem:[%s7581_s7 + $0x40] sm:$0xff] }
 0x87a   :  { %v2451_v45 = vadd.f32 %v2450_v42, %v2449_v44  ;;  %v7312_v57 = vpack.c.bf16 %v5030_v52, %v5029_v14 }
 0x87c   :  { %6437 = vtanh.f32 %v2451_v45 }
 0x886   :  { %v6438_v46 = vpop.eup %6437 }
 0x887   :  { %v2454_v49 = vmul.f32 %v6438_v46, %v2453_v16 }
 0x889   :  { %v2456_v28 = vadd.f32 %v2455_v48, %v2454_v49  ;;  %v7389_v48 = vld [vmem:[#allocation10 + $0x2] ss:$0 sm:$0xff] }
 0x88b   :  { %2457 = vst.msk [vmem:[#allocation2 + $0x38] sm:$0xff] %vm102_vm2, %v2456_v28  ;;  %2458 = vst.msk [vmem:[%s7587_s13] sm:$0xff] %vm102_vm2, %v2456_v28 }
 0x892   :  { %v2466_v51 = vld [vmem:[#allocation2 + $0x38] sm:$0xff] }
 0x893   :  { %5713 = vmatmul.mubr.msk.f32.gmra.mrb[42].mxu0 %vm102_vm2, %v2466_v51  ;;  %5733 = vmatmul.mubr.msk.f32.gmra.mrb[42].mxu1 %vm102_vm2, %v2466_v51 }
 0x894   :  { %5743 = vmatprep.mubr.msk.f32.mxu0 %vm102_vm2, %v7149_v19  ;;  %5763 = vmatprep.mubr.msk.f32.mxu1 %vm6620_vm3, %v6621_v26  ;;  %v5031_v19 = vld [vmem:[%s7581_s7 + $0x50] sm:$0xff] }
 0x897   :  { %5744 = vmatmul.mubr.msk.f32.vlgmr.msra.gmra.mrb[44].mxu0 %vm102_vm2, %v7163_v24  ;;  %5764 = vmatmul.mubr.msk.f32.vlgmr.msra.gmra.mrb[44].mxu1 %vm102_vm2, %v7302_v53  ;;  %v7333_v24 = vpack.c.bf16 %v5032_v58, %v5031_v19 }
 0x898   :  { %6206 = vmatpush3.bf16.msra.mxu1 %v7304_v32  ;;  %5746 = vmatprep.mubr.msk.f32.mxu0 %vm102_vm2, %v7169_v25 }
 0x899   :  { %6207 = vmatprep.subr.bf16.mxu1 %v6619_v11  ;;  %5774 = vmatprep.mubr.msk.f32.mxu1 %vm6620_vm3, %v6621_v26 }
 0x89a   :  { %6212 = vmatpush3.bf16.msra.mxu0 %v7312_v57 }
 0x89b   :  { %5747 = vmatmul.mubr.msk.f32.gmra.mrb[46].mxu0 %vm102_vm2, %v7175_v31  ;;  %6213 = vmatprep.subr.bf16.mxu0 %v6619_v11 }
 0x89c   :  { %6209 = vmatpush3.bf16.msra.mxu1 %v7327_v59  ;;  %5749 = vmatprep.mubr.msk.f32.mxu0 %vm102_vm2, %v7179_v30 }
 0x89d   :  { %6216 = vmatprep.subr.bf16.mxu1 %v6619_v11 }
 0x89e   :  { %6215 = vmatpush3.bf16.msra.mxu0 %v7333_v24 }
 0x89f   :  { %5775 = vmatmul.mubr.msk.f32.vlgmr.msra.gmra.mrb[46].mxu1 %vm102_vm2, %v7302_v53  ;;  %5750 = vmatmul.mubr.msk.f32.gmra.mrb[48].mxu0 %vm102_vm2, %v7184_v33 }
 0x8a0   :  { %5752 = vmatprep.mubr.msk.f32.mxu0 %vm102_vm2, %v7190_v34  ;;  %6218 = vmatpush3.bf16.msra.mxu1 %v7213_v38 }
 0x8a1   :  { %6222 = vmatprep.subr.bf16.mxu0 %v6619_v11  ;;  %6219 = vmatprep.subr.bf16.mxu1 %v6619_v11 }
 0x8a2   :  { %5796 = vmatprep.mubr.msk.f32.mxu1 %vm6620_vm3, %v6621_v26 }
 0x8a3   :  { %5753 = vmatmul.mubr.msk.f32.gmra.mrb[50].mxu0 %vm102_vm2, %v2466_v51 }
 0x8a4   :  { %5785 = vmatprep.mubr.msk.f32.mxu0 %vm6620_vm3, %v6621_v26  ;;  %6221 = vmatpush3.bf16.msra.mxu1 %v7225_v43 }
 0x8a5   :  { %6228 = vmatprep.subr.bf16.mxu1 %v6619_v11 }
 0x8a7   :  { %5786 = vmatmul.mubr.msk.f32.vlgmr.msra.gmra.mrb[52].mxu0 %vm102_vm2, %v7302_v53 }
 0x8a8   :  { %6224 = vmatpush3.bf16.msra.mxu0 %v7304_v32  ;;  %5807 = vmatprep.mubr.msk.f32.mxu0 %vm6620_vm3, %v6621_v26 }
 0x8a9   :  { %6225 = vmatprep.subr.bf16.mxu0 %v6619_v11 }
 0x8ac   :  { %6227 = vmatpush3.bf16.msra.mxu0 %v7327_v59 }
 0x8ad   :  { %6234 = vmatprep.subr.bf16.mxu0 %v6619_v11 }
 0x966   :  { %v5714_v25 = vpop.f32.mrb[42].mxu0  ;;  %v5734_v31 = vpop.f32.mrb[42].mxu1 }
 0x967   :  { %v2604_v30 = vadd.f32 %v5714_v25, %v7246_v56  ;;  %v2730_v33 = vadd.f32 %v5734_v31, %v7254_v1  ;;  %v2598_v34 = vpop.f32.mrb[43].mxu0  ;;  %v2724_v60 = vpop.f32.mrb[43].mxu1 }
 0x968   :  { %v2599_v27 = vadd.f32 %v7246_v56, %v2598_v34  ;;  %v2725_v61 = vadd.f32 %v7254_v1, %v2724_v60 }
 0x969   :  { %2614 = vst.msk [vmem:[#allocation3 + $0x38] sm:$0xff] %vm102_vm2, %v2604_v30  ;;  %2740 = vst.msk [vmem:[#allocation4 + $0x38] sm:$0xff] %vm102_vm2, %v2730_v33 }
 0x96a   :  { %2613 = vst.msk [vmem:[#allocation3 + $0x30] sm:$0xff] %vm102_vm2, %v2599_v27  ;;  %2739 = vst.msk [vmem:[#allocation4 + $0x30] sm:$0xff] %vm102_vm2, %v2725_v61  ;;  %v5745_v62 = vpop.f32.mrb[44].mxu0  ;;  %v2963_v63 = vpop.f32.mrb[44].mxu1  ;;  %v3356_v27 = vld [vmem:[#allocation3 + $0x8] sm:$0xff] }
 0x96b   :  { %v2826_v0 = vadd.f32 %v5745_v62, %v5016_v7  ;;  %v2964_v2 = vadd.f32 %v7371_v29, %v2963_v63  ;;  %v2820_v3 = vpop.f32.mrb[45].mxu0  ;;  %v5765_v56 = vpop.f32.mrb[45].mxu1  ;;  %v3364_v63 = vld [vmem:[#allocation4 + $0x8] sm:$0xff] }
 0x96c   :  { %v2821_v1 = vadd.f32 %v5016_v7, %v2820_v3 }
 0x96d   :  { %2860 = vst.msk [vmem:[#allocation5 + $0x8] sm:$0xff] %vm102_vm2, %v2826_v0  ;;  %v3120_v5 = vadd.f32 %v3119_v4, %v2964_v2 }
 0x96e   :  { %2859 = vst.msk [vmem:[#allocation5] sm:$0xff] %vm102_vm2, %v2821_v1  ;;  %v5748_v6 = vpop.f32.mrb[46].mxu0 }
 0x96f   :  { %v5040_v9 = vmul.f32 -1.442695, %v3120_v5  ;;  %v2836_v10 = vadd.f32 %v5748_v6, %v5016_v7  ;;  %v2830_v12 = vpop.f32.mrb[47].mxu0 }
 0x970   :  { %v2831_v13 = vadd.f32 %v5016_v7, %v2830_v12 }
 0x971   :  { %6439 = vpow2.f32 %v5040_v9  ;;  %2862 = vst.msk [vmem:[#allocation5 + $0x18] sm:$0xff] %vm102_vm2, %v2836_v10 }
 0x972   :  { %2861 = vst.msk [vmem:[#allocation5 + $0x10] sm:$0xff] %vm102_vm2, %v2831_v13  ;;  %v3039_v17 = vpop.f32.mrb[46].mxu1  ;;  %v5751_v18 = vpop.f32.mrb[48].mxu0 }
 0x973   :  { %v3040_v20 = vadd.f32 %v7380_v15, %v3039_v17  ;;  %v2846_v22 = vadd.f32 %v5751_v18, %v5016_v7  ;;  %v2840_v21 = vpop.f32.mrb[49].mxu0  ;;  %v5776_v23 = vpop.f32.mrb[47].mxu1 }
 0x974   :  { %v2841_v36 = vadd.f32 %v5016_v7, %v2840_v21  ;;  %v3372_v13 = vld [vmem:[#allocation5 + $0x8] sm:$0xff] }
 0x975   :  { %v3128_v37 = vadd.f32 %v3127_v35, %v3040_v20  ;;  %2864 = vst.msk [vmem:[#allocation5 + $0x28] sm:$0xff] %vm102_vm2, %v2846_v22  ;;  %v3135_v14 = vld [vmem:[#allocation5] sm:$0xff] }
 0x976   :  { %2863 = vst.msk [vmem:[#allocation5 + $0x20] sm:$0xff] %vm102_vm2, %v2841_v36  ;;  %v5754_v39 = vpop.f32.mrb[50].mxu0 }
 0x977   :  { %v5041_v40 = vmul.f32 -1.442695, %v3128_v37  ;;  %v2856_v41 = vadd.f32 %v5754_v39, %v5016_v7  ;;  %v2850_v42 = vpop.f32.mrb[51].mxu0 }
 0x978   :  { %v2851_v44 = vadd.f32 %v5016_v7, %v2850_v42  ;;  %v3593_v42 = vld [vmem:[#allocation3 + $0x10] sm:$0xff] }
 0x979   :  { %6441 = vpow2.f32 %v5041_v40  ;;  %2866 = vst.msk [vmem:[#allocation5 + $0x38] sm:$0xff] %vm102_vm2, %v2856_v41 }
 0x97a   :  { %2865 = vst.msk [vmem:[#allocation5 + $0x30] sm:$0xff] %vm102_vm2, %v2851_v44  ;;  %v3115_v45 = vpop.f32.mrb[52].mxu0 }
 0x97b   :  { %v6440_v8 = vpop.eup %6439  ;;  %v5787_v16 = vpop.f32.mrb[53].mxu0  ;;  %v3116_v47 = vadd.f32 %v7389_v48, %v3115_v45 }
 0x97c   :  { %v3124_v46 = vadd.f32 1.0, %v6440_v8  ;;  %v3601_v16 = vld [vmem:[#allocation4 + $0x10] sm:$0xff] }
 0x97e   :  { %6443 = vrcp.f32 %v3124_v46 }
 0x983   :  { %v6442_v49 = vpop.eup %6441 }
 0x984   :  { %v3132_v28 = vadd.f32 1.0, %v6442_v49 }
 0x986   :  { %6445 = vrcp.f32 %v3132_v28 }
 0x988   :  { %v6444_v50 = vpop.eup %6443 }
 0x989   :  { %v3136_v51 = vmul.f32 %v6444_v50, %v3116_v47 }
 0x98b   :  { %v3137_v52 = vadd.f32 %v3136_v51, %v3135_v14 }
 0x98d   :  { %6447 = vtanh.f32 %v3137_v52 }
 0x990   :  { %v6446_v54 = vpop.eup %6445 }
 0x991   :  { %v3139_v55 = vsub.f32 1.0, %v6446_v54  ;;  %v3141_v25 = vmul.f32 %v6446_v54, %v7302_v53 }
 0x997   :  { %v6448_v19 = vpop.eup %6447 }
 0x998   :  { %v3140_v58 = vmul.f32 %v6448_v19, %v3139_v55 }
 0x99a   :  { %v3142_v31 = vadd.f32 %v3141_v25, %v3140_v58  ;;  %v3609_v58 = vld [vmem:[#allocation5 + $0x10] sm:$0xff] }
 0x99c   :  { %5797 = vmatmul.mubr.msk.f32.vlgmr.msra.gmra.mrb[48].mxu1 %vm102_vm2, %v3142_v31  ;;  %5808 = vmatmul.mubr.msk.f32.vlgmr.msra.gmra.mrb[54].mxu0 %vm102_vm2, %v3142_v31 }
 0x99d   :  { %6230 = vmatpush3.bf16.msra.mxu1 %v7312_v57  ;;  %5818 = vmatprep.mubr.msk.f32.mxu1 %vm6620_vm3, %v6621_v26 }
 0x99e   :  { %6231 = vmatprep.subr.bf16.mxu1 %v6619_v11  ;;  %6236 = vmatpush3.bf16.msra.mxu0 %v7213_v38 }
 0x99f   :  { %6237 = vmatprep.subr.bf16.mxu0 %v6619_v11  ;;  %5829 = vmatprep.mubr.msk.f32.mxu0 %vm6620_vm3, %v6621_v26 }
 0x9a1   :  { %6233 = vmatpush3.bf16.msra.mxu1 %v7333_v24 }
 0x9a2   :  { %6240 = vmatprep.subr.bf16.mxu1 %v6619_v11  ;;  %6239 = vmatpush3.bf16.msra.mxu0 %v7225_v43 }
 0x9a3   :  { %6246 = vmatprep.subr.bf16.mxu0 %v6619_v11 }
 0x9a4   :  { %5819 = vmatmul.mubr.msk.f32.vlgmr.msra.gmra.mrb[50].mxu1 %vm102_vm2, %v3142_v31 }
 0x9a5   :  { %6242 = vmatpush3.bf16.msra.mxu1 %v7304_v32  ;;  %5840 = vmatprep.mubr.msk.f32.mxu1 %vm6620_vm3, %v6621_v26 }
 0x9a6   :  { %6243 = vmatprep.subr.bf16.mxu1 %v6619_v11 }
 0x9a9   :  { %6245 = vmatpush3.bf16.msra.mxu1 %v7327_v59 }
 0x9aa   :  { %6252 = vmatprep.subr.bf16.mxu1 %v6619_v11 }
 0xa6f   :  { %v3212_v53 = vpop.f32.mrb[48].mxu1  ;;  %v3282_v30 = vpop.f32.mrb[54].mxu0 }
 0xa70   :  { %v3213_v33 = vadd.f32 %v7371_v29, %v3212_v53  ;;  %v5798_v34 = vpop.f32.mrb[49].mxu1  ;;  %v5809_v60 = vpop.f32.mrb[55].mxu0  ;;  %v3283_v61 = vadd.f32 %v7380_v15, %v3282_v30 }
 0xa72   :  { %v3357_v7 = vadd.f32 %v3356_v27, %v3213_v33  ;;  %v3365_v0 = vadd.f32 %v3364_v63, %v3283_v61 }
 0xa74   :  { %v5045_v62 = vmul.f32 -1.442695, %v3357_v7  ;;  %v5046_v56 = vmul.f32 -1.442695, %v3365_v0  ;;  %v3830_v0 = vld [vmem:[#allocation3 + $0x18] sm:$0xff] }
 0xa76   :  { %6449 = vpow2.f32 %v5045_v62 }
 0xa77   :  { %v3352_v2 = vpop.f32.mrb[50].mxu1  ;;  %6451 = vpow2.f32 %v5046_v56 }
 0xa78   :  { %v5820_v3 = vpop.f32.mrb[51].mxu1  ;;  %v3353_v9 = vadd.f32 %v7389_v48, %v3352_v2 }
 0xa80   :  { %v6450_v4 = vpop.eup %6449 }
 0xa81   :  { %v3361_v1 = vadd.f32 1.0, %v6450_v4  ;;  %v6452_v5 = vpop.eup %6451  ;;  %v3838_v4 = vld [vmem:[#allocation4 + $0x18] sm:$0xff] }
 0xa82   :  { %v3369_v6 = vadd.f32 1.0, %v6452_v5 }
 0xa83   :  { %6453 = vrcp.f32 %v3361_v1 }
 0xa84   :  { %6455 = vrcp.f32 %v3369_v6 }
 0xa8d   :  { %v6454_v10 = vpop.eup %6453 }
 0xa8e   :  { %v3373_v12 = vmul.f32 %v6454_v10, %v3353_v9  ;;  %v6456_v18 = vpop.eup %6455 }
 0xa8f   :  { %v3376_v20 = vsub.f32 1.0, %v6456_v18  ;;  %v3378_v23 = vmul.f32 %v6456_v18, %v3142_v31 }
 0xa90   :  { %v3374_v17 = vadd.f32 %v3373_v12, %v3372_v13 }
 0xa92   :  { %6457 = vtanh.f32 %v3374_v17 }
 0xa9c   :  { %v6458_v22 = vpop.eup %6457 }
 0xa9d   :  { %v3377_v21 = vmul.f32 %v6458_v22, %v3376_v20 }
 0xa9f   :  { %v3379_v35 = vadd.f32 %v3378_v23, %v3377_v21  ;;  %v3846_v21 = vld [vmem:[#allocation5 + $0x18] sm:$0xff] }
 0xaa1   :  { %5830 = vmatmul.mubr.msk.f32.vlgmr.msra.gmra.mrb[56].mxu0 %vm102_vm2, %v3379_v35  ;;  %5841 = vmatmul.mubr.msk.f32.vlgmr.msra.gmra.mrb[52].mxu1 %vm102_vm2, %v3379_v35 }
 0xaa2   :  { %6248 = vmatpush3.bf16.msra.mxu0 %v7312_v57  ;;  %5851 = vmatprep.mubr.msk.f32.mxu0 %vm6620_vm3, %v6621_v26 }
 0xaa3   :  { %6249 = vmatprep.subr.bf16.mxu0 %v6619_v11  ;;  %6254 = vmatpush3.bf16.msra.mxu1 %v7213_v38 }
 0xaa4   :  { %6255 = vmatprep.subr.bf16.mxu1 %v6619_v11  ;;  %5862 = vmatprep.mubr.msk.f32.mxu1 %vm6620_vm3, %v6621_v26 }
 0xaa6   :  { %6251 = vmatpush3.bf16.msra.mxu0 %v7333_v24 }
 0xaa7   :  { %6258 = vmatprep.subr.bf16.mxu0 %v6619_v11  ;;  %6257 = vmatpush3.bf16.msra.mxu1 %v7225_v43 }
 0xaa8   :  { %6264 = vmatprep.subr.bf16.mxu1 %v6619_v11 }
 0xaa9   :  { %5852 = vmatmul.mubr.msk.f32.vlgmr.msra.gmra.mrb[58].mxu0 %vm102_vm2, %v3379_v35 }
 0xaaa   :  { %6260 = vmatpush3.bf16.msra.mxu0 %v7304_v32  ;;  %5873 = vmatprep.mubr.msk.f32.mxu0 %vm6620_vm3, %v6621_v26 }
 0xaab   :  { %6261 = vmatprep.subr.bf16.mxu0 %v6619_v11 }
 0xaae   :  { %6263 = vmatpush3.bf16.msra.mxu0 %v7327_v59 }
 0xaaf   :  { %6270 = vmatprep.subr.bf16.mxu0 %v6619_v11 }
 0xb74   :  { %v3449_v36 = vpop.f32.mrb[56].mxu0  ;;  %v3519_v37 = vpop.f32.mrb[52].mxu1 }
 0xb75   :  { %v3450_v39 = vadd.f32 %v7371_v29, %v3449_v36  ;;  %v5831_v40 = vpop.f32.mrb[57].mxu0  ;;  %v5842_v41 = vpop.f32.mrb[53].mxu1  ;;  %v3520_v44 = vadd.f32 %v7380_v15, %v3519_v37 }
 0xb77   :  { %v3594_v45 = vadd.f32 %v3593_v42, %v3450_v39  ;;  %v3602_v46 = vadd.f32 %v3601_v16, %v3520_v44 }
 0xb79   :  { %v5050_v8 = vmul.f32 -1.442695, %v3594_v45  ;;  %v5051_v47 = vmul.f32 -1.442695, %v3602_v46  ;;  %v4067_v46 = vld [vmem:[#allocation3 + $0x20] sm:$0xff] }
 0xb7b   :  { %6459 = vpow2.f32 %v5050_v8 }
 0xb7c   :  { %v3589_v49 = vpop.f32.mrb[58].mxu0  ;;  %6461 = vpow2.f32 %v5051_v47 }
 0xb7d   :  { %v5853_v28 = vpop.f32.mrb[59].mxu0  ;;  %v3590_v54 = vadd.f32 %v7389_v48, %v3589_v49 }
 0xb85   :  { %v6460_v50 = vpop.eup %6459 }
 0xb86   :  { %v3598_v51 = vadd.f32 1.0, %v6460_v50  ;;  %v6462_v14 = vpop.eup %6461  ;;  %v4075_v50 = vld [vmem:[#allocation4 + $0x20] sm:$0xff] }
 0xb87   :  { %v3606_v52 = vadd.f32 1.0, %v6462_v14 }
 0xb88   :  { %6463 = vrcp.f32 %v3598_v51 }
 0xb89   :  { %6465 = vrcp.f32 %v3606_v52 }
 0xb92   :  { %v6464_v55 = vpop.eup %6463 }
 0xb93   :  { %v3610_v19 = vmul.f32 %v6464_v55, %v3590_v54  ;;  %v6466_v31 = vpop.eup %6465 }
 0xb94   :  { %v3613_v53 = vsub.f32 1.0, %v6466_v31  ;;  %v3615_v34 = vmul.f32 %v6466_v31, %v3379_v35 }
 0xb95   :  { %v3611_v25 = vadd.f32 %v3610_v19, %v3609_v58 }
 0xb97   :  { %6467 = vtanh.f32 %v3611_v25 }
 0xba1   :  { %v6468_v30 = vpop.eup %6467 }
 0xba2   :  { %v3614_v33 = vmul.f32 %v6468_v30, %v3613_v53 }
 0xba4   :  { %v3616_v60 = vadd.f32 %v3615_v34, %v3614_v33  ;;  %v4083_v33 = vld [vmem:[#allocation5 + $0x20] sm:$0xff] }
 0xba6   :  { %5863 = vmatmul.mubr.msk.f32.vlgmr.msra.gmra.mrb[54].mxu1 %vm102_vm2, %v3616_v60  ;;  %5874 = vmatmul.mubr.msk.f32.vlgmr.msra.gmra.mrb[60].mxu0 %vm102_vm2, %v3616_v60 }
 0xba7   :  { %6266 = vmatpush3.bf16.msra.mxu1 %v7312_v57  ;;  %5884 = vmatprep.mubr.msk.f32.mxu1 %vm6620_vm3, %v6621_v26 }
 0xba8   :  { %6267 = vmatprep.subr.bf16.mxu1 %v6619_v11  ;;  %6272 = vmatpush3.bf16.msra.mxu0 %v7213_v38 }
 0xba9   :  { %6273 = vmatprep.subr.bf16.mxu0 %v6619_v11  ;;  %5895 = vmatprep.mubr.msk.f32.mxu0 %vm6620_vm3, %v6621_v26 }
 0xbab   :  { %6269 = vmatpush3.bf16.msra.mxu1 %v7333_v24 }
 0xbac   :  { %6276 = vmatprep.subr.bf16.mxu1 %v6619_v11  ;;  %6275 = vmatpush3.bf16.msra.mxu0 %v7225_v43 }
 0xbad   :  { %6282 = vmatprep.subr.bf16.mxu0 %v6619_v11 }
 0xbae   :  { %5885 = vmatmul.mubr.msk.f32.vlgmr.msra.gmra.mrb[56].mxu1 %vm102_vm2, %v3616_v60 }
 0xbaf   :  { %6278 = vmatpush3.bf16.msra.mxu1 %v7304_v32  ;;  %5906 = vmatprep.mubr.msk.f32.mxu1 %vm6620_vm3, %v6621_v26 }
 0xbb0   :  { %6279 = vmatprep.subr.bf16.mxu1 %v6619_v11 }
 0xbb3   :  { %6281 = vmatpush3.bf16.msra.mxu1 %v7327_v59 }
 0xbb4   :  { %6288 = vmatprep.subr.bf16.mxu1 %v6619_v11 }
 0xc79   :  { %v3686_v27 = vpop.f32.mrb[54].mxu1  ;;  %v3756_v61 = vpop.f32.mrb[60].mxu0 }
 0xc7a   :  { %v3687_v7 = vadd.f32 %v7371_v29, %v3686_v27  ;;  %v5864_v62 = vpop.f32.mrb[55].mxu1  ;;  %v5875_v63 = vpop.f32.mrb[61].mxu0  ;;  %v3757_v2 = vadd.f32 %v7380_v15, %v3756_v61 }
 0xc7c   :  { %v3831_v3 = vadd.f32 %v3830_v0, %v3687_v7  ;;  %v3839_v1 = vadd.f32 %v3838_v4, %v3757_v2 }
 0xc7e   :  { %v5055_v56 = vmul.f32 -1.442695, %v3831_v3  ;;  %v5056_v9 = vmul.f32 -1.442695, %v3839_v1  ;;  %v4304_v1 = vld [vmem:[#allocation3 + $0x28] sm:$0xff] }
 0xc80   :  { %6469 = vpow2.f32 %v5055_v56 }
 0xc81   :  { %v3826_v5 = vpop.f32.mrb[56].mxu1  ;;  %6471 = vpow2.f32 %v5056_v9 }
 0xc82   :  { %v5886_v6 = vpop.f32.mrb[57].mxu1  ;;  %v3827_v18 = vadd.f32 %v7389_v48, %v3826_v5 }
 0xc8a   :  { %v6470_v10 = vpop.eup %6469 }
 0xc8b   :  { %v3835_v12 = vadd.f32 1.0, %v6470_v10  ;;  %v6472_v13 = vpop.eup %6471  ;;  %v4312_v10 = vld [vmem:[#allocation4 + $0x28] sm:$0xff] }
 0xc8c   :  { %v3843_v17 = vadd.f32 1.0, %v6472_v13 }
 0xc8d   :  { %6473 = vrcp.f32 %v3835_v12 }
 0xc8e   :  { %6475 = vrcp.f32 %v3843_v17 }
 0xc97   :  { %v6474_v20 = vpop.eup %6473 }
 0xc98   :  { %v3847_v22 = vmul.f32 %v6474_v20, %v3827_v18  ;;  %v6476_v35 = vpop.eup %6475 }
 0xc99   :  { %v3850_v36 = vsub.f32 1.0, %v6476_v35  ;;  %v3852_v40 = vmul.f32 %v6476_v35, %v3616_v60 }
 0xc9a   :  { %v3848_v23 = vadd.f32 %v3847_v22, %v3846_v21 }
 0xc9c   :  { %6477 = vtanh.f32 %v3848_v23 }
 0xca6   :  { %v6478_v37 = vpop.eup %6477 }
 0xca7   :  { %v3851_v39 = vmul.f32 %v6478_v37, %v3850_v36 }
 0xca9   :  { %v3853_v41 = vadd.f32 %v3852_v40, %v3851_v39  ;;  %v4320_v39 = vld [vmem:[#allocation5 + $0x28] sm:$0xff] }
 0xcab   :  { %5896 = vmatmul.mubr.msk.f32.vlgmr.msra.gmra.mrb[62].mxu0 %vm102_vm2, %v3853_v41  ;;  %5907 = vmatmul.mubr.msk.f32.vlgmr.msra.gmra.mrb[58].mxu1 %vm102_vm2, %v3853_v41 }
 0xcac   :  { %6284 = vmatpush3.bf16.msra.mxu0 %v7312_v57  ;;  %5917 = vmatprep.mubr.msk.f32.mxu0 %vm6620_vm3, %v6621_v26 }
 0xcad   :  { %6285 = vmatprep.subr.bf16.mxu0 %v6619_v11  ;;  %6290 = vmatpush3.bf16.msra.mxu1 %v7213_v38 }
 0xcae   :  { %6291 = vmatprep.subr.bf16.mxu1 %v6619_v11  ;;  %5928 = vmatprep.mubr.msk.f32.mxu1 %vm6620_vm3, %v6621_v26 }
 0xcb0   :  { %6287 = vmatpush3.bf16.msra.mxu0 %v7333_v24 }
 0xcb1   :  { %6294 = vmatprep.subr.bf16.mxu0 %v6619_v11  ;;  %6293 = vmatpush3.bf16.msra.mxu1 %v7225_v43 }
 0xcb2   :  { %6300 = vmatprep.subr.bf16.mxu1 %v6619_v11 }
 0xcb3   :  { %5918 = vmatmul.mubr.msk.f32.vlgmr.msra.gmra.mrb[64].mxu0 %vm102_vm2, %v3853_v41 }
 0xcb4   :  { %6296 = vmatpush3.bf16.msra.mxu0 %v7304_v32  ;;  %5939 = vmatprep.mubr.msk.f32.mxu0 %vm6620_vm3, %v6621_v26 }
 0xcb5   :  { %6297 = vmatprep.subr.bf16.mxu0 %v6619_v11 }
 0xcb8   :  { %6299 = vmatpush3.bf16.msra.mxu0 %v7327_v59 }
 0xcb9   :  { %6306 = vmatprep.subr.bf16.mxu0 %v6619_v11 }
 0xd7e   :  { %v3923_v42 = vpop.f32.mrb[62].mxu0  ;;  %v3993_v44 = vpop.f32.mrb[58].mxu1 }
 0xd7f   :  { %v3924_v45 = vadd.f32 %v7371_v29, %v3923_v42  ;;  %v5897_v8 = vpop.f32.mrb[63].mxu0  ;;  %v5908_v16 = vpop.f32.mrb[59].mxu1  ;;  %v3994_v49 = vadd.f32 %v7380_v15, %v3993_v44 }
 0xd81   :  { %v4068_v28 = vadd.f32 %v4067_v46, %v3924_v45  ;;  %v4076_v51 = vadd.f32 %v4075_v50, %v3994_v49 }
 0xd83   :  { %v5060_v47 = vmul.f32 -1.442695, %v4068_v28  ;;  %v5061_v54 = vmul.f32 -1.442695, %v4076_v51 }
 0xd85   :  { %6479 = vpow2.f32 %v5060_v47  ;;  %v4541_v47 = vld [vmem:[#allocation3 + $0x30] sm:$0xff] }
 0xd86   :  { %v4063_v14 = vpop.f32.mrb[64].mxu0  ;;  %6481 = vpow2.f32 %v5061_v54 }
 0xd87   :  { %v5919_v52 = vpop.f32.mrb[65].mxu0  ;;  %v4064_v31 = vadd.f32 %v7389_v48, %v4063_v14  ;;  %v4549_v14 = vld [vmem:[#allocation4 + $0x30] sm:$0xff] }
 0xd8f   :  { %v6480_v55 = vpop.eup %6479 }
 0xd90   :  { %v4072_v19 = vadd.f32 1.0, %v6480_v55  ;;  %v6482_v58 = vpop.eup %6481 }
 0xd91   :  { %v4080_v25 = vadd.f32 1.0, %v6482_v58 }
 0xd92   :  { %6483 = vrcp.f32 %v4072_v19 }
 0xd93   :  { %6485 = vrcp.f32 %v4080_v25 }
 0xd9c   :  { %v6484_v53 = vpop.eup %6483 }
 0xd9d   :  { %v4084_v30 = vmul.f32 %v6484_v53, %v4064_v31  ;;  %v6486_v60 = vpop.eup %6485 }
 0xd9e   :  { %v4087_v27 = vsub.f32 1.0, %v6486_v60  ;;  %v4089_v62 = vmul.f32 %v6486_v60, %v3853_v41 }
 0xd9f   :  { %v4085_v34 = vadd.f32 %v4084_v30, %v4083_v33 }
 0xda1   :  { %6487 = vtanh.f32 %v4085_v34  ;;  %v4557_v34 = vld [vmem:[#allocation5 + $0x30] sm:$0xff] }
 0xdab   :  { %v6488_v61 = vpop.eup %6487 }
 0xdac   :  { %v4088_v7 = vmul.f32 %v6488_v61, %v4087_v27 }
 0xdae   :  { %v4090_v63 = vadd.f32 %v4089_v62, %v4088_v7 }
 0xdb0   :  { %5929 = vmatmul.mubr.msk.f32.vlgmr.msra.gmra.mrb[60].mxu1 %vm102_vm2, %v4090_v63  ;;  %5940 = vmatmul.mubr.msk.f32.vlgmr.msra.gmra.mrb[66].mxu0 %vm102_vm2, %v4090_v63 }
 0xdb1   :  { %6302 = vmatpush3.bf16.msra.mxu1 %v7312_v57  ;;  %5950 = vmatprep.mubr.msk.f32.mxu1 %vm6620_vm3, %v6621_v26 }
 0xdb2   :  { %6303 = vmatprep.subr.bf16.mxu1 %v6619_v11  ;;  %6308 = vmatpush3.bf16.msra.mxu0 %v7213_v38 }
 0xdb3   :  { %6309 = vmatprep.subr.bf16.mxu0 %v6619_v11  ;;  %5961 = vmatprep.mubr.msk.f32.mxu0 %vm6620_vm3, %v6621_v26 }
 0xdb5   :  { %6305 = vmatpush3.bf16.msra.mxu1 %v7333_v24 }
 0xdb6   :  { %6312 = vmatprep.subr.bf16.mxu1 %v6619_v11  ;;  %6311 = vmatpush3.bf16.msra.mxu0 %v7225_v43 }
 0xdb7   :  { %6318 = vmatprep.subr.bf16.mxu0 %v6619_v11 }
 0xdb8   :  { %5951 = vmatmul.mubr.msk.f32.vlgmr.msra.gmra.mrb[62].mxu1 %vm102_vm2, %v4090_v63 }
 0xdb9   :  { %6314 = vmatpush3.bf16.msra.mxu1 %v7304_v32  ;;  %5972 = vmatprep.mubr.msk.f32.mxu1 %vm6620_vm3, %v6621_v26 }
 0xdba   :  { %6315 = vmatprep.subr.bf16.mxu1 %v6619_v11 }
 0xdbd   :  { %6317 = vmatpush3.bf16.msra.mxu1 %v7327_v59 }
 0xdbe   :  { %6324 = vmatprep.subr.bf16.mxu1 %v6619_v11 }
 0xe83   :  { %v4160_v0 = vpop.f32.mrb[60].mxu1  ;;  %v4230_v2 = vpop.f32.mrb[66].mxu0 }
 0xe84   :  { %v4161_v3 = vadd.f32 %v7371_v29, %v4160_v0  ;;  %v5930_v56 = vpop.f32.mrb[61].mxu1  ;;  %v5941_v4 = vpop.f32.mrb[67].mxu0  ;;  %v4231_v5 = vadd.f32 %v7380_v15, %v4230_v2  ;;  %v4808_v2 = vld [vmem:[%s7584_s10] sm:$0xff] }
 0xe86   :  { %v4305_v6 = vadd.f32 %v4304_v1, %v4161_v3  ;;  %v4313_v12 = vadd.f32 %v4312_v10, %v4231_v5  ;;  %v4810_v3 = vld [vmem:[%s7584_s10 + $0x10] sm:$0xff]  ;;  %v4778_v10 = vld [vmem:[#allocation3 + $0x38] sm:$0xff] }
 0xe88   :  { %v5065_v9 = vmul.f32 -1.442695, %v4305_v6  ;;  %v5066_v18 = vmul.f32 -1.442695, %v4313_v12 }
 0xe8a   :  { %6489 = vpow2.f32 %v5065_v9 }
 0xe8b   :  { %v4300_v13 = vpop.f32.mrb[62].mxu1  ;;  %6491 = vpow2.f32 %v5066_v18  ;;  %v4786_v18 = vld [vmem:[#allocation4 + $0x38] sm:$0xff] }
 0xe8c   :  { %v5952_v17 = vpop.f32.mrb[63].mxu1  ;;  %v4301_v35 = vadd.f32 %v7389_v48, %v4300_v13 }
 0xe94   :  { %v6490_v20 = vpop.eup %6489 }
 0xe95   :  { %v4309_v22 = vadd.f32 1.0, %v6490_v20  ;;  %v6492_v21 = vpop.eup %6491 }
 0xe96   :  { %v4317_v23 = vadd.f32 1.0, %v6492_v21 }
 0xe97   :  { %6493 = vrcp.f32 %v4309_v22 }
 0xe98   :  { %6495 = vrcp.f32 %v4317_v23 }
 0xea1   :  { %v6494_v36 = vpop.eup %6493 }
 0xea2   :  { %v4321_v37 = vmul.f32 %v6494_v36, %v4301_v35  ;;  %v6496_v41 = vpop.eup %6495 }
 0xea3   :  { %v4324_v42 = vsub.f32 1.0, %v6496_v41  ;;  %v4326_v8 = vmul.f32 %v6496_v41, %v4090_v63 }
 0xea4   :  { %v4322_v40 = vadd.f32 %v4321_v37, %v4320_v39 }
 0xea6   :  { %6497 = vtanh.f32 %v4322_v40 }
 0xeb0   :  { %v6498_v44 = vpop.eup %6497 }
 0xeb1   :  { %v4325_v45 = vmul.f32 %v6498_v44, %v4324_v42 }
 0xeb3   :  { %v4327_v16 = vadd.f32 %v4326_v8, %v4325_v45 }
 0xeb5   :  { %5962 = vmatmul.mubr.msk.f32.vlgmr.msra.gmra.mrb[68].mxu0 %vm102_vm2, %v4327_v16  ;;  %5973 = vmatmul.mubr.msk.f32.vlgmr.msra.gmra.mrb[64].mxu1 %vm102_vm2, %v4327_v16 }
 0xeb6   :  { %6320 = vmatpush3.bf16.msra.mxu0 %v7312_v57  ;;  %5983 = vmatprep.mubr.msk.f32.mxu0 %vm6620_vm3, %v6621_v26 }
 0xeb7   :  { %6321 = vmatprep.subr.bf16.mxu0 %v6619_v11  ;;  %6326 = vmatpush3.bf16.msra.mxu1 %v7213_v38 }
 0xeb8   :  { %6327 = vmatprep.subr.bf16.mxu1 %v6619_v11  ;;  %5994 = vmatprep.mubr.msk.f32.mxu1 %vm6620_vm3, %v6621_v26 }
 0xeba   :  { %6323 = vmatpush3.bf16.msra.mxu0 %v7333_v24 }
 0xebb   :  { %6330 = vmatprep.subr.bf16.mxu0 %v6619_v11  ;;  %6329 = vmatpush3.bf16.msra.mxu1 %v7225_v43 }
 0xebc   :  { %6336 = vmatprep.subr.bf16.mxu1 %v6619_v11 }
 0xebd   :  { %5984 = vmatmul.mubr.msk.f32.vlgmr.msra.gmra.mrb[70].mxu0 %vm102_vm2, %v4327_v16 }
 0xebe   :  { %6332 = vmatpush3.bf16.msra.mxu0 %v7304_v32  ;;  %6005 = vmatprep.mubr.msk.f32.mxu0 %vm6620_vm3, %v6621_v26 }
 0xebf   :  { %6333 = vmatprep.subr.bf16.mxu0 %v6619_v11 }
 0xec2   :  { %6335 = vmatpush3.bf16.msra.mxu0 %v7327_v59 }
 0xec3   :  { %6342 = vmatprep.subr.bf16.mxu0 %v6619_v11 }
 0xf88   :  { %v4397_v38 = vpop.f32.mrb[68].mxu0  ;;  %v4467_v46 = vpop.f32.mrb[64].mxu1 }
 0xf89   :  { %v4398_v49 = vadd.f32 %v7371_v29, %v4397_v38  ;;  %v5963_v43 = vpop.f32.mrb[69].mxu0  ;;  %v5974_v28 = vpop.f32.mrb[65].mxu1  ;;  %v4468_v50 = vadd.f32 %v7380_v15, %v4467_v46 }
 0xf8b   :  { %v4542_v51 = vadd.f32 %v4541_v47, %v4398_v49  ;;  %v4550_v52 = vadd.f32 %v4549_v14, %v4468_v50  ;;  %v5079_v49 = vld [vmem:[#allocation11] ss:$0 sm:$0xff] }
 0xf8d   :  { %v5070_v32 = vmul.f32 -1.442695, %v4542_v51  ;;  %v5071_v19 = vmul.f32 -1.442695, %v4550_v52 }
 0xf8f   :  { %6499 = vpow2.f32 %v5070_v32 }
 0xf90   :  { %v4537_v54 = vpop.f32.mrb[70].mxu0  ;;  %6501 = vpow2.f32 %v5071_v19 }
 0xf91   :  { %v5985_v55 = vpop.f32.mrb[71].mxu0  ;;  %v4538_v53 = vadd.f32 %v7389_v48, %v4537_v54 }
 0xf99   :  { %v6500_v59 = vpop.eup %6499 }
 0xf9a   :  { %v4546_v58 = vadd.f32 1.0, %v6500_v59  ;;  %v6502_v25 = vpop.eup %6501 }
 0xf9b   :  { %v4554_v31 = vadd.f32 1.0, %v6502_v25 }
 0xf9c   :  { %6503 = vrcp.f32 %v4546_v58 }
 0xf9d   :  { %6505 = vrcp.f32 %v4554_v31 }
 0xfa6   :  { %v6504_v30 = vpop.eup %6503 }
 0xfa7   :  { %v4558_v33 = vmul.f32 %v6504_v30, %v4538_v53  ;;  %v6506_v27 = vpop.eup %6505 }
 0xfa8   :  { %v4561_v61 = vsub.f32 1.0, %v6506_v27  ;;  %v4563_v63 = vmul.f32 %v6506_v27, %v4327_v16 }
 0xfa9   :  { %v4559_v60 = vadd.f32 %v4558_v33, %v4557_v34 }
 0xfab   :  { %6507 = vtanh.f32 %v4559_v60 }
 0xfb5   :  { %v6508_v7 = vpop.eup %6507 }
 0xfb6   :  { %v4562_v62 = vmul.f32 %v6508_v7, %v4561_v61 }
 0xfb8   :  { %v4564_v0 = vadd.f32 %v4563_v63, %v4562_v62 }
 0xfba   :  { %5995 = vmatmul.mubr.msk.f32.vlgmr.msra.gmra.mrb[66].mxu1 %vm102_vm2, %v4564_v0  ;;  %6006 = vmatmul.mubr.msk.f32.vlgmr.msra.gmra.mrb[72].mxu0 %vm102_vm2, %v4564_v0 }
 0xfbb   :  { %6338 = vmatpush3.bf16.msra.mxu1 %v7312_v57  ;;  %6016 = vmatprep.mubr.msk.f32.mxu1 %vm6620_vm3, %v6621_v26  ;;  %v4809_v57 = vld [vmem:[%s7584_s10 + $0x8] sm:$0xff] }
 0xfbc   :  { %6339 = vmatprep.subr.bf16.mxu1 %v6619_v11  ;;  %6027 = vmatprep.mubr.msk.f32.mxu0 %vm6620_vm3, %v6621_v26  ;;  %v6343_v56 = vpack.c.bf16 %v4809_v57, %v4808_v2  ;;  %v4811_v26 = vld [vmem:[%s7584_s10 + $0x18] sm:$0xff] }
 0xfbe   :  { %6344 = vmatpush3.bf16.msra.mxu0 %v6343_v56 }
 0xfbf   :  { %6341 = vmatpush3.bf16.msra.mxu1 %v7333_v24  ;;  %v6346_v24 = vpack.c.bf16 %v4811_v26, %v4810_v3  ;;  %6345 = vmatprep.subr.bf16.mxu0 %v6619_v11 }
 0xfc2   :  { %6017 = vmatmul.mubr.msk.f32.vlgmr.msra.gmra.mrb[68].mxu1 %vm102_vm2, %v4564_v0  ;;  %6347 = vmatpush3.bf16.msra.mxu0 %v6346_v24 }
0x108d   :  { %v4634_v4 = vpop.f32.mrb[66].mxu1  ;;  %v4704_v1 = vpop.f32.mrb[72].mxu0 }
0x108e   :  { %v4635_v5 = vadd.f32 %v7371_v29, %v4634_v4  ;;  %v5996_v6 = vpop.f32.mrb[67].mxu1  ;;  %v6007_v9 = vpop.f32.mrb[73].mxu0  ;;  %v4705_v12 = vadd.f32 %v7380_v15, %v4704_v1  ;;  %v4794_v15 = vld [vmem:[#allocation5 + $0x38] sm:$0xff] }
0x1090   :  { %v4779_v13 = vadd.f32 %v4778_v10, %v4635_v5  ;;  %v4787_v20 = vadd.f32 %v4786_v18, %v4705_v12 }
0x1092   :  { %v5075_v17 = vmul.f32 -1.442695, %v4779_v13  ;;  %v5076_v23 = vmul.f32 -1.442695, %v4787_v20 }
0x1094   :  { %6509 = vpow2.f32 %v5075_v17 }
0x1095   :  { %v4774_v22 = vpop.f32.mrb[68].mxu1  ;;  %6511 = vpow2.f32 %v5076_v23 }
0x1096   :  { %v6018_v21 = vpop.f32.mrb[69].mxu1  ;;  %v4775_v29 = vadd.f32 %v7389_v48, %v4774_v22 }
0x109e   :  { %v6510_v11 = vpop.eup %6509 }
0x109f   :  { %v4783_v35 = vadd.f32 1.0, %v6510_v11  ;;  %v6512_v36 = vpop.eup %6511 }
0x10a0   :  { %v4791_v37 = vadd.f32 1.0, %v6512_v36 }
0x10a1   :  { %6513 = vrcp.f32 %v4783_v35 }
0x10a2   :  { %6515 = vrcp.f32 %v4791_v37 }
0x10ab   :  { %v6514_v39 = vpop.eup %6513 }
0x10ac   :  { %v4795_v40 = vmul.f32 %v6514_v39, %v4775_v29  ;;  %v6516_v42 = vpop.eup %6515 }
0x10ad   :  { %v4798_v44 = vsub.f32 1.0, %v6516_v42  ;;  %v4800_v8 = vmul.f32 %v6516_v42, %v4564_v0 }
0x10ae   :  { %v4796_v41 = vadd.f32 %v4795_v40, %v4794_v15 }
0x10b0   :  { %6517 = vtanh.f32 %v4796_v41 }
0x10ba   :  { %v6518_v45 = vpop.eup %6517 }
0x10bb   :  { %v4799_v16 = vmul.f32 %v6518_v45, %v4798_v44 }
0x10bd   :  { %v4801_v38 = vadd.f32 %v4800_v8, %v4799_v16 }
0x10bf   :  { %5077 = vst.msk [vmem:[%s7587_s13 + $0x8] sm:$0xff] %vm102_vm2, %v4801_v38 }
0x10c6   :  { %v5078_v48 = vld [vmem:[%s7587_s13 + $0x8] sm:$0xff] }
0x10c7   :  { %v4807_v46 = vmax.f32 %v5078_v48, 0.0 }
0x10c9   :  { %6028 = vmatmul.mubr.msk.f32.vlgmr.msra.gmra.mrb[74].mxu0 %vm102_vm2, %v4807_v46 }
0x119c   :  { %v4888_v43 = vpop.f32.mrb[74].mxu0 }
0x119d   :  { %v4889_v28 = vadd.f32 %v5079_v49, %v4888_v43  ;;  %v6029_v47 = vpop.f32.mrb[75].mxu0 }
0x119f   :  { %4893 = vst.msk [vmem:[%s7586_s12] sm:$0xff] %vm4892_vm4, %v4889_v28 }
0x11a0   :  { %4902 = vsyncpa [#allocation7], 1 }
0x11a1   :  { %4903 = vsyncpa [#allocation9], 1 }
0x11a2   :  { %4904 = vsyncpa [#allocation12], 1 }

</bundles_post_ra>
